<compile_context>
chip_gen: v6e
topology: v6e:2x2x1
jax: 0.10.0
libtpu: 0.0.40
codegen_flags: <defaults>
</compile_context>

<pallas_src>
import functools

import jax
import jax.numpy as jnp
from jax.experimental import pallas as pl
from jax.experimental.pallas import tpu as pltpu

K = 7      # spatial-attention conv kernel size
PAD = 3    # padding for k=7 (matches SpatialAttention)


def _cbam_kernel(x_ref, w1_ref, w2_ref, cm_ref, wsa_ref, o_ref,
                 pmap_ref, st_ref, *, W, align):
    # x_ref   : (Bt, C, HW)           VMEM  lane-dense image slab
    # w1_ref  : (Cr, C)               VMEM  fc conv1 weight (1x1, no bias)
    # w2_ref  : (C, Cr)               VMEM  fc conv2 weight (1x1, no bias)
    # cm_ref  : (K, HW)               VMEM  per-dx column-validity masks (f32)
    # wsa_ref : (2*K*K,)              SMEM  7x7 spatial conv weight, [c, kh, kw]
    # o_ref   : (Bt, C, HW)           VMEM  output
    # pmap_ref: (2, Bt, HW + 2*align) VMEM  zero-haloed flat [avg, max] maps
    # st_ref  : (C, 2)                VMEM  per-image stacked [avg|max] stats / MLP out
    Bt, C, HW = x_ref.shape

    # Re-zero the halo every step (tiny) -> kernel is stateless across the
    # (possibly megacore-parallel) batch grid.
    pmap_ref[...] = jnp.zeros_like(pmap_ref)

    x1_all = []
    for b in range(Bt):
        xb = x_ref[b]                                             # (C, HW)
        if xb.dtype != jnp.float32:
            xb = xb.astype(jnp.float32)

        # ---------------- channel attention (fused avg/max MLP) ----------------
        st_ref[:, 0:1] = jnp.mean(xb, axis=-1, keepdims=True)     # (C, 1)
        st_ref[:, 1:2] = jnp.max(xb, axis=-1, keepdims=True)      # (C, 1)
        v = st_ref[...]                                           # (C, 2)
        h = jnp.maximum(
            jnp.dot(w1_ref[...], v, preferred_element_type=jnp.float32), 0.0)
        st_ref[...] = jnp.dot(w2_ref[...], h,
                              preferred_element_type=jnp.float32)  # (C, 2)
        ca = jax.nn.sigmoid(st_ref[:, 0:1] + st_ref[:, 1:2])       # (C, 1)

        x1 = xb * ca                                               # (C, HW)
        x1_all.append(x1)

        # -------- spatial avg/max maps, stored flat at a 128-aligned offset --------
        pmap_ref[0, b:b + 1, align:align + HW] = jnp.mean(x1, axis=0, keepdims=True)
        pmap_ref[1, b:b + 1, align:align + HW] = jnp.max(x1, axis=0, keepdims=True)

    # ---------------- 7x7 conv on the flat maps, batched over Bt ----------------
    # Tap (dy, dx) is a pure lane shift by dy*W + dx of the flat map; the
    # row/flat out-of-range reads hit the zero halo, column wrap is killed by
    # the per-dx mask (precomputed in the wrapper).
    acc = jnp.zeros((Bt, HW), jnp.float32)
    for dx in range(-PAD, PAD + 1):
        mdx = cm_ref[dx + PAD:dx + PAD + 1, :]                    # (1, HW)
        for dy in range(-PAD, PAD + 1):
            start = align + dy * W + dx
            w_a = wsa_ref[(dy + PAD) * K + (dx + PAD)]            # SMEM scalar
            w_m = wsa_ref[K * K + (dy + PAD) * K + (dx + PAD)]
            sh_a = pmap_ref[0, :, start:start + HW]               # (Bt, HW)
            sh_m = pmap_ref[1, :, start:start + HW]
            acc = acc + (w_a * sh_a + w_m * sh_m) * mdx

    # Stash sigmoid(acc) in the (no longer needed) avg-map rows so the final
    # per-image re-weight reads lane-aligned (1, HW) rows straight from a ref.
    pmap_ref[0, :, align:align + HW] = jax.nn.sigmoid(acc)

    for b in range(Bt):
        sa_b = pmap_ref[0, b:b + 1, align:align + HW]             # (1, HW)
        o_ref[b] = (x1_all[b] * sa_b).astype(o_ref.dtype)


def _pick_block_n(n, c, hw, itemsize, budget_bytes=8 * 1024 * 1024):
    """Images per grid step: largest divisor of n whose double-buffered
    in+out blocks stay within a conservative VMEM budget (safe on v7x 64MiB)."""
    per_img = 2 * c * hw * itemsize          # one input + one output block copy
    bt = max(1, budget_bytes // (2 * per_img))   # /2 for double buffering
    bt = int(min(bt, n))
    while n % bt:
        bt -= 1
    return bt


def cbam_forward(x, w1, w2, wsa, *, block_n=None):
    N, C, H, W = x.shape
    HW = H * W
    Cr = w1.shape[0]

    x2 = x.reshape(N, C, HW)                                # lane-dense view (free)
    w1 = jnp.asarray(w1, jnp.float32)                       # (Cr, C)
    w2 = jnp.asarray(w2, jnp.float32)                       # (C, Cr)
    wsa_flat = jnp.asarray(wsa, jnp.float32).reshape(-1)    # (2*K*K,) [c, kh, kw]

    # per-dx column-validity masks, hoisted out of the kernel
    col = jnp.arange(HW, dtype=jnp.int32) % W
    colmasks = jnp.stack(
        [((col + dx >= 0) & (col + dx < W)).astype(jnp.float32)
         for dx in range(-PAD, PAD + 1)], axis=0)           # (K, HW)

    # halo width: >= 3*W + 3, rounded up to 128 so the interior store is aligned
    align = ((PAD * W + PAD + 127) // 128) * 128

    bt = _pick_block_n(N, C, HW, x.dtype.itemsize) if block_n is None else block_n
    assert N % bt == 0, (N, bt)

    kernel = functools.partial(_cbam_kernel, W=W, align=align)

    out = pl.pallas_call(
        kernel,
        out_shape=jax.ShapeDtypeStruct((N, C, HW), x.dtype),
        grid_spec=pltpu.PrefetchScalarGridSpec(
            num_scalar_prefetch=0,
            grid=(N // bt,),
            in_specs=[
                pl.BlockSpec((bt, C, HW), lambda n: (n, 0, 0)),
                pl.BlockSpec((Cr, C), lambda n: (0, 0)),
                pl.BlockSpec((C, Cr), lambda n: (0, 0)),
                pl.BlockSpec((K, HW), lambda n: (0, 0)),
                pl.BlockSpec(memory_space=pltpu.MemorySpace.SMEM),
            ],
            out_specs=pl.BlockSpec((bt, C, HW), lambda n: (n, 0, 0)),
            scratch_shapes=[
                pltpu.VMEM((2, bt, HW + 2 * align), jnp.float32),
                pltpu.VMEM((C, 2), jnp.float32),
            ],
        ),
        compiler_params=pltpu.CompilerParams(
            dimension_semantics=("parallel",)),
    )(x2, w1, w2, colmasks, wsa_flat)
    return out.reshape(N, C, H, W)


def cbam_reference(x, w1, w2, wsa):
    """Pure-JAX reference matching the PyTorch CBAM forward."""
    hp = jax.lax.Precision.HIGHEST
    avg = x.mean(axis=(2, 3))                               # (N, C)
    mx = x.max(axis=(2, 3))                                 # (N, C)

    def fc(v):
        h = jnp.maximum(jnp.einsum('nc,rc->nr', v, w1, precision=hp), 0.0)
        return jnp.einsum('nr,cr->nc', h, w2, precision=hp)

    ca = jax.nn.sigmoid(fc(avg) + fc(mx))[:, :, None, None]
    x1 = x * ca
    a = x1.mean(axis=1, keepdims=True)
    m = x1.max(axis=1, keepdims=True)
    y = jnp.concatenate([a, m], axis=1)                     # (N, 2, H, W)
    sa = jax.lax.conv_general_dilated(
        y, wsa.reshape(1, 2, K, K), (1, 1), [(PAD, PAD), (PAD, PAD)],
        dimension_numbers=('NCHW', 'OIHW', 'NCHW'), precision=hp)
    return x1 * jax.nn.sigmoid(sa)


if __name__ == "__main__":
    key = jax.random.PRNGKey(0)
    k1, k2, k3, k4 = jax.random.split(key, 4)

    N, C, H, W = 2, 32, 16, 16      # ch=32 -> reduction 16 gives Cr=2
    Cr = C // 16

    x = jax.random.normal(k1, (N, C, H, W), jnp.float32)
    w1 = jax.random.normal(k2, (Cr, C), jnp.float32) * 0.1     # Conv2d(C, Cr, 1)
    w2 = jax.random.normal(k3, (C, Cr), jnp.float32) * 0.1     # Conv2d(Cr, C, 1)
    wsa = jax.random.normal(k4, (2, K, K), jnp.float32) * 0.1  # Conv2d(2, 1, 7)

    out = jax.block_until_ready(cbam_forward(x, w1, w2, wsa))

    ref = cbam_reference(x, w1, w2, wsa)
    assert out.shape == x.shape
    err = float(jnp.max(jnp.abs(out - ref)))
    assert jnp.allclose(out, ref, atol=1e-3, rtol=1e-3), f"max abs err = {err}"

    print("KERNEL_OK")
</pallas_src>

<mosaic_0001>
module attributes {stable_mosaic.version = 11 : i64} {
  func.func @_cbam_kernel(%arg0: i32, %arg1: memref<2x32x256xf32, #tpu.memory_space<vmem>>, %arg2: memref<2x32xf32, #tpu.memory_space<vmem>>, %arg3: memref<32x2xf32, #tpu.memory_space<vmem>>, %arg4: memref<7x256xf32, #tpu.memory_space<vmem>>, %arg5: memref<98xf32, #tpu.memory_space<smem>>, %arg6: memref<2x32x256xf32, #tpu.memory_space<vmem>>, %arg7: memref<2x2x512xf32, #tpu.memory_space<vmem>>, %arg8: memref<32x2xf32, #tpu.memory_space<vmem>>) attributes {dimension_semantics = [#tpu.dimension_semantics<parallel>], iteration_bounds = array<i64: 1>, scalar_prefetch = 0 : i64, scratch_operands = 2 : i64, tpu.core_type = #tpu.core_type<tc>, window_params = [{transform_indices = @transform_0, window_bounds = array<i64: 2, 32, 256>}, {pipeline_mode = #tpu.pipeline_mode<synchronous>, transform_indices = @transform_1, window_bounds = array<i64: 2, 32>}, {pipeline_mode = #tpu.pipeline_mode<synchronous>, transform_indices = @transform_2, window_bounds = array<i64: 32, 2>}, {pipeline_mode = #tpu.pipeline_mode<synchronous>, transform_indices = @transform_3, window_bounds = array<i64: 7, 256>}, {transform_indices = @transform_4, window_bounds = array<i64: 98>}, {transform_indices = @transform_5, window_bounds = array<i64: 2, 32, 256>}]} {
    %cst = arith.constant 0.000000e+00 : f32
    %0 = vector.broadcast %cst : f32 to vector<2x2x512xf32>
    %c0 = arith.constant 0 : index
    %c0_0 = arith.constant 0 : index
    %c0_1 = arith.constant 0 : index
    %1 = vector.load %arg7[%c0, %c0_0, %c0_1] : memref<2x2x512xf32, #tpu.memory_space<vmem>>, vector<2x2x512xf32>
    tpu.vector_store %arg7[%c0, %c0_0, %c0_1], %0 {strides = array<i32>} : memref<2x2x512xf32, #tpu.memory_space<vmem>>, vector<2x2x512xf32>,
    %c0_2 = arith.constant 0 : index
    %c0_3 = arith.constant 0 : index
    %c0_4 = arith.constant 0 : index
    %2 = vector.load %arg1[%c0_2, %c0_3, %c0_4] : memref<2x32x256xf32, #tpu.memory_space<vmem>>, vector<1x32x256xf32>
    %3 = vector.shape_cast %2 : vector<1x32x256xf32> to vector<32x256xf32>
    %cst_5 = arith.constant dense<0.000000e+00> : vector<32xf32>
    %4 = vector.multi_reduction <add>, %3, %cst_5 [1] : vector<32x256xf32> to vector<32xf32>
    %5 = vector.shape_cast %4 : vector<32xf32> to vector<32x1xf32>
    %cst_6 = arith.constant 2.560000e+02 : f32
    %6 = vector.broadcast %cst_6 : f32 to vector<32x1xf32>
    %7 = arith.divf %5, %6 : vector<32x1xf32>
    %c0_7 = arith.constant 0 : index
    %c0_8 = arith.constant 0 : index
    %8 = vector.load %arg8[%c0_7, %c0_8] : memref<32x2xf32, #tpu.memory_space<vmem>>, vector<32x1xf32>
    tpu.vector_store %arg8[%c0_7, %c0_8], %7 {strides = array<i32>} : memref<32x2xf32, #tpu.memory_space<vmem>>, vector<32x1xf32>,
    %cst_9 = arith.constant dense<0xFF800000> : vector<32xf32>
    %9 = vector.multi_reduction <maximumf>, %3, %cst_9 [1] : vector<32x256xf32> to vector<32xf32>
    %10 = vector.shape_cast %9 : vector<32xf32> to vector<32x1xf32>
    %c0_10 = arith.constant 0 : index
    %c1 = arith.constant 1 : index
    %11 = vector.load %arg8[%c0_10, %c1] : memref<32x2xf32, #tpu.memory_space<vmem>>, vector<32x1xf32>
    tpu.vector_store %arg8[%c0_10, %c1], %10 {strides = array<i32>} : memref<32x2xf32, #tpu.memory_space<vmem>>, vector<32x1xf32>,
    %c0_11 = arith.constant 0 : index
    %c0_12 = arith.constant 0 : index
    %12 = vector.load %arg8[%c0_11, %c0_12] : memref<32x2xf32, #tpu.memory_space<vmem>>, vector<32x2xf32>
    %c0_13 = arith.constant 0 : index
    %c0_14 = arith.constant 0 : index
    %13 = vector.load %arg2[%c0_13, %c0_14] : memref<2x32xf32, #tpu.memory_space<vmem>>, vector<2x32xf32>
    %cst_15 = arith.constant dense<0.000000e+00> : vector<2x2xf32>
    %14 = tpu.matmul %13, %12, %cst_15 {dimension_numbers = #tpu.dot_dimension_numbers<[1], [0], [0], [1], [0, 0, 1, 1], [], []>} : vector<2x32xf32>, vector<32x2xf32>, vector<2x2xf32> -> vector<2x2xf32>
    %cst_16 = arith.constant 0.000000e+00 : f32
    %15 = vector.broadcast %cst_16 : f32 to vector<2x2xf32>
    %16 = arith.maximumf %14, %15 : vector<2x2xf32>
    %c0_17 = arith.constant 0 : index
    %c0_18 = arith.constant 0 : index
    %17 = vector.load %arg3[%c0_17, %c0_18] : memref<32x2xf32, #tpu.memory_space<vmem>>, vector<32x2xf32>
    %cst_19 = arith.constant dense<0.000000e+00> : vector<32x2xf32>
    %18 = tpu.matmul %17, %16, %cst_19 {dimension_numbers = #tpu.dot_dimension_numbers<[1], [0], [0], [1], [0, 0, 1, 1], [], []>} : vector<32x2xf32>, vector<2x2xf32>, vector<32x2xf32> -> vector<32x2xf32>
    %c0_20 = arith.constant 0 : index
    %c0_21 = arith.constant 0 : index
    %19 = vector.load %arg8[%c0_20, %c0_21] : memref<32x2xf32, #tpu.memory_space<vmem>>, vector<32x2xf32>
    tpu.vector_store %arg8[%c0_20, %c0_21], %18 {strides = array<i32>} : memref<32x2xf32, #tpu.memory_space<vmem>>, vector<32x2xf32>,
    %c0_22 = arith.constant 0 : index
    %c0_23 = arith.constant 0 : index
    %20 = vector.load %arg8[%c0_22, %c0_23] : memref<32x2xf32, #tpu.memory_space<vmem>>, vector<32x1xf32>
    %c0_24 = arith.constant 0 : index
    %c1_25 = arith.constant 1 : index
    %21 = vector.load %arg8[%c0_24, %c1_25] : memref<32x2xf32, #tpu.memory_space<vmem>>, vector<32x1xf32>
    %22 = arith.addf %20, %21 : vector<32x1xf32>
    %23 = arith.negf %22 : vector<32x1xf32>
    %24 = math.exp %23 : vector<32x1xf32>
    %cst_26 = arith.constant 1.000000e+00 : f32
    %25 = vector.broadcast %cst_26 : f32 to vector<32x1xf32>
    %26 = arith.addf %25, %24 : vector<32x1xf32>
    %27 = arith.divf %25, %26 : vector<32x1xf32>
    %28 = vector.broadcast %27 : vector<32x1xf32> to vector<32x256xf32>
    %29 = arith.mulf %3, %28 : vector<32x256xf32>
    %cst_27 = arith.constant dense<0.000000e+00> : vector<256xf32>
    %30 = vector.multi_reduction <add>, %29, %cst_27 [0] : vector<32x256xf32> to vector<256xf32>
    %31 = vector.shape_cast %30 : vector<256xf32> to vector<1x256xf32>
    %cst_28 = arith.constant 3.200000e+01 : f32
    %32 = vector.broadcast %cst_28 : f32 to vector<1x256xf32>
    %33 = arith.divf %31, %32 : vector<1x256xf32>
    %c0_29 = arith.constant 0 : index
    %c0_30 = arith.constant 0 : index
    %c128 = arith.constant 128 : index
    %34 = vector.load %arg7[%c0_29, %c0_30, %c128] : memref<2x2x512xf32, #tpu.memory_space<vmem>>, vector<1x1x256xf32>
    %35 = vector.shape_cast %34 : vector<1x1x256xf32> to vector<1x256xf32>
    %36 = vector.shape_cast %33 : vector<1x256xf32> to vector<1x1x256xf32>
    tpu.vector_store %arg7[%c0_29, %c0_30, %c128], %36 {strides = array<i32>} : memref<2x2x512xf32, #tpu.memory_space<vmem>>, vector<1x1x256xf32>,
    %cst_31 = arith.constant dense<0xFF800000> : vector<256xf32>
    %37 = vector.multi_reduction <maximumf>, %29, %cst_31 [0] : vector<32x256xf32> to vector<256xf32>
    %38 = vector.shape_cast %37 : vector<256xf32> to vector<1x256xf32>
    %c1_32 = arith.constant 1 : index
    %c0_33 = arith.constant 0 : index
    %c128_34 = arith.constant 128 : index
    %39 = vector.load %arg7[%c1_32, %c0_33, %c128_34] : memref<2x2x512xf32, #tpu.memory_space<vmem>>, vector<1x1x256xf32>
    %40 = vector.shape_cast %39 : vector<1x1x256xf32> to vector<1x256xf32>
    %41 = vector.shape_cast %38 : vector<1x256xf32> to vector<1x1x256xf32>
    tpu.vector_store %arg7[%c1_32, %c0_33, %c128_34], %41 {strides = array<i32>} : memref<2x2x512xf32, #tpu.memory_space<vmem>>, vector<1x1x256xf32>,
    %c1_35 = arith.constant 1 : index
    %c0_36 = arith.constant 0 : index
    %c0_37 = arith.constant 0 : index
    %42 = vector.load %arg1[%c1_35, %c0_36, %c0_37] : memref<2x32x256xf32, #tpu.memory_space<vmem>>, vector<1x32x256xf32>
    %43 = vector.shape_cast %42 : vector<1x32x256xf32> to vector<32x256xf32>
    %cst_38 = arith.constant dense<0.000000e+00> : vector<32xf32>
    %44 = vector.multi_reduction <add>, %43, %cst_38 [1] : vector<32x256xf32> to vector<32xf32>
    %45 = vector.shape_cast %44 : vector<32xf32> to vector<32x1xf32>
    %cst_39 = arith.constant 2.560000e+02 : f32
    %46 = vector.broadcast %cst_39 : f32 to vector<32x1xf32>
    %47 = arith.divf %45, %46 : vector<32x1xf32>
    %c0_40 = arith.constant 0 : index
    %c0_41 = arith.constant 0 : index
    %48 = vector.load %arg8[%c0_40, %c0_41] : memref<32x2xf32, #tpu.memory_space<vmem>>, vector<32x1xf32>
    tpu.vector_store %arg8[%c0_40, %c0_41], %47 {strides = array<i32>} : memref<32x2xf32, #tpu.memory_space<vmem>>, vector<32x1xf32>,
    %cst_42 = arith.constant dense<0xFF800000> : vector<32xf32>
    %49 = vector.multi_reduction <maximumf>, %43, %cst_42 [1] : vector<32x256xf32> to vector<32xf32>
    %50 = vector.shape_cast %49 : vector<32xf32> to vector<32x1xf32>
    %c0_43 = arith.constant 0 : index
    %c1_44 = arith.constant 1 : index
    %51 = vector.load %arg8[%c0_43, %c1_44] : memref<32x2xf32, #tpu.memory_space<vmem>>, vector<32x1xf32>
    tpu.vector_store %arg8[%c0_43, %c1_44], %50 {strides = array<i32>} : memref<32x2xf32, #tpu.memory_space<vmem>>, vector<32x1xf32>,
    %c0_45 = arith.constant 0 : index
    %c0_46 = arith.constant 0 : index
    %52 = vector.load %arg8[%c0_45, %c0_46] : memref<32x2xf32, #tpu.memory_space<vmem>>, vector<32x2xf32>
    %c0_47 = arith.constant 0 : index
    %c0_48 = arith.constant 0 : index
    %53 = vector.load %arg2[%c0_47, %c0_48] : memref<2x32xf32, #tpu.memory_space<vmem>>, vector<2x32xf32>
    %cst_49 = arith.constant dense<0.000000e+00> : vector<2x2xf32>
    %54 = tpu.matmul %53, %52, %cst_49 {dimension_numbers = #tpu.dot_dimension_numbers<[1], [0], [0], [1], [0, 0, 1, 1], [], []>} : vector<2x32xf32>, vector<32x2xf32>, vector<2x2xf32> -> vector<2x2xf32>
    %cst_50 = arith.constant 0.000000e+00 : f32
    %55 = vector.broadcast %cst_50 : f32 to vector<2x2xf32>
    %56 = arith.maximumf %54, %55 : vector<2x2xf32>
    %c0_51 = arith.constant 0 : index
    %c0_52 = arith.constant 0 : index
    %57 = vector.load %arg3[%c0_51, %c0_52] : memref<32x2xf32, #tpu.memory_space<vmem>>, vector<32x2xf32>
    %cst_53 = arith.constant dense<0.000000e+00> : vector<32x2xf32>
    %58 = tpu.matmul %57, %56, %cst_53 {dimension_numbers = #tpu.dot_dimension_numbers<[1], [0], [0], [1], [0, 0, 1, 1], [], []>} : vector<32x2xf32>, vector<2x2xf32>, vector<32x2xf32> -> vector<32x2xf32>
    %c0_54 = arith.constant 0 : index
    %c0_55 = arith.constant 0 : index
    %59 = vector.load %arg8[%c0_54, %c0_55] : memref<32x2xf32, #tpu.memory_space<vmem>>, vector<32x2xf32>
    tpu.vector_store %arg8[%c0_54, %c0_55], %58 {strides = array<i32>} : memref<32x2xf32, #tpu.memory_space<vmem>>, vector<32x2xf32>,
    %c0_56 = arith.constant 0 : index
    %c0_57 = arith.constant 0 : index
    %60 = vector.load %arg8[%c0_56, %c0_57] : memref<32x2xf32, #tpu.memory_space<vmem>>, vector<32x1xf32>
    %c0_58 = arith.constant 0 : index
    %c1_59 = arith.constant 1 : index
    %61 = vector.load %arg8[%c0_58, %c1_59] : memref<32x2xf32, #tpu.memory_space<vmem>>, vector<32x1xf32>
    %62 = arith.addf %60, %61 : vector<32x1xf32>
    %63 = arith.negf %62 : vector<32x1xf32>
    %64 = math.exp %63 : vector<32x1xf32>
    %cst_60 = arith.constant 1.000000e+00 : f32
    %65 = vector.broadcast %cst_60 : f32 to vector<32x1xf32>
    %66 = arith.addf %65, %64 : vector<32x1xf32>
    %67 = arith.divf %65, %66 : vector<32x1xf32>
    %68 = vector.broadcast %67 : vector<32x1xf32> to vector<32x256xf32>
    %69 = arith.mulf %43, %68 : vector<32x256xf32>
    %cst_61 = arith.constant dense<0.000000e+00> : vector<256xf32>
    %70 = vector.multi_reduction <add>, %69, %cst_61 [0] : vector<32x256xf32> to vector<256xf32>
    %71 = vector.shape_cast %70 : vector<256xf32> to vector<1x256xf32>
    %cst_62 = arith.constant 3.200000e+01 : f32
    %72 = vector.broadcast %cst_62 : f32 to vector<1x256xf32>
    %73 = arith.divf %71, %72 : vector<1x256xf32>
    %c0_63 = arith.constant 0 : index
    %c1_64 = arith.constant 1 : index
    %c128_65 = arith.constant 128 : index
    %74 = vector.load %arg7[%c0_63, %c1_64, %c128_65] : memref<2x2x512xf32, #tpu.memory_space<vmem>>, vector<1x1x256xf32>
    %75 = vector.shape_cast %74 : vector<1x1x256xf32> to vector<1x256xf32>
    %76 = vector.shape_cast %73 : vector<1x256xf32> to vector<1x1x256xf32>
    tpu.vector_store %arg7[%c0_63, %c1_64, %c128_65], %76 {strides = array<i32>} : memref<2x2x512xf32, #tpu.memory_space<vmem>>, vector<1x1x256xf32>,
    %cst_66 = arith.constant dense<0xFF800000> : vector<256xf32>
    %77 = vector.multi_reduction <maximumf>, %69, %cst_66 [0] : vector<32x256xf32> to vector<256xf32>
    %78 = vector.shape_cast %77 : vector<256xf32> to vector<1x256xf32>
    %c1_67 = arith.constant 1 : index
    %c1_68 = arith.constant 1 : index
    %c128_69 = arith.constant 128 : index
    %79 = vector.load %arg7[%c1_67, %c1_68, %c128_69] : memref<2x2x512xf32, #tpu.memory_space<vmem>>, vector<1x1x256xf32>
    %80 = vector.shape_cast %79 : vector<1x1x256xf32> to vector<1x256xf32>
    %81 = vector.shape_cast %78 : vector<1x256xf32> to vector<1x1x256xf32>
    tpu.vector_store %arg7[%c1_67, %c1_68, %c128_69], %81 {strides = array<i32>} : memref<2x2x512xf32, #tpu.memory_space<vmem>>, vector<1x1x256xf32>,
    %cst_70 = arith.constant 0.000000e+00 : f32
    %82 = vector.broadcast %cst_70 : f32 to vector<2x256xf32>
    %c0_71 = arith.constant 0 : index
    %c0_72 = arith.constant 0 : index
    %83 = vector.load %arg4[%c0_71, %c0_72] : memref<7x256xf32, #tpu.memory_space<vmem>>, vector<1x256xf32>
    %c0_73 = arith.constant 0 : index
    %84 = memref.load %arg5[%c0_73] : memref<98xf32, #tpu.memory_space<smem>>
    %c49 = arith.constant 49 : index
    %85 = memref.load %arg5[%c49] : memref<98xf32, #tpu.memory_space<smem>>
    %c0_74 = arith.constant 0 : index
    %c0_75 = arith.constant 0 : index
    %c77 = arith.constant 77 : index
    %86 = vector.load %arg7[%c0_74, %c0_75, %c77] : memref<2x2x512xf32, #tpu.memory_space<vmem>>, vector<1x2x256xf32>
    %87 = vector.shape_cast %86 : vector<1x2x256xf32> to vector<2x256xf32>
    %c1_76 = arith.constant 1 : index
    %c0_77 = arith.constant 0 : index
    %c77_78 = arith.constant 77 : index
    %88 = vector.load %arg7[%c1_76, %c0_77, %c77_78] : memref<2x2x512xf32, #tpu.memory_space<vmem>>, vector<1x2x256xf32>
    %89 = vector.shape_cast %88 : vector<1x2x256xf32> to vector<2x256xf32>
    %90 = vector.broadcast %84 : f32 to vector<2x256xf32>
    %91 = arith.mulf %90, %87 : vector<2x256xf32>
    %92 = vector.broadcast %85 : f32 to vector<2x256xf32>
    %93 = arith.mulf %92, %89 : vector<2x256xf32>
    %94 = arith.addf %91, %93 : vector<2x256xf32>
    %95 = vector.broadcast %83 : vector<1x256xf32> to vector<2x256xf32>
    %96 = arith.mulf %94, %95 : vector<2x256xf32>
    %97 = arith.addf %82, %96 : vector<2x256xf32>
    %c7 = arith.constant 7 : index
    %98 = memref.load %arg5[%c7] : memref<98xf32, #tpu.memory_space<smem>>
    %c56 = arith.constant 56 : index
    %99 = memref.load %arg5[%c56] : memref<98xf32, #tpu.memory_space<smem>>
    %c0_79 = arith.constant 0 : index
    %c0_80 = arith.constant 0 : index
    %c93 = arith.constant 93 : index
    %100 = vector.load %arg7[%c0_79, %c0_80, %c93] : memref<2x2x512xf32, #tpu.memory_space<vmem>>, vector<1x2x256xf32>
    %101 = vector.shape_cast %100 : vector<1x2x256xf32> to vector<2x256xf32>
    %c1_81 = arith.constant 1 : index
    %c0_82 = arith.constant 0 : index
    %c93_83 = arith.constant 93 : index
    %102 = vector.load %arg7[%c1_81, %c0_82, %c93_83] : memref<2x2x512xf32, #tpu.memory_space<vmem>>, vector<1x2x256xf32>
    %103 = vector.shape_cast %102 : vector<1x2x256xf32> to vector<2x256xf32>
    %104 = vector.broadcast %98 : f32 to vector<2x256xf32>
    %105 = arith.mulf %104, %101 : vector<2x256xf32>
    %106 = vector.broadcast %99 : f32 to vector<2x256xf32>
    %107 = arith.mulf %106, %103 : vector<2x256xf32>
    %108 = arith.addf %105, %107 : vector<2x256xf32>
    %109 = vector.broadcast %83 : vector<1x256xf32> to vector<2x256xf32>
    %110 = arith.mulf %108, %109 : vector<2x256xf32>
    %111 = arith.addf %97, %110 : vector<2x256xf32>
    %c14 = arith.constant 14 : index
    %112 = memref.load %arg5[%c14] : memref<98xf32, #tpu.memory_space<smem>>
    %c63 = arith.constant 63 : index
    %113 = memref.load %arg5[%c63] : memref<98xf32, #tpu.memory_space<smem>>
    %c0_84 = arith.constant 0 : index
    %c0_85 = arith.constant 0 : index
    %c109 = arith.constant 109 : index
    %114 = vector.load %arg7[%c0_84, %c0_85, %c109] : memref<2x2x512xf32, #tpu.memory_space<vmem>>, vector<1x2x256xf32>
    %115 = vector.shape_cast %114 : vector<1x2x256xf32> to vector<2x256xf32>
    %c1_86 = arith.constant 1 : index
    %c0_87 = arith.constant 0 : index
    %c109_88 = arith.constant 109 : index
    %116 = vector.load %arg7[%c1_86, %c0_87, %c109_88] : memref<2x2x512xf32, #tpu.memory_space<vmem>>, vector<1x2x256xf32>
    %117 = vector.shape_cast %116 : vector<1x2x256xf32> to vector<2x256xf32>
    %118 = vector.broadcast %112 : f32 to vector<2x256xf32>
    %119 = arith.mulf %118, %115 : vector<2x256xf32>
    %120 = vector.broadcast %113 : f32 to vector<2x256xf32>
    %121 = arith.mulf %120, %117 : vector<2x256xf32>
    %122 = arith.addf %119, %121 : vector<2x256xf32>
    %123 = vector.broadcast %83 : vector<1x256xf32> to vector<2x256xf32>
    %124 = arith.mulf %122, %123 : vector<2x256xf32>
    %125 = arith.addf %111, %124 : vector<2x256xf32>
    %c21 = arith.constant 21 : index
    %126 = memref.load %arg5[%c21] : memref<98xf32, #tpu.memory_space<smem>>
    %c70 = arith.constant 70 : index
    %127 = memref.load %arg5[%c70] : memref<98xf32, #tpu.memory_space<smem>>
    %c0_89 = arith.constant 0 : index
    %c0_90 = arith.constant 0 : index
    %c125 = arith.constant 125 : index
    %128 = vector.load %arg7[%c0_89, %c0_90, %c125] : memref<2x2x512xf32, #tpu.memory_space<vmem>>, vector<1x2x256xf32>
    %129 = vector.shape_cast %128 : vector<1x2x256xf32> to vector<2x256xf32>
    %c1_91 = arith.constant 1 : index
    %c0_92 = arith.constant 0 : index
    %c125_93 = arith.constant 125 : index
    %130 = vector.load %arg7[%c1_91, %c0_92, %c125_93] : memref<2x2x512xf32, #tpu.memory_space<vmem>>, vector<1x2x256xf32>
    %131 = vector.shape_cast %130 : vector<1x2x256xf32> to vector<2x256xf32>
    %132 = vector.broadcast %126 : f32 to vector<2x256xf32>
    %133 = arith.mulf %132, %129 : vector<2x256xf32>
    %134 = vector.broadcast %127 : f32 to vector<2x256xf32>
    %135 = arith.mulf %134, %131 : vector<2x256xf32>
    %136 = arith.addf %133, %135 : vector<2x256xf32>
    %137 = vector.broadcast %83 : vector<1x256xf32> to vector<2x256xf32>
    %138 = arith.mulf %136, %137 : vector<2x256xf32>
    %139 = arith.addf %125, %138 : vector<2x256xf32>
    %c28 = arith.constant 28 : index
    %140 = memref.load %arg5[%c28] : memref<98xf32, #tpu.memory_space<smem>>
    %c77_94 = arith.constant 77 : index
    %141 = memref.load %arg5[%c77_94] : memref<98xf32, #tpu.memory_space<smem>>
    %c0_95 = arith.constant 0 : index
    %c0_96 = arith.constant 0 : index
    %c141 = arith.constant 141 : index
    %142 = vector.load %arg7[%c0_95, %c0_96, %c141] : memref<2x2x512xf32, #tpu.memory_space<vmem>>, vector<1x2x256xf32>
    %143 = vector.shape_cast %142 : vector<1x2x256xf32> to vector<2x256xf32>
    %c1_97 = arith.constant 1 : index
    %c0_98 = arith.constant 0 : index
    %c141_99 = arith.constant 141 : index
    %144 = vector.load %arg7[%c1_97, %c0_98, %c141_99] : memref<2x2x512xf32, #tpu.memory_space<vmem>>, vector<1x2x256xf32>
    %145 = vector.shape_cast %144 : vector<1x2x256xf32> to vector<2x256xf32>
    %146 = vector.broadcast %140 : f32 to vector<2x256xf32>
    %147 = arith.mulf %146, %143 : vector<2x256xf32>
    %148 = vector.broadcast %141 : f32 to vector<2x256xf32>
    %149 = arith.mulf %148, %145 : vector<2x256xf32>
    %150 = arith.addf %147, %149 : vector<2x256xf32>
    %151 = vector.broadcast %83 : vector<1x256xf32> to vector<2x256xf32>
    %152 = arith.mulf %150, %151 : vector<2x256xf32>
    %153 = arith.addf %139, %152 : vector<2x256xf32>
    %c35 = arith.constant 35 : index
    %154 = memref.load %arg5[%c35] : memref<98xf32, #tpu.memory_space<smem>>
    %c84 = arith.constant 84 : index
    %155 = memref.load %arg5[%c84] : memref<98xf32, #tpu.memory_space<smem>>
    %c0_100 = arith.constant 0 : index
    %c0_101 = arith.constant 0 : index
    %c157 = arith.constant 157 : index
    %156 = vector.load %arg7[%c0_100, %c0_101, %c157] : memref<2x2x512xf32, #tpu.memory_space<vmem>>, vector<1x2x256xf32>
    %157 = vector.shape_cast %156 : vector<1x2x256xf32> to vector<2x256xf32>
    %c1_102 = arith.constant 1 : index
    %c0_103 = arith.constant 0 : index
    %c157_104 = arith.constant 157 : index
    %158 = vector.load %arg7[%c1_102, %c0_103, %c157_104] : memref<2x2x512xf32, #tpu.memory_space<vmem>>, vector<1x2x256xf32>
    %159 = vector.shape_cast %158 : vector<1x2x256xf32> to vector<2x256xf32>
    %160 = vector.broadcast %154 : f32 to vector<2x256xf32>
    %161 = arith.mulf %160, %157 : vector<2x256xf32>
    %162 = vector.broadcast %155 : f32 to vector<2x256xf32>
    %163 = arith.mulf %162, %159 : vector<2x256xf32>
    %164 = arith.addf %161, %163 : vector<2x256xf32>
    %165 = vector.broadcast %83 : vector<1x256xf32> to vector<2x256xf32>
    %166 = arith.mulf %164, %165 : vector<2x256xf32>
    %167 = arith.addf %153, %166 : vector<2x256xf32>
    %c42 = arith.constant 42 : index
    %168 = memref.load %arg5[%c42] : memref<98xf32, #tpu.memory_space<smem>>
    %c91 = arith.constant 91 : index
    %169 = memref.load %arg5[%c91] : memref<98xf32, #tpu.memory_space<smem>>
    %c0_105 = arith.constant 0 : index
    %c0_106 = arith.constant 0 : index
    %c173 = arith.constant 173 : index
    %170 = vector.load %arg7[%c0_105, %c0_106, %c173] : memref<2x2x512xf32, #tpu.memory_space<vmem>>, vector<1x2x256xf32>
    %171 = vector.shape_cast %170 : vector<1x2x256xf32> to vector<2x256xf32>
    %c1_107 = arith.constant 1 : index
    %c0_108 = arith.constant 0 : index
    %c173_109 = arith.constant 173 : index
    %172 = vector.load %arg7[%c1_107, %c0_108, %c173_109] : memref<2x2x512xf32, #tpu.memory_space<vmem>>, vector<1x2x256xf32>
    %173 = vector.shape_cast %172 : vector<1x2x256xf32> to vector<2x256xf32>
    %174 = vector.broadcast %168 : f32 to vector<2x256xf32>
    %175 = arith.mulf %174, %171 : vector<2x256xf32>
    %176 = vector.broadcast %169 : f32 to vector<2x256xf32>
    %177 = arith.mulf %176, %173 : vector<2x256xf32>
    %178 = arith.addf %175, %177 : vector<2x256xf32>
    %179 = vector.broadcast %83 : vector<1x256xf32> to vector<2x256xf32>
    %180 = arith.mulf %178, %179 : vector<2x256xf32>
    %181 = arith.addf %167, %180 : vector<2x256xf32>
    %c1_110 = arith.constant 1 : index
    %c0_111 = arith.constant 0 : index
    %182 = vector.load %arg4[%c1_110, %c0_111] : memref<7x256xf32, #tpu.memory_space<vmem>>, vector<1x256xf32>
    %c1_112 = arith.constant 1 : index
    %183 = memref.load %arg5[%c1_112] : memref<98xf32, #tpu.memory_space<smem>>
    %c50 = arith.constant 50 : index
    %184 = memref.load %arg5[%c50] : memref<98xf32, #tpu.memory_space<smem>>
    %c0_113 = arith.constant 0 : index
    %c0_114 = arith.constant 0 : index
    %c78 = arith.constant 78 : index
    %185 = vector.load %arg7[%c0_113, %c0_114, %c78] : memref<2x2x512xf32, #tpu.memory_space<vmem>>, vector<1x2x256xf32>
    %186 = vector.shape_cast %185 : vector<1x2x256xf32> to vector<2x256xf32>
    %c1_115 = arith.constant 1 : index
    %c0_116 = arith.constant 0 : index
    %c78_117 = arith.constant 78 : index
    %187 = vector.load %arg7[%c1_115, %c0_116, %c78_117] : memref<2x2x512xf32, #tpu.memory_space<vmem>>, vector<1x2x256xf32>
    %188 = vector.shape_cast %187 : vector<1x2x256xf32> to vector<2x256xf32>
    %189 = vector.broadcast %183 : f32 to vector<2x256xf32>
    %190 = arith.mulf %189, %186 : vector<2x256xf32>
    %191 = vector.broadcast %184 : f32 to vector<2x256xf32>
    %192 = arith.mulf %191, %188 : vector<2x256xf32>
    %193 = arith.addf %190, %192 : vector<2x256xf32>
    %194 = vector.broadcast %182 : vector<1x256xf32> to vector<2x256xf32>
    %195 = arith.mulf %193, %194 : vector<2x256xf32>
    %196 = arith.addf %181, %195 : vector<2x256xf32>
    %c8 = arith.constant 8 : index
    %197 = memref.load %arg5[%c8] : memref<98xf32, #tpu.memory_space<smem>>
    %c57 = arith.constant 57 : index
    %198 = memref.load %arg5[%c57] : memref<98xf32, #tpu.memory_space<smem>>
    %c0_118 = arith.constant 0 : index
    %c0_119 = arith.constant 0 : index
    %c94 = arith.constant 94 : index
    %199 = vector.load %arg7[%c0_118, %c0_119, %c94] : memref<2x2x512xf32, #tpu.memory_space<vmem>>, vector<1x2x256xf32>
    %200 = vector.shape_cast %199 : vector<1x2x256xf32> to vector<2x256xf32>
    %c1_120 = arith.constant 1 : index
    %c0_121 = arith.constant 0 : index
    %c94_122 = arith.constant 94 : index
    %201 = vector.load %arg7[%c1_120, %c0_121, %c94_122] : memref<2x2x512xf32, #tpu.memory_space<vmem>>, vector<1x2x256xf32>
    %202 = vector.shape_cast %201 : vector<1x2x256xf32> to vector<2x256xf32>
    %203 = vector.broadcast %197 : f32 to vector<2x256xf32>
    %204 = arith.mulf %203, %200 : vector<2x256xf32>
    %205 = vector.broadcast %198 : f32 to vector<2x256xf32>
    %206 = arith.mulf %205, %202 : vector<2x256xf32>
    %207 = arith.addf %204, %206 : vector<2x256xf32>
    %208 = vector.broadcast %182 : vector<1x256xf32> to vector<2x256xf32>
    %209 = arith.mulf %207, %208 : vector<2x256xf32>
    %210 = arith.addf %196, %209 : vector<2x256xf32>
    %c15 = arith.constant 15 : index
    %211 = memref.load %arg5[%c15] : memref<98xf32, #tpu.memory_space<smem>>
    %c64 = arith.constant 64 : index
    %212 = memref.load %arg5[%c64] : memref<98xf32, #tpu.memory_space<smem>>
    %c0_123 = arith.constant 0 : index
    %c0_124 = arith.constant 0 : index
    %c110 = arith.constant 110 : index
    %213 = vector.load %arg7[%c0_123, %c0_124, %c110] : memref<2x2x512xf32, #tpu.memory_space<vmem>>, vector<1x2x256xf32>
    %214 = vector.shape_cast %213 : vector<1x2x256xf32> to vector<2x256xf32>
    %c1_125 = arith.constant 1 : index
    %c0_126 = arith.constant 0 : index
    %c110_127 = arith.constant 110 : index
    %215 = vector.load %arg7[%c1_125, %c0_126, %c110_127] : memref<2x2x512xf32, #tpu.memory_space<vmem>>, vector<1x2x256xf32>
    %216 = vector.shape_cast %215 : vector<1x2x256xf32> to vector<2x256xf32>
    %217 = vector.broadcast %211 : f32 to vector<2x256xf32>
    %218 = arith.mulf %217, %214 : vector<2x256xf32>
    %219 = vector.broadcast %212 : f32 to vector<2x256xf32>
    %220 = arith.mulf %219, %216 : vector<2x256xf32>
    %221 = arith.addf %218, %220 : vector<2x256xf32>
    %222 = vector.broadcast %182 : vector<1x256xf32> to vector<2x256xf32>
    %223 = arith.mulf %221, %222 : vector<2x256xf32>
    %224 = arith.addf %210, %223 : vector<2x256xf32>
    %c22 = arith.constant 22 : index
    %225 = memref.load %arg5[%c22] : memref<98xf32, #tpu.memory_space<smem>>
    %c71 = arith.constant 71 : index
    %226 = memref.load %arg5[%c71] : memref<98xf32, #tpu.memory_space<smem>>
    %c0_128 = arith.constant 0 : index
    %c0_129 = arith.constant 0 : index
    %c126 = arith.constant 126 : index
    %227 = vector.load %arg7[%c0_128, %c0_129, %c126] : memref<2x2x512xf32, #tpu.memory_space<vmem>>, vector<1x2x256xf32>
    %228 = vector.shape_cast %227 : vector<1x2x256xf32> to vector<2x256xf32>
    %c1_130 = arith.constant 1 : index
    %c0_131 = arith.constant 0 : index
    %c126_132 = arith.constant 126 : index
    %229 = vector.load %arg7[%c1_130, %c0_131, %c126_132] : memref<2x2x512xf32, #tpu.memory_space<vmem>>, vector<1x2x256xf32>
    %230 = vector.shape_cast %229 : vector<1x2x256xf32> to vector<2x256xf32>
    %231 = vector.broadcast %225 : f32 to vector<2x256xf32>
    %232 = arith.mulf %231, %228 : vector<2x256xf32>
    %233 = vector.broadcast %226 : f32 to vector<2x256xf32>
    %234 = arith.mulf %233, %230 : vector<2x256xf32>
    %235 = arith.addf %232, %234 : vector<2x256xf32>
    %236 = vector.broadcast %182 : vector<1x256xf32> to vector<2x256xf32>
    %237 = arith.mulf %235, %236 : vector<2x256xf32>
    %238 = arith.addf %224, %237 : vector<2x256xf32>
    %c29 = arith.constant 29 : index
    %239 = memref.load %arg5[%c29] : memref<98xf32, #tpu.memory_space<smem>>
    %c78_133 = arith.constant 78 : index
    %240 = memref.load %arg5[%c78_133] : memref<98xf32, #tpu.memory_space<smem>>
    %c0_134 = arith.constant 0 : index
    %c0_135 = arith.constant 0 : index
    %c142 = arith.constant 142 : index
    %241 = vector.load %arg7[%c0_134, %c0_135, %c142] : memref<2x2x512xf32, #tpu.memory_space<vmem>>, vector<1x2x256xf32>
    %242 = vector.shape_cast %241 : vector<1x2x256xf32> to vector<2x256xf32>
    %c1_136 = arith.constant 1 : index
    %c0_137 = arith.constant 0 : index
    %c142_138 = arith.constant 142 : index
    %243 = vector.load %arg7[%c1_136, %c0_137, %c142_138] : memref<2x2x512xf32, #tpu.memory_space<vmem>>, vector<1x2x256xf32>
    %244 = vector.shape_cast %243 : vector<1x2x256xf32> to vector<2x256xf32>
    %245 = vector.broadcast %239 : f32 to vector<2x256xf32>
    %246 = arith.mulf %245, %242 : vector<2x256xf32>
    %247 = vector.broadcast %240 : f32 to vector<2x256xf32>
    %248 = arith.mulf %247, %244 : vector<2x256xf32>
    %249 = arith.addf %246, %248 : vector<2x256xf32>
    %250 = vector.broadcast %182 : vector<1x256xf32> to vector<2x256xf32>
    %251 = arith.mulf %249, %250 : vector<2x256xf32>
    %252 = arith.addf %238, %251 : vector<2x256xf32>
    %c36 = arith.constant 36 : index
    %253 = memref.load %arg5[%c36] : memref<98xf32, #tpu.memory_space<smem>>
    %c85 = arith.constant 85 : index
    %254 = memref.load %arg5[%c85] : memref<98xf32, #tpu.memory_space<smem>>
    %c0_139 = arith.constant 0 : index
    %c0_140 = arith.constant 0 : index
    %c158 = arith.constant 158 : index
    %255 = vector.load %arg7[%c0_139, %c0_140, %c158] : memref<2x2x512xf32, #tpu.memory_space<vmem>>, vector<1x2x256xf32>
    %256 = vector.shape_cast %255 : vector<1x2x256xf32> to vector<2x256xf32>
    %c1_141 = arith.constant 1 : index
    %c0_142 = arith.constant 0 : index
    %c158_143 = arith.constant 158 : index
    %257 = vector.load %arg7[%c1_141, %c0_142, %c158_143] : memref<2x2x512xf32, #tpu.memory_space<vmem>>, vector<1x2x256xf32>
    %258 = vector.shape_cast %257 : vector<1x2x256xf32> to vector<2x256xf32>
    %259 = vector.broadcast %253 : f32 to vector<2x256xf32>
    %260 = arith.mulf %259, %256 : vector<2x256xf32>
    %261 = vector.broadcast %254 : f32 to vector<2x256xf32>
    %262 = arith.mulf %261, %258 : vector<2x256xf32>
    %263 = arith.addf %260, %262 : vector<2x256xf32>
    %264 = vector.broadcast %182 : vector<1x256xf32> to vector<2x256xf32>
    %265 = arith.mulf %263, %264 : vector<2x256xf32>
    %266 = arith.addf %252, %265 : vector<2x256xf32>
    %c43 = arith.constant 43 : index
    %267 = memref.load %arg5[%c43] : memref<98xf32, #tpu.memory_space<smem>>
    %c92 = arith.constant 92 : index
    %268 = memref.load %arg5[%c92] : memref<98xf32, #tpu.memory_space<smem>>
    %c0_144 = arith.constant 0 : index
    %c0_145 = arith.constant 0 : index
    %c174 = arith.constant 174 : index
    %269 = vector.load %arg7[%c0_144, %c0_145, %c174] : memref<2x2x512xf32, #tpu.memory_space<vmem>>, vector<1x2x256xf32>
    %270 = vector.shape_cast %269 : vector<1x2x256xf32> to vector<2x256xf32>
    %c1_146 = arith.constant 1 : index
    %c0_147 = arith.constant 0 : index
    %c174_148 = arith.constant 174 : index
    %271 = vector.load %arg7[%c1_146, %c0_147, %c174_148] : memref<2x2x512xf32, #tpu.memory_space<vmem>>, vector<1x2x256xf32>
    %272 = vector.shape_cast %271 : vector<1x2x256xf32> to vector<2x256xf32>
    %273 = vector.broadcast %267 : f32 to vector<2x256xf32>
    %274 = arith.mulf %273, %270 : vector<2x256xf32>
    %275 = vector.broadcast %268 : f32 to vector<2x256xf32>
    %276 = arith.mulf %275, %272 : vector<2x256xf32>
    %277 = arith.addf %274, %276 : vector<2x256xf32>
    %278 = vector.broadcast %182 : vector<1x256xf32> to vector<2x256xf32>
    %279 = arith.mulf %277, %278 : vector<2x256xf32>
    %280 = arith.addf %266, %279 : vector<2x256xf32>
    %c2 = arith.constant 2 : index
    %c0_149 = arith.constant 0 : index
    %281 = vector.load %arg4[%c2, %c0_149] : memref<7x256xf32, #tpu.memory_space<vmem>>, vector<1x256xf32>
    %c2_150 = arith.constant 2 : index
    %282 = memref.load %arg5[%c2_150] : memref<98xf32, #tpu.memory_space<smem>>
    %c51 = arith.constant 51 : index
    %283 = memref.load %arg5[%c51] : memref<98xf32, #tpu.memory_space<smem>>
    %c0_151 = arith.constant 0 : index
    %c0_152 = arith.constant 0 : index
    %c79 = arith.constant 79 : index
    %284 = vector.load %arg7[%c0_151, %c0_152, %c79] : memref<2x2x512xf32, #tpu.memory_space<vmem>>, vector<1x2x256xf32>
    %285 = vector.shape_cast %284 : vector<1x2x256xf32> to vector<2x256xf32>
    %c1_153 = arith.constant 1 : index
    %c0_154 = arith.constant 0 : index
    %c79_155 = arith.constant 79 : index
    %286 = vector.load %arg7[%c1_153, %c0_154, %c79_155] : memref<2x2x512xf32, #tpu.memory_space<vmem>>, vector<1x2x256xf32>
    %287 = vector.shape_cast %286 : vector<1x2x256xf32> to vector<2x256xf32>
    %288 = vector.broadcast %282 : f32 to vector<2x256xf32>
    %289 = arith.mulf %288, %285 : vector<2x256xf32>
    %290 = vector.broadcast %283 : f32 to vector<2x256xf32>
    %291 = arith.mulf %290, %287 : vector<2x256xf32>
    %292 = arith.addf %289, %291 : vector<2x256xf32>
    %293 = vector.broadcast %281 : vector<1x256xf32> to vector<2x256xf32>
    %294 = arith.mulf %292, %293 : vector<2x256xf32>
    %295 = arith.addf %280, %294 : vector<2x256xf32>
    %c9 = arith.constant 9 : index
    %296 = memref.load %arg5[%c9] : memref<98xf32, #tpu.memory_space<smem>>
    %c58 = arith.constant 58 : index
    %297 = memref.load %arg5[%c58] : memref<98xf32, #tpu.memory_space<smem>>
    %c0_156 = arith.constant 0 : index
    %c0_157 = arith.constant 0 : index
    %c95 = arith.constant 95 : index
    %298 = vector.load %arg7[%c0_156, %c0_157, %c95] : memref<2x2x512xf32, #tpu.memory_space<vmem>>, vector<1x2x256xf32>
    %299 = vector.shape_cast %298 : vector<1x2x256xf32> to vector<2x256xf32>
    %c1_158 = arith.constant 1 : index
    %c0_159 = arith.constant 0 : index
    %c95_160 = arith.constant 95 : index
    %300 = vector.load %arg7[%c1_158, %c0_159, %c95_160] : memref<2x2x512xf32, #tpu.memory_space<vmem>>, vector<1x2x256xf32>
    %301 = vector.shape_cast %300 : vector<1x2x256xf32> to vector<2x256xf32>
    %302 = vector.broadcast %296 : f32 to vector<2x256xf32>
    %303 = arith.mulf %302, %299 : vector<2x256xf32>
    %304 = vector.broadcast %297 : f32 to vector<2x256xf32>
    %305 = arith.mulf %304, %301 : vector<2x256xf32>
    %306 = arith.addf %303, %305 : vector<2x256xf32>
    %307 = vector.broadcast %281 : vector<1x256xf32> to vector<2x256xf32>
    %308 = arith.mulf %306, %307 : vector<2x256xf32>
    %309 = arith.addf %295, %308 : vector<2x256xf32>
    %c16 = arith.constant 16 : index
    %310 = memref.load %arg5[%c16] : memref<98xf32, #tpu.memory_space<smem>>
    %c65 = arith.constant 65 : index
    %311 = memref.load %arg5[%c65] : memref<98xf32, #tpu.memory_space<smem>>
    %c0_161 = arith.constant 0 : index
    %c0_162 = arith.constant 0 : index
    %c111 = arith.constant 111 : index
    %312 = vector.load %arg7[%c0_161, %c0_162, %c111] : memref<2x2x512xf32, #tpu.memory_space<vmem>>, vector<1x2x256xf32>
    %313 = vector.shape_cast %312 : vector<1x2x256xf32> to vector<2x256xf32>
    %c1_163 = arith.constant 1 : index
    %c0_164 = arith.constant 0 : index
    %c111_165 = arith.constant 111 : index
    %314 = vector.load %arg7[%c1_163, %c0_164, %c111_165] : memref<2x2x512xf32, #tpu.memory_space<vmem>>, vector<1x2x256xf32>
    %315 = vector.shape_cast %314 : vector<1x2x256xf32> to vector<2x256xf32>
    %316 = vector.broadcast %310 : f32 to vector<2x256xf32>
    %317 = arith.mulf %316, %313 : vector<2x256xf32>
    %318 = vector.broadcast %311 : f32 to vector<2x256xf32>
    %319 = arith.mulf %318, %315 : vector<2x256xf32>
    %320 = arith.addf %317, %319 : vector<2x256xf32>
    %321 = vector.broadcast %281 : vector<1x256xf32> to vector<2x256xf32>
    %322 = arith.mulf %320, %321 : vector<2x256xf32>
    %323 = arith.addf %309, %322 : vector<2x256xf32>
    %c23 = arith.constant 23 : index
    %324 = memref.load %arg5[%c23] : memref<98xf32, #tpu.memory_space<smem>>
    %c72 = arith.constant 72 : index
    %325 = memref.load %arg5[%c72] : memref<98xf32, #tpu.memory_space<smem>>
    %c0_166 = arith.constant 0 : index
    %c0_167 = arith.constant 0 : index
    %c127 = arith.constant 127 : index
    %326 = vector.load %arg7[%c0_166, %c0_167, %c127] : memref<2x2x512xf32, #tpu.memory_space<vmem>>, vector<1x2x256xf32>
    %327 = vector.shape_cast %326 : vector<1x2x256xf32> to vector<2x256xf32>
    %c1_168 = arith.constant 1 : index
    %c0_169 = arith.constant 0 : index
    %c127_170 = arith.constant 127 : index
    %328 = vector.load %arg7[%c1_168, %c0_169, %c127_170] : memref<2x2x512xf32, #tpu.memory_space<vmem>>, vector<1x2x256xf32>
    %329 = vector.shape_cast %328 : vector<1x2x256xf32> to vector<2x256xf32>
    %330 = vector.broadcast %324 : f32 to vector<2x256xf32>
    %331 = arith.mulf %330, %327 : vector<2x256xf32>
    %332 = vector.broadcast %325 : f32 to vector<2x256xf32>
    %333 = arith.mulf %332, %329 : vector<2x256xf32>
    %334 = arith.addf %331, %333 : vector<2x256xf32>
    %335 = vector.broadcast %281 : vector<1x256xf32> to vector<2x256xf32>
    %336 = arith.mulf %334, %335 : vector<2x256xf32>
    %337 = arith.addf %323, %336 : vector<2x256xf32>
    %c30 = arith.constant 30 : index
    %338 = memref.load %arg5[%c30] : memref<98xf32, #tpu.memory_space<smem>>
    %c79_171 = arith.constant 79 : index
    %339 = memref.load %arg5[%c79_171] : memref<98xf32, #tpu.memory_space<smem>>
    %c0_172 = arith.constant 0 : index
    %c0_173 = arith.constant 0 : index
    %c143 = arith.constant 143 : index
    %340 = vector.load %arg7[%c0_172, %c0_173, %c143] : memref<2x2x512xf32, #tpu.memory_space<vmem>>, vector<1x2x256xf32>
    %341 = vector.shape_cast %340 : vector<1x2x256xf32> to vector<2x256xf32>
    %c1_174 = arith.constant 1 : index
    %c0_175 = arith.constant 0 : index
    %c143_176 = arith.constant 143 : index
    %342 = vector.load %arg7[%c1_174, %c0_175, %c143_176] : memref<2x2x512xf32, #tpu.memory_space<vmem>>, vector<1x2x256xf32>
    %343 = vector.shape_cast %342 : vector<1x2x256xf32> to vector<2x256xf32>
    %344 = vector.broadcast %338 : f32 to vector<2x256xf32>
    %345 = arith.mulf %344, %341 : vector<2x256xf32>
    %346 = vector.broadcast %339 : f32 to vector<2x256xf32>
    %347 = arith.mulf %346, %343 : vector<2x256xf32>
    %348 = arith.addf %345, %347 : vector<2x256xf32>
    %349 = vector.broadcast %281 : vector<1x256xf32> to vector<2x256xf32>
    %350 = arith.mulf %348, %349 : vector<2x256xf32>
    %351 = arith.addf %337, %350 : vector<2x256xf32>
    %c37 = arith.constant 37 : index
    %352 = memref.load %arg5[%c37] : memref<98xf32, #tpu.memory_space<smem>>
    %c86 = arith.constant 86 : index
    %353 = memref.load %arg5[%c86] : memref<98xf32, #tpu.memory_space<smem>>
    %c0_177 = arith.constant 0 : index
    %c0_178 = arith.constant 0 : index
    %c159 = arith.constant 159 : index
    %354 = vector.load %arg7[%c0_177, %c0_178, %c159] : memref<2x2x512xf32, #tpu.memory_space<vmem>>, vector<1x2x256xf32>
    %355 = vector.shape_cast %354 : vector<1x2x256xf32> to vector<2x256xf32>
    %c1_179 = arith.constant 1 : index
    %c0_180 = arith.constant 0 : index
    %c159_181 = arith.constant 159 : index
    %356 = vector.load %arg7[%c1_179, %c0_180, %c159_181] : memref<2x2x512xf32, #tpu.memory_space<vmem>>, vector<1x2x256xf32>
    %357 = vector.shape_cast %356 : vector<1x2x256xf32> to vector<2x256xf32>
    %358 = vector.broadcast %352 : f32 to vector<2x256xf32>
    %359 = arith.mulf %358, %355 : vector<2x256xf32>
    %360 = vector.broadcast %353 : f32 to vector<2x256xf32>
    %361 = arith.mulf %360, %357 : vector<2x256xf32>
    %362 = arith.addf %359, %361 : vector<2x256xf32>
    %363 = vector.broadcast %281 : vector<1x256xf32> to vector<2x256xf32>
    %364 = arith.mulf %362, %363 : vector<2x256xf32>
    %365 = arith.addf %351, %364 : vector<2x256xf32>
    %c44 = arith.constant 44 : index
    %366 = memref.load %arg5[%c44] : memref<98xf32, #tpu.memory_space<smem>>
    %c93_182 = arith.constant 93 : index
    %367 = memref.load %arg5[%c93_182] : memref<98xf32, #tpu.memory_space<smem>>
    %c0_183 = arith.constant 0 : index
    %c0_184 = arith.constant 0 : index
    %c175 = arith.constant 175 : index
    %368 = vector.load %arg7[%c0_183, %c0_184, %c175] : memref<2x2x512xf32, #tpu.memory_space<vmem>>, vector<1x2x256xf32>
    %369 = vector.shape_cast %368 : vector<1x2x256xf32> to vector<2x256xf32>
    %c1_185 = arith.constant 1 : index
    %c0_186 = arith.constant 0 : index
    %c175_187 = arith.constant 175 : index
    %370 = vector.load %arg7[%c1_185, %c0_186, %c175_187] : memref<2x2x512xf32, #tpu.memory_space<vmem>>, vector<1x2x256xf32>
    %371 = vector.shape_cast %370 : vector<1x2x256xf32> to vector<2x256xf32>
    %372 = vector.broadcast %366 : f32 to vector<2x256xf32>
    %373 = arith.mulf %372, %369 : vector<2x256xf32>
    %374 = vector.broadcast %367 : f32 to vector<2x256xf32>
    %375 = arith.mulf %374, %371 : vector<2x256xf32>
    %376 = arith.addf %373, %375 : vector<2x256xf32>
    %377 = vector.broadcast %281 : vector<1x256xf32> to vector<2x256xf32>
    %378 = arith.mulf %376, %377 : vector<2x256xf32>
    %379 = arith.addf %365, %378 : vector<2x256xf32>
    %c3 = arith.constant 3 : index
    %c0_188 = arith.constant 0 : index
    %380 = vector.load %arg4[%c3, %c0_188] : memref<7x256xf32, #tpu.memory_space<vmem>>, vector<1x256xf32>
    %c3_189 = arith.constant 3 : index
    %381 = memref.load %arg5[%c3_189] : memref<98xf32, #tpu.memory_space<smem>>
    %c52 = arith.constant 52 : index
    %382 = memref.load %arg5[%c52] : memref<98xf32, #tpu.memory_space<smem>>
    %c0_190 = arith.constant 0 : index
    %c0_191 = arith.constant 0 : index
    %c80 = arith.constant 80 : index
    %383 = vector.load %arg7[%c0_190, %c0_191, %c80] : memref<2x2x512xf32, #tpu.memory_space<vmem>>, vector<1x2x256xf32>
    %384 = vector.shape_cast %383 : vector<1x2x256xf32> to vector<2x256xf32>
    %c1_192 = arith.constant 1 : index
    %c0_193 = arith.constant 0 : index
    %c80_194 = arith.constant 80 : index
    %385 = vector.load %arg7[%c1_192, %c0_193, %c80_194] : memref<2x2x512xf32, #tpu.memory_space<vmem>>, vector<1x2x256xf32>
    %386 = vector.shape_cast %385 : vector<1x2x256xf32> to vector<2x256xf32>
    %387 = vector.broadcast %381 : f32 to vector<2x256xf32>
    %388 = arith.mulf %387, %384 : vector<2x256xf32>
    %389 = vector.broadcast %382 : f32 to vector<2x256xf32>
    %390 = arith.mulf %389, %386 : vector<2x256xf32>
    %391 = arith.addf %388, %390 : vector<2x256xf32>
    %392 = vector.broadcast %380 : vector<1x256xf32> to vector<2x256xf32>
    %393 = arith.mulf %391, %392 : vector<2x256xf32>
    %394 = arith.addf %379, %393 : vector<2x256xf32>
    %c10 = arith.constant 10 : index
    %395 = memref.load %arg5[%c10] : memref<98xf32, #tpu.memory_space<smem>>
    %c59 = arith.constant 59 : index
    %396 = memref.load %arg5[%c59] : memref<98xf32, #tpu.memory_space<smem>>
    %c0_195 = arith.constant 0 : index
    %c0_196 = arith.constant 0 : index
    %c96 = arith.constant 96 : index
    %397 = vector.load %arg7[%c0_195, %c0_196, %c96] : memref<2x2x512xf32, #tpu.memory_space<vmem>>, vector<1x2x256xf32>
    %398 = vector.shape_cast %397 : vector<1x2x256xf32> to vector<2x256xf32>
    %c1_197 = arith.constant 1 : index
    %c0_198 = arith.constant 0 : index
    %c96_199 = arith.constant 96 : index
    %399 = vector.load %arg7[%c1_197, %c0_198, %c96_199] : memref<2x2x512xf32, #tpu.memory_space<vmem>>, vector<1x2x256xf32>
    %400 = vector.shape_cast %399 : vector<1x2x256xf32> to vector<2x256xf32>
    %401 = vector.broadcast %395 : f32 to vector<2x256xf32>
    %402 = arith.mulf %401, %398 : vector<2x256xf32>
    %403 = vector.broadcast %396 : f32 to vector<2x256xf32>
    %404 = arith.mulf %403, %400 : vector<2x256xf32>
    %405 = arith.addf %402, %404 : vector<2x256xf32>
    %406 = vector.broadcast %380 : vector<1x256xf32> to vector<2x256xf32>
    %407 = arith.mulf %405, %406 : vector<2x256xf32>
    %408 = arith.addf %394, %407 : vector<2x256xf32>
    %c17 = arith.constant 17 : index
    %409 = memref.load %arg5[%c17] : memref<98xf32, #tpu.memory_space<smem>>
    %c66 = arith.constant 66 : index
    %410 = memref.load %arg5[%c66] : memref<98xf32, #tpu.memory_space<smem>>
    %c0_200 = arith.constant 0 : index
    %c0_201 = arith.constant 0 : index
    %c112 = arith.constant 112 : index
    %411 = vector.load %arg7[%c0_200, %c0_201, %c112] : memref<2x2x512xf32, #tpu.memory_space<vmem>>, vector<1x2x256xf32>
    %412 = vector.shape_cast %411 : vector<1x2x256xf32> to vector<2x256xf32>
    %c1_202 = arith.constant 1 : index
    %c0_203 = arith.constant 0 : index
    %c112_204 = arith.constant 112 : index
    %413 = vector.load %arg7[%c1_202, %c0_203, %c112_204] : memref<2x2x512xf32, #tpu.memory_space<vmem>>, vector<1x2x256xf32>
    %414 = vector.shape_cast %413 : vector<1x2x256xf32> to vector<2x256xf32>
    %415 = vector.broadcast %409 : f32 to vector<2x256xf32>
    %416 = arith.mulf %415, %412 : vector<2x256xf32>
    %417 = vector.broadcast %410 : f32 to vector<2x256xf32>
    %418 = arith.mulf %417, %414 : vector<2x256xf32>
    %419 = arith.addf %416, %418 : vector<2x256xf32>
    %420 = vector.broadcast %380 : vector<1x256xf32> to vector<2x256xf32>
    %421 = arith.mulf %419, %420 : vector<2x256xf32>
    %422 = arith.addf %408, %421 : vector<2x256xf32>
    %c24 = arith.constant 24 : index
    %423 = memref.load %arg5[%c24] : memref<98xf32, #tpu.memory_space<smem>>
    %c73 = arith.constant 73 : index
    %424 = memref.load %arg5[%c73] : memref<98xf32, #tpu.memory_space<smem>>
    %c0_205 = arith.constant 0 : index
    %c0_206 = arith.constant 0 : index
    %c128_207 = arith.constant 128 : index
    %425 = vector.load %arg7[%c0_205, %c0_206, %c128_207] : memref<2x2x512xf32, #tpu.memory_space<vmem>>, vector<1x2x256xf32>
    %426 = vector.shape_cast %425 : vector<1x2x256xf32> to vector<2x256xf32>
    %c1_208 = arith.constant 1 : index
    %c0_209 = arith.constant 0 : index
    %c128_210 = arith.constant 128 : index
    %427 = vector.load %arg7[%c1_208, %c0_209, %c128_210] : memref<2x2x512xf32, #tpu.memory_space<vmem>>, vector<1x2x256xf32>
    %428 = vector.shape_cast %427 : vector<1x2x256xf32> to vector<2x256xf32>
    %429 = vector.broadcast %423 : f32 to vector<2x256xf32>
    %430 = arith.mulf %429, %426 : vector<2x256xf32>
    %431 = vector.broadcast %424 : f32 to vector<2x256xf32>
    %432 = arith.mulf %431, %428 : vector<2x256xf32>
    %433 = arith.addf %430, %432 : vector<2x256xf32>
    %434 = vector.broadcast %380 : vector<1x256xf32> to vector<2x256xf32>
    %435 = arith.mulf %433, %434 : vector<2x256xf32>
    %436 = arith.addf %422, %435 : vector<2x256xf32>
    %c31 = arith.constant 31 : index
    %437 = memref.load %arg5[%c31] : memref<98xf32, #tpu.memory_space<smem>>
    %c80_211 = arith.constant 80 : index
    %438 = memref.load %arg5[%c80_211] : memref<98xf32, #tpu.memory_space<smem>>
    %c0_212 = arith.constant 0 : index
    %c0_213 = arith.constant 0 : index
    %c144 = arith.constant 144 : index
    %439 = vector.load %arg7[%c0_212, %c0_213, %c144] : memref<2x2x512xf32, #tpu.memory_space<vmem>>, vector<1x2x256xf32>
    %440 = vector.shape_cast %439 : vector<1x2x256xf32> to vector<2x256xf32>
    %c1_214 = arith.constant 1 : index
    %c0_215 = arith.constant 0 : index
    %c144_216 = arith.constant 144 : index
    %441 = vector.load %arg7[%c1_214, %c0_215, %c144_216] : memref<2x2x512xf32, #tpu.memory_space<vmem>>, vector<1x2x256xf32>
    %442 = vector.shape_cast %441 : vector<1x2x256xf32> to vector<2x256xf32>
    %443 = vector.broadcast %437 : f32 to vector<2x256xf32>
    %444 = arith.mulf %443, %440 : vector<2x256xf32>
    %445 = vector.broadcast %438 : f32 to vector<2x256xf32>
    %446 = arith.mulf %445, %442 : vector<2x256xf32>
    %447 = arith.addf %444, %446 : vector<2x256xf32>
    %448 = vector.broadcast %380 : vector<1x256xf32> to vector<2x256xf32>
    %449 = arith.mulf %447, %448 : vector<2x256xf32>
    %450 = arith.addf %436, %449 : vector<2x256xf32>
    %c38 = arith.constant 38 : index
    %451 = memref.load %arg5[%c38] : memref<98xf32, #tpu.memory_space<smem>>
    %c87 = arith.constant 87 : index
    %452 = memref.load %arg5[%c87] : memref<98xf32, #tpu.memory_space<smem>>
    %c0_217 = arith.constant 0 : index
    %c0_218 = arith.constant 0 : index
    %c160 = arith.constant 160 : index
    %453 = vector.load %arg7[%c0_217, %c0_218, %c160] : memref<2x2x512xf32, #tpu.memory_space<vmem>>, vector<1x2x256xf32>
    %454 = vector.shape_cast %453 : vector<1x2x256xf32> to vector<2x256xf32>
    %c1_219 = arith.constant 1 : index
    %c0_220 = arith.constant 0 : index
    %c160_221 = arith.constant 160 : index
    %455 = vector.load %arg7[%c1_219, %c0_220, %c160_221] : memref<2x2x512xf32, #tpu.memory_space<vmem>>, vector<1x2x256xf32>
    %456 = vector.shape_cast %455 : vector<1x2x256xf32> to vector<2x256xf32>
    %457 = vector.broadcast %451 : f32 to vector<2x256xf32>
    %458 = arith.mulf %457, %454 : vector<2x256xf32>
    %459 = vector.broadcast %452 : f32 to vector<2x256xf32>
    %460 = arith.mulf %459, %456 : vector<2x256xf32>
    %461 = arith.addf %458, %460 : vector<2x256xf32>
    %462 = vector.broadcast %380 : vector<1x256xf32> to vector<2x256xf32>
    %463 = arith.mulf %461, %462 : vector<2x256xf32>
    %464 = arith.addf %450, %463 : vector<2x256xf32>
    %c45 = arith.constant 45 : index
    %465 = memref.load %arg5[%c45] : memref<98xf32, #tpu.memory_space<smem>>
    %c94_222 = arith.constant 94 : index
    %466 = memref.load %arg5[%c94_222] : memref<98xf32, #tpu.memory_space<smem>>
    %c0_223 = arith.constant 0 : index
    %c0_224 = arith.constant 0 : index
    %c176 = arith.constant 176 : index
    %467 = vector.load %arg7[%c0_223, %c0_224, %c176] : memref<2x2x512xf32, #tpu.memory_space<vmem>>, vector<1x2x256xf32>
    %468 = vector.shape_cast %467 : vector<1x2x256xf32> to vector<2x256xf32>
    %c1_225 = arith.constant 1 : index
    %c0_226 = arith.constant 0 : index
    %c176_227 = arith.constant 176 : index
    %469 = vector.load %arg7[%c1_225, %c0_226, %c176_227] : memref<2x2x512xf32, #tpu.memory_space<vmem>>, vector<1x2x256xf32>
    %470 = vector.shape_cast %469 : vector<1x2x256xf32> to vector<2x256xf32>
    %471 = vector.broadcast %465 : f32 to vector<2x256xf32>
    %472 = arith.mulf %471, %468 : vector<2x256xf32>
    %473 = vector.broadcast %466 : f32 to vector<2x256xf32>
    %474 = arith.mulf %473, %470 : vector<2x256xf32>
    %475 = arith.addf %472, %474 : vector<2x256xf32>
    %476 = vector.broadcast %380 : vector<1x256xf32> to vector<2x256xf32>
    %477 = arith.mulf %475, %476 : vector<2x256xf32>
    %478 = arith.addf %464, %477 : vector<2x256xf32>
    %c4 = arith.constant 4 : index
    %c0_228 = arith.constant 0 : index
    %479 = vector.load %arg4[%c4, %c0_228] : memref<7x256xf32, #tpu.memory_space<vmem>>, vector<1x256xf32>
    %c4_229 = arith.constant 4 : index
    %480 = memref.load %arg5[%c4_229] : memref<98xf32, #tpu.memory_space<smem>>
    %c53 = arith.constant 53 : index
    %481 = memref.load %arg5[%c53] : memref<98xf32, #tpu.memory_space<smem>>
    %c0_230 = arith.constant 0 : index
    %c0_231 = arith.constant 0 : index
    %c81 = arith.constant 81 : index
    %482 = vector.load %arg7[%c0_230, %c0_231, %c81] : memref<2x2x512xf32, #tpu.memory_space<vmem>>, vector<1x2x256xf32>
    %483 = vector.shape_cast %482 : vector<1x2x256xf32> to vector<2x256xf32>
    %c1_232 = arith.constant 1 : index
    %c0_233 = arith.constant 0 : index
    %c81_234 = arith.constant 81 : index
    %484 = vector.load %arg7[%c1_232, %c0_233, %c81_234] : memref<2x2x512xf32, #tpu.memory_space<vmem>>, vector<1x2x256xf32>
    %485 = vector.shape_cast %484 : vector<1x2x256xf32> to vector<2x256xf32>
    %486 = vector.broadcast %480 : f32 to vector<2x256xf32>
    %487 = arith.mulf %486, %483 : vector<2x256xf32>
    %488 = vector.broadcast %481 : f32 to vector<2x256xf32>
    %489 = arith.mulf %488, %485 : vector<2x256xf32>
    %490 = arith.addf %487, %489 : vector<2x256xf32>
    %491 = vector.broadcast %479 : vector<1x256xf32> to vector<2x256xf32>
    %492 = arith.mulf %490, %491 : vector<2x256xf32>
    %493 = arith.addf %478, %492 : vector<2x256xf32>
    %c11 = arith.constant 11 : index
    %494 = memref.load %arg5[%c11] : memref<98xf32, #tpu.memory_space<smem>>
    %c60 = arith.constant 60 : index
    %495 = memref.load %arg5[%c60] : memref<98xf32, #tpu.memory_space<smem>>
    %c0_235 = arith.constant 0 : index
    %c0_236 = arith.constant 0 : index
    %c97 = arith.constant 97 : index
    %496 = vector.load %arg7[%c0_235, %c0_236, %c97] : memref<2x2x512xf32, #tpu.memory_space<vmem>>, vector<1x2x256xf32>
    %497 = vector.shape_cast %496 : vector<1x2x256xf32> to vector<2x256xf32>
    %c1_237 = arith.constant 1 : index
    %c0_238 = arith.constant 0 : index
    %c97_239 = arith.constant 97 : index
    %498 = vector.load %arg7[%c1_237, %c0_238, %c97_239] : memref<2x2x512xf32, #tpu.memory_space<vmem>>, vector<1x2x256xf32>
    %499 = vector.shape_cast %498 : vector<1x2x256xf32> to vector<2x256xf32>
    %500 = vector.broadcast %494 : f32 to vector<2x256xf32>
    %501 = arith.mulf %500, %497 : vector<2x256xf32>
    %502 = vector.broadcast %495 : f32 to vector<2x256xf32>
    %503 = arith.mulf %502, %499 : vector<2x256xf32>
    %504 = arith.addf %501, %503 : vector<2x256xf32>
    %505 = vector.broadcast %479 : vector<1x256xf32> to vector<2x256xf32>
    %506 = arith.mulf %504, %505 : vector<2x256xf32>
    %507 = arith.addf %493, %506 : vector<2x256xf32>
    %c18 = arith.constant 18 : index
    %508 = memref.load %arg5[%c18] : memref<98xf32, #tpu.memory_space<smem>>
    %c67 = arith.constant 67 : index
    %509 = memref.load %arg5[%c67] : memref<98xf32, #tpu.memory_space<smem>>
    %c0_240 = arith.constant 0 : index
    %c0_241 = arith.constant 0 : index
    %c113 = arith.constant 113 : index
    %510 = vector.load %arg7[%c0_240, %c0_241, %c113] : memref<2x2x512xf32, #tpu.memory_space<vmem>>, vector<1x2x256xf32>
    %511 = vector.shape_cast %510 : vector<1x2x256xf32> to vector<2x256xf32>
    %c1_242 = arith.constant 1 : index
    %c0_243 = arith.constant 0 : index
    %c113_244 = arith.constant 113 : index
    %512 = vector.load %arg7[%c1_242, %c0_243, %c113_244] : memref<2x2x512xf32, #tpu.memory_space<vmem>>, vector<1x2x256xf32>
    %513 = vector.shape_cast %512 : vector<1x2x256xf32> to vector<2x256xf32>
    %514 = vector.broadcast %508 : f32 to vector<2x256xf32>
    %515 = arith.mulf %514, %511 : vector<2x256xf32>
    %516 = vector.broadcast %509 : f32 to vector<2x256xf32>
    %517 = arith.mulf %516, %513 : vector<2x256xf32>
    %518 = arith.addf %515, %517 : vector<2x256xf32>
    %519 = vector.broadcast %479 : vector<1x256xf32> to vector<2x256xf32>
    %520 = arith.mulf %518, %519 : vector<2x256xf32>
    %521 = arith.addf %507, %520 : vector<2x256xf32>
    %c25 = arith.constant 25 : index
    %522 = memref.load %arg5[%c25] : memref<98xf32, #tpu.memory_space<smem>>
    %c74 = arith.constant 74 : index
    %523 = memref.load %arg5[%c74] : memref<98xf32, #tpu.memory_space<smem>>
    %c0_245 = arith.constant 0 : index
    %c0_246 = arith.constant 0 : index
    %c129 = arith.constant 129 : index
    %524 = vector.load %arg7[%c0_245, %c0_246, %c129] : memref<2x2x512xf32, #tpu.memory_space<vmem>>, vector<1x2x256xf32>
    %525 = vector.shape_cast %524 : vector<1x2x256xf32> to vector<2x256xf32>
    %c1_247 = arith.constant 1 : index
    %c0_248 = arith.constant 0 : index
    %c129_249 = arith.constant 129 : index
    %526 = vector.load %arg7[%c1_247, %c0_248, %c129_249] : memref<2x2x512xf32, #tpu.memory_space<vmem>>, vector<1x2x256xf32>
    %527 = vector.shape_cast %526 : vector<1x2x256xf32> to vector<2x256xf32>
    %528 = vector.broadcast %522 : f32 to vector<2x256xf32>
    %529 = arith.mulf %528, %525 : vector<2x256xf32>
    %530 = vector.broadcast %523 : f32 to vector<2x256xf32>
    %531 = arith.mulf %530, %527 : vector<2x256xf32>
    %532 = arith.addf %529, %531 : vector<2x256xf32>
    %533 = vector.broadcast %479 : vector<1x256xf32> to vector<2x256xf32>
    %534 = arith.mulf %532, %533 : vector<2x256xf32>
    %535 = arith.addf %521, %534 : vector<2x256xf32>
    %c32 = arith.constant 32 : index
    %536 = memref.load %arg5[%c32] : memref<98xf32, #tpu.memory_space<smem>>
    %c81_250 = arith.constant 81 : index
    %537 = memref.load %arg5[%c81_250] : memref<98xf32, #tpu.memory_space<smem>>
    %c0_251 = arith.constant 0 : index
    %c0_252 = arith.constant 0 : index
    %c145 = arith.constant 145 : index
    %538 = vector.load %arg7[%c0_251, %c0_252, %c145] : memref<2x2x512xf32, #tpu.memory_space<vmem>>, vector<1x2x256xf32>
    %539 = vector.shape_cast %538 : vector<1x2x256xf32> to vector<2x256xf32>
    %c1_253 = arith.constant 1 : index
    %c0_254 = arith.constant 0 : index
    %c145_255 = arith.constant 145 : index
    %540 = vector.load %arg7[%c1_253, %c0_254, %c145_255] : memref<2x2x512xf32, #tpu.memory_space<vmem>>, vector<1x2x256xf32>
    %541 = vector.shape_cast %540 : vector<1x2x256xf32> to vector<2x256xf32>
    %542 = vector.broadcast %536 : f32 to vector<2x256xf32>
    %543 = arith.mulf %542, %539 : vector<2x256xf32>
    %544 = vector.broadcast %537 : f32 to vector<2x256xf32>
    %545 = arith.mulf %544, %541 : vector<2x256xf32>
    %546 = arith.addf %543, %545 : vector<2x256xf32>
    %547 = vector.broadcast %479 : vector<1x256xf32> to vector<2x256xf32>
    %548 = arith.mulf %546, %547 : vector<2x256xf32>
    %549 = arith.addf %535, %548 : vector<2x256xf32>
    %c39 = arith.constant 39 : index
    %550 = memref.load %arg5[%c39] : memref<98xf32, #tpu.memory_space<smem>>
    %c88 = arith.constant 88 : index
    %551 = memref.load %arg5[%c88] : memref<98xf32, #tpu.memory_space<smem>>
    %c0_256 = arith.constant 0 : index
    %c0_257 = arith.constant 0 : index
    %c161 = arith.constant 161 : index
    %552 = vector.load %arg7[%c0_256, %c0_257, %c161] : memref<2x2x512xf32, #tpu.memory_space<vmem>>, vector<1x2x256xf32>
    %553 = vector.shape_cast %552 : vector<1x2x256xf32> to vector<2x256xf32>
    %c1_258 = arith.constant 1 : index
    %c0_259 = arith.constant 0 : index
    %c161_260 = arith.constant 161 : index
    %554 = vector.load %arg7[%c1_258, %c0_259, %c161_260] : memref<2x2x512xf32, #tpu.memory_space<vmem>>, vector<1x2x256xf32>
    %555 = vector.shape_cast %554 : vector<1x2x256xf32> to vector<2x256xf32>
    %556 = vector.broadcast %550 : f32 to vector<2x256xf32>
    %557 = arith.mulf %556, %553 : vector<2x256xf32>
    %558 = vector.broadcast %551 : f32 to vector<2x256xf32>
    %559 = arith.mulf %558, %555 : vector<2x256xf32>
    %560 = arith.addf %557, %559 : vector<2x256xf32>
    %561 = vector.broadcast %479 : vector<1x256xf32> to vector<2x256xf32>
    %562 = arith.mulf %560, %561 : vector<2x256xf32>
    %563 = arith.addf %549, %562 : vector<2x256xf32>
    %c46 = arith.constant 46 : index
    %564 = memref.load %arg5[%c46] : memref<98xf32, #tpu.memory_space<smem>>
    %c95_261 = arith.constant 95 : index
    %565 = memref.load %arg5[%c95_261] : memref<98xf32, #tpu.memory_space<smem>>
    %c0_262 = arith.constant 0 : index
    %c0_263 = arith.constant 0 : index
    %c177 = arith.constant 177 : index
    %566 = vector.load %arg7[%c0_262, %c0_263, %c177] : memref<2x2x512xf32, #tpu.memory_space<vmem>>, vector<1x2x256xf32>
    %567 = vector.shape_cast %566 : vector<1x2x256xf32> to vector<2x256xf32>
    %c1_264 = arith.constant 1 : index
    %c0_265 = arith.constant 0 : index
    %c177_266 = arith.constant 177 : index
    %568 = vector.load %arg7[%c1_264, %c0_265, %c177_266] : memref<2x2x512xf32, #tpu.memory_space<vmem>>, vector<1x2x256xf32>
    %569 = vector.shape_cast %568 : vector<1x2x256xf32> to vector<2x256xf32>
    %570 = vector.broadcast %564 : f32 to vector<2x256xf32>
    %571 = arith.mulf %570, %567 : vector<2x256xf32>
    %572 = vector.broadcast %565 : f32 to vector<2x256xf32>
    %573 = arith.mulf %572, %569 : vector<2x256xf32>
    %574 = arith.addf %571, %573 : vector<2x256xf32>
    %575 = vector.broadcast %479 : vector<1x256xf32> to vector<2x256xf32>
    %576 = arith.mulf %574, %575 : vector<2x256xf32>
    %577 = arith.addf %563, %576 : vector<2x256xf32>
    %c5 = arith.constant 5 : index
    %c0_267 = arith.constant 0 : index
    %578 = vector.load %arg4[%c5, %c0_267] : memref<7x256xf32, #tpu.memory_space<vmem>>, vector<1x256xf32>
    %c5_268 = arith.constant 5 : index
    %579 = memref.load %arg5[%c5_268] : memref<98xf32, #tpu.memory_space<smem>>
    %c54 = arith.constant 54 : index
    %580 = memref.load %arg5[%c54] : memref<98xf32, #tpu.memory_space<smem>>
    %c0_269 = arith.constant 0 : index
    %c0_270 = arith.constant 0 : index
    %c82 = arith.constant 82 : index
    %581 = vector.load %arg7[%c0_269, %c0_270, %c82] : memref<2x2x512xf32, #tpu.memory_space<vmem>>, vector<1x2x256xf32>
    %582 = vector.shape_cast %581 : vector<1x2x256xf32> to vector<2x256xf32>
    %c1_271 = arith.constant 1 : index
    %c0_272 = arith.constant 0 : index
    %c82_273 = arith.constant 82 : index
    %583 = vector.load %arg7[%c1_271, %c0_272, %c82_273] : memref<2x2x512xf32, #tpu.memory_space<vmem>>, vector<1x2x256xf32>
    %584 = vector.shape_cast %583 : vector<1x2x256xf32> to vector<2x256xf32>
    %585 = vector.broadcast %579 : f32 to vector<2x256xf32>
    %586 = arith.mulf %585, %582 : vector<2x256xf32>
    %587 = vector.broadcast %580 : f32 to vector<2x256xf32>
    %588 = arith.mulf %587, %584 : vector<2x256xf32>
    %589 = arith.addf %586, %588 : vector<2x256xf32>
    %590 = vector.broadcast %578 : vector<1x256xf32> to vector<2x256xf32>
    %591 = arith.mulf %589, %590 : vector<2x256xf32>
    %592 = arith.addf %577, %591 : vector<2x256xf32>
    %c12 = arith.constant 12 : index
    %593 = memref.load %arg5[%c12] : memref<98xf32, #tpu.memory_space<smem>>
    %c61 = arith.constant 61 : index
    %594 = memref.load %arg5[%c61] : memref<98xf32, #tpu.memory_space<smem>>
    %c0_274 = arith.constant 0 : index
    %c0_275 = arith.constant 0 : index
    %c98 = arith.constant 98 : index
    %595 = vector.load %arg7[%c0_274, %c0_275, %c98] : memref<2x2x512xf32, #tpu.memory_space<vmem>>, vector<1x2x256xf32>
    %596 = vector.shape_cast %595 : vector<1x2x256xf32> to vector<2x256xf32>
    %c1_276 = arith.constant 1 : index
    %c0_277 = arith.constant 0 : index
    %c98_278 = arith.constant 98 : index
    %597 = vector.load %arg7[%c1_276, %c0_277, %c98_278] : memref<2x2x512xf32, #tpu.memory_space<vmem>>, vector<1x2x256xf32>
    %598 = vector.shape_cast %597 : vector<1x2x256xf32> to vector<2x256xf32>
    %599 = vector.broadcast %593 : f32 to vector<2x256xf32>
    %600 = arith.mulf %599, %596 : vector<2x256xf32>
    %601 = vector.broadcast %594 : f32 to vector<2x256xf32>
    %602 = arith.mulf %601, %598 : vector<2x256xf32>
    %603 = arith.addf %600, %602 : vector<2x256xf32>
    %604 = vector.broadcast %578 : vector<1x256xf32> to vector<2x256xf32>
    %605 = arith.mulf %603, %604 : vector<2x256xf32>
    %606 = arith.addf %592, %605 : vector<2x256xf32>
    %c19 = arith.constant 19 : index
    %607 = memref.load %arg5[%c19] : memref<98xf32, #tpu.memory_space<smem>>
    %c68 = arith.constant 68 : index
    %608 = memref.load %arg5[%c68] : memref<98xf32, #tpu.memory_space<smem>>
    %c0_279 = arith.constant 0 : index
    %c0_280 = arith.constant 0 : index
    %c114 = arith.constant 114 : index
    %609 = vector.load %arg7[%c0_279, %c0_280, %c114] : memref<2x2x512xf32, #tpu.memory_space<vmem>>, vector<1x2x256xf32>
    %610 = vector.shape_cast %609 : vector<1x2x256xf32> to vector<2x256xf32>
    %c1_281 = arith.constant 1 : index
    %c0_282 = arith.constant 0 : index
    %c114_283 = arith.constant 114 : index
    %611 = vector.load %arg7[%c1_281, %c0_282, %c114_283] : memref<2x2x512xf32, #tpu.memory_space<vmem>>, vector<1x2x256xf32>
    %612 = vector.shape_cast %611 : vector<1x2x256xf32> to vector<2x256xf32>
    %613 = vector.broadcast %607 : f32 to vector<2x256xf32>
    %614 = arith.mulf %613, %610 : vector<2x256xf32>
    %615 = vector.broadcast %608 : f32 to vector<2x256xf32>
    %616 = arith.mulf %615, %612 : vector<2x256xf32>
    %617 = arith.addf %614, %616 : vector<2x256xf32>
    %618 = vector.broadcast %578 : vector<1x256xf32> to vector<2x256xf32>
    %619 = arith.mulf %617, %618 : vector<2x256xf32>
    %620 = arith.addf %606, %619 : vector<2x256xf32>
    %c26 = arith.constant 26 : index
    %621 = memref.load %arg5[%c26] : memref<98xf32, #tpu.memory_space<smem>>
    %c75 = arith.constant 75 : index
    %622 = memref.load %arg5[%c75] : memref<98xf32, #tpu.memory_space<smem>>
    %c0_284 = arith.constant 0 : index
    %c0_285 = arith.constant 0 : index
    %c130 = arith.constant 130 : index
    %623 = vector.load %arg7[%c0_284, %c0_285, %c130] : memref<2x2x512xf32, #tpu.memory_space<vmem>>, vector<1x2x256xf32>
    %624 = vector.shape_cast %623 : vector<1x2x256xf32> to vector<2x256xf32>
    %c1_286 = arith.constant 1 : index
    %c0_287 = arith.constant 0 : index
    %c130_288 = arith.constant 130 : index
    %625 = vector.load %arg7[%c1_286, %c0_287, %c130_288] : memref<2x2x512xf32, #tpu.memory_space<vmem>>, vector<1x2x256xf32>
    %626 = vector.shape_cast %625 : vector<1x2x256xf32> to vector<2x256xf32>
    %627 = vector.broadcast %621 : f32 to vector<2x256xf32>
    %628 = arith.mulf %627, %624 : vector<2x256xf32>
    %629 = vector.broadcast %622 : f32 to vector<2x256xf32>
    %630 = arith.mulf %629, %626 : vector<2x256xf32>
    %631 = arith.addf %628, %630 : vector<2x256xf32>
    %632 = vector.broadcast %578 : vector<1x256xf32> to vector<2x256xf32>
    %633 = arith.mulf %631, %632 : vector<2x256xf32>
    %634 = arith.addf %620, %633 : vector<2x256xf32>
    %c33 = arith.constant 33 : index
    %635 = memref.load %arg5[%c33] : memref<98xf32, #tpu.memory_space<smem>>
    %c82_289 = arith.constant 82 : index
    %636 = memref.load %arg5[%c82_289] : memref<98xf32, #tpu.memory_space<smem>>
    %c0_290 = arith.constant 0 : index
    %c0_291 = arith.constant 0 : index
    %c146 = arith.constant 146 : index
    %637 = vector.load %arg7[%c0_290, %c0_291, %c146] : memref<2x2x512xf32, #tpu.memory_space<vmem>>, vector<1x2x256xf32>
    %638 = vector.shape_cast %637 : vector<1x2x256xf32> to vector<2x256xf32>
    %c1_292 = arith.constant 1 : index
    %c0_293 = arith.constant 0 : index
    %c146_294 = arith.constant 146 : index
    %639 = vector.load %arg7[%c1_292, %c0_293, %c146_294] : memref<2x2x512xf32, #tpu.memory_space<vmem>>, vector<1x2x256xf32>
    %640 = vector.shape_cast %639 : vector<1x2x256xf32> to vector<2x256xf32>
    %641 = vector.broadcast %635 : f32 to vector<2x256xf32>
    %642 = arith.mulf %641, %638 : vector<2x256xf32>
    %643 = vector.broadcast %636 : f32 to vector<2x256xf32>
    %644 = arith.mulf %643, %640 : vector<2x256xf32>
    %645 = arith.addf %642, %644 : vector<2x256xf32>
    %646 = vector.broadcast %578 : vector<1x256xf32> to vector<2x256xf32>
    %647 = arith.mulf %645, %646 : vector<2x256xf32>
    %648 = arith.addf %634, %647 : vector<2x256xf32>
    %c40 = arith.constant 40 : index
    %649 = memref.load %arg5[%c40] : memref<98xf32, #tpu.memory_space<smem>>
    %c89 = arith.constant 89 : index
    %650 = memref.load %arg5[%c89] : memref<98xf32, #tpu.memory_space<smem>>
    %c0_295 = arith.constant 0 : index
    %c0_296 = arith.constant 0 : index
    %c162 = arith.constant 162 : index
    %651 = vector.load %arg7[%c0_295, %c0_296, %c162] : memref<2x2x512xf32, #tpu.memory_space<vmem>>, vector<1x2x256xf32>
    %652 = vector.shape_cast %651 : vector<1x2x256xf32> to vector<2x256xf32>
    %c1_297 = arith.constant 1 : index
    %c0_298 = arith.constant 0 : index
    %c162_299 = arith.constant 162 : index
    %653 = vector.load %arg7[%c1_297, %c0_298, %c162_299] : memref<2x2x512xf32, #tpu.memory_space<vmem>>, vector<1x2x256xf32>
    %654 = vector.shape_cast %653 : vector<1x2x256xf32> to vector<2x256xf32>
    %655 = vector.broadcast %649 : f32 to vector<2x256xf32>
    %656 = arith.mulf %655, %652 : vector<2x256xf32>
    %657 = vector.broadcast %650 : f32 to vector<2x256xf32>
    %658 = arith.mulf %657, %654 : vector<2x256xf32>
    %659 = arith.addf %656, %658 : vector<2x256xf32>
    %660 = vector.broadcast %578 : vector<1x256xf32> to vector<2x256xf32>
    %661 = arith.mulf %659, %660 : vector<2x256xf32>
    %662 = arith.addf %648, %661 : vector<2x256xf32>
    %c47 = arith.constant 47 : index
    %663 = memref.load %arg5[%c47] : memref<98xf32, #tpu.memory_space<smem>>
    %c96_300 = arith.constant 96 : index
    %664 = memref.load %arg5[%c96_300] : memref<98xf32, #tpu.memory_space<smem>>
    %c0_301 = arith.constant 0 : index
    %c0_302 = arith.constant 0 : index
    %c178 = arith.constant 178 : index
    %665 = vector.load %arg7[%c0_301, %c0_302, %c178] : memref<2x2x512xf32, #tpu.memory_space<vmem>>, vector<1x2x256xf32>
    %666 = vector.shape_cast %665 : vector<1x2x256xf32> to vector<2x256xf32>
    %c1_303 = arith.constant 1 : index
    %c0_304 = arith.constant 0 : index
    %c178_305 = arith.constant 178 : index
    %667 = vector.load %arg7[%c1_303, %c0_304, %c178_305] : memref<2x2x512xf32, #tpu.memory_space<vmem>>, vector<1x2x256xf32>
    %668 = vector.shape_cast %667 : vector<1x2x256xf32> to vector<2x256xf32>
    %669 = vector.broadcast %663 : f32 to vector<2x256xf32>
    %670 = arith.mulf %669, %666 : vector<2x256xf32>
    %671 = vector.broadcast %664 : f32 to vector<2x256xf32>
    %672 = arith.mulf %671, %668 : vector<2x256xf32>
    %673 = arith.addf %670, %672 : vector<2x256xf32>
    %674 = vector.broadcast %578 : vector<1x256xf32> to vector<2x256xf32>
    %675 = arith.mulf %673, %674 : vector<2x256xf32>
    %676 = arith.addf %662, %675 : vector<2x256xf32>
    %c6 = arith.constant 6 : index
    %c0_306 = arith.constant 0 : index
    %677 = vector.load %arg4[%c6, %c0_306] : memref<7x256xf32, #tpu.memory_space<vmem>>, vector<1x256xf32>
    %c6_307 = arith.constant 6 : index
    %678 = memref.load %arg5[%c6_307] : memref<98xf32, #tpu.memory_space<smem>>
    %c55 = arith.constant 55 : index
    %679 = memref.load %arg5[%c55] : memref<98xf32, #tpu.memory_space<smem>>
    %c0_308 = arith.constant 0 : index
    %c0_309 = arith.constant 0 : index
    %c83 = arith.constant 83 : index
    %680 = vector.load %arg7[%c0_308, %c0_309, %c83] : memref<2x2x512xf32, #tpu.memory_space<vmem>>, vector<1x2x256xf32>
    %681 = vector.shape_cast %680 : vector<1x2x256xf32> to vector<2x256xf32>
    %c1_310 = arith.constant 1 : index
    %c0_311 = arith.constant 0 : index
    %c83_312 = arith.constant 83 : index
    %682 = vector.load %arg7[%c1_310, %c0_311, %c83_312] : memref<2x2x512xf32, #tpu.memory_space<vmem>>, vector<1x2x256xf32>
    %683 = vector.shape_cast %682 : vector<1x2x256xf32> to vector<2x256xf32>
    %684 = vector.broadcast %678 : f32 to vector<2x256xf32>
    %685 = arith.mulf %684, %681 : vector<2x256xf32>
    %686 = vector.broadcast %679 : f32 to vector<2x256xf32>
    %687 = arith.mulf %686, %683 : vector<2x256xf32>
    %688 = arith.addf %685, %687 : vector<2x256xf32>
    %689 = vector.broadcast %677 : vector<1x256xf32> to vector<2x256xf32>
    %690 = arith.mulf %688, %689 : vector<2x256xf32>
    %691 = arith.addf %676, %690 : vector<2x256xf32>
    %c13 = arith.constant 13 : index
    %692 = memref.load %arg5[%c13] : memref<98xf32, #tpu.memory_space<smem>>
    %c62 = arith.constant 62 : index
    %693 = memref.load %arg5[%c62] : memref<98xf32, #tpu.memory_space<smem>>
    %c0_313 = arith.constant 0 : index
    %c0_314 = arith.constant 0 : index
    %c99 = arith.constant 99 : index
    %694 = vector.load %arg7[%c0_313, %c0_314, %c99] : memref<2x2x512xf32, #tpu.memory_space<vmem>>, vector<1x2x256xf32>
    %695 = vector.shape_cast %694 : vector<1x2x256xf32> to vector<2x256xf32>
    %c1_315 = arith.constant 1 : index
    %c0_316 = arith.constant 0 : index
    %c99_317 = arith.constant 99 : index
    %696 = vector.load %arg7[%c1_315, %c0_316, %c99_317] : memref<2x2x512xf32, #tpu.memory_space<vmem>>, vector<1x2x256xf32>
    %697 = vector.shape_cast %696 : vector<1x2x256xf32> to vector<2x256xf32>
    %698 = vector.broadcast %692 : f32 to vector<2x256xf32>
    %699 = arith.mulf %698, %695 : vector<2x256xf32>
    %700 = vector.broadcast %693 : f32 to vector<2x256xf32>
    %701 = arith.mulf %700, %697 : vector<2x256xf32>
    %702 = arith.addf %699, %701 : vector<2x256xf32>
    %703 = vector.broadcast %677 : vector<1x256xf32> to vector<2x256xf32>
    %704 = arith.mulf %702, %703 : vector<2x256xf32>
    %705 = arith.addf %691, %704 : vector<2x256xf32>
    %c20 = arith.constant 20 : index
    %706 = memref.load %arg5[%c20] : memref<98xf32, #tpu.memory_space<smem>>
    %c69 = arith.constant 69 : index
    %707 = memref.load %arg5[%c69] : memref<98xf32, #tpu.memory_space<smem>>
    %c0_318 = arith.constant 0 : index
    %c0_319 = arith.constant 0 : index
    %c115 = arith.constant 115 : index
    %708 = vector.load %arg7[%c0_318, %c0_319, %c115] : memref<2x2x512xf32, #tpu.memory_space<vmem>>, vector<1x2x256xf32>
    %709 = vector.shape_cast %708 : vector<1x2x256xf32> to vector<2x256xf32>
    %c1_320 = arith.constant 1 : index
    %c0_321 = arith.constant 0 : index
    %c115_322 = arith.constant 115 : index
    %710 = vector.load %arg7[%c1_320, %c0_321, %c115_322] : memref<2x2x512xf32, #tpu.memory_space<vmem>>, vector<1x2x256xf32>
    %711 = vector.shape_cast %710 : vector<1x2x256xf32> to vector<2x256xf32>
    %712 = vector.broadcast %706 : f32 to vector<2x256xf32>
    %713 = arith.mulf %712, %709 : vector<2x256xf32>
    %714 = vector.broadcast %707 : f32 to vector<2x256xf32>
    %715 = arith.mulf %714, %711 : vector<2x256xf32>
    %716 = arith.addf %713, %715 : vector<2x256xf32>
    %717 = vector.broadcast %677 : vector<1x256xf32> to vector<2x256xf32>
    %718 = arith.mulf %716, %717 : vector<2x256xf32>
    %719 = arith.addf %705, %718 : vector<2x256xf32>
    %c27 = arith.constant 27 : index
    %720 = memref.load %arg5[%c27] : memref<98xf32, #tpu.memory_space<smem>>
    %c76 = arith.constant 76 : index
    %721 = memref.load %arg5[%c76] : memref<98xf32, #tpu.memory_space<smem>>
    %c0_323 = arith.constant 0 : index
    %c0_324 = arith.constant 0 : index
    %c131 = arith.constant 131 : index
    %722 = vector.load %arg7[%c0_323, %c0_324, %c131] : memref<2x2x512xf32, #tpu.memory_space<vmem>>, vector<1x2x256xf32>
    %723 = vector.shape_cast %722 : vector<1x2x256xf32> to vector<2x256xf32>
    %c1_325 = arith.constant 1 : index
    %c0_326 = arith.constant 0 : index
    %c131_327 = arith.constant 131 : index
    %724 = vector.load %arg7[%c1_325, %c0_326, %c131_327] : memref<2x2x512xf32, #tpu.memory_space<vmem>>, vector<1x2x256xf32>
    %725 = vector.shape_cast %724 : vector<1x2x256xf32> to vector<2x256xf32>
    %726 = vector.broadcast %720 : f32 to vector<2x256xf32>
    %727 = arith.mulf %726, %723 : vector<2x256xf32>
    %728 = vector.broadcast %721 : f32 to vector<2x256xf32>
    %729 = arith.mulf %728, %725 : vector<2x256xf32>
    %730 = arith.addf %727, %729 : vector<2x256xf32>
    %731 = vector.broadcast %677 : vector<1x256xf32> to vector<2x256xf32>
    %732 = arith.mulf %730, %731 : vector<2x256xf32>
    %733 = arith.addf %719, %732 : vector<2x256xf32>
    %c34 = arith.constant 34 : index
    %734 = memref.load %arg5[%c34] : memref<98xf32, #tpu.memory_space<smem>>
    %c83_328 = arith.constant 83 : index
    %735 = memref.load %arg5[%c83_328] : memref<98xf32, #tpu.memory_space<smem>>
    %c0_329 = arith.constant 0 : index
    %c0_330 = arith.constant 0 : index
    %c147 = arith.constant 147 : index
    %736 = vector.load %arg7[%c0_329, %c0_330, %c147] : memref<2x2x512xf32, #tpu.memory_space<vmem>>, vector<1x2x256xf32>
    %737 = vector.shape_cast %736 : vector<1x2x256xf32> to vector<2x256xf32>
    %c1_331 = arith.constant 1 : index
    %c0_332 = arith.constant 0 : index
    %c147_333 = arith.constant 147 : index
    %738 = vector.load %arg7[%c1_331, %c0_332, %c147_333] : memref<2x2x512xf32, #tpu.memory_space<vmem>>, vector<1x2x256xf32>
    %739 = vector.shape_cast %738 : vector<1x2x256xf32> to vector<2x256xf32>
    %740 = vector.broadcast %734 : f32 to vector<2x256xf32>
    %741 = arith.mulf %740, %737 : vector<2x256xf32>
    %742 = vector.broadcast %735 : f32 to vector<2x256xf32>
    %743 = arith.mulf %742, %739 : vector<2x256xf32>
    %744 = arith.addf %741, %743 : vector<2x256xf32>
    %745 = vector.broadcast %677 : vector<1x256xf32> to vector<2x256xf32>
    %746 = arith.mulf %744, %745 : vector<2x256xf32>
    %747 = arith.addf %733, %746 : vector<2x256xf32>
    %c41 = arith.constant 41 : index
    %748 = memref.load %arg5[%c41] : memref<98xf32, #tpu.memory_space<smem>>
    %c90 = arith.constant 90 : index
    %749 = memref.load %arg5[%c90] : memref<98xf32, #tpu.memory_space<smem>>
    %c0_334 = arith.constant 0 : index
    %c0_335 = arith.constant 0 : index
    %c163 = arith.constant 163 : index
    %750 = vector.load %arg7[%c0_334, %c0_335, %c163] : memref<2x2x512xf32, #tpu.memory_space<vmem>>, vector<1x2x256xf32>
    %751 = vector.shape_cast %750 : vector<1x2x256xf32> to vector<2x256xf32>
    %c1_336 = arith.constant 1 : index
    %c0_337 = arith.constant 0 : index
    %c163_338 = arith.constant 163 : index
    %752 = vector.load %arg7[%c1_336, %c0_337, %c163_338] : memref<2x2x512xf32, #tpu.memory_space<vmem>>, vector<1x2x256xf32>
    %753 = vector.shape_cast %752 : vector<1x2x256xf32> to vector<2x256xf32>
    %754 = vector.broadcast %748 : f32 to vector<2x256xf32>
    %755 = arith.mulf %754, %751 : vector<2x256xf32>
    %756 = vector.broadcast %749 : f32 to vector<2x256xf32>
    %757 = arith.mulf %756, %753 : vector<2x256xf32>
    %758 = arith.addf %755, %757 : vector<2x256xf32>
    %759 = vector.broadcast %677 : vector<1x256xf32> to vector<2x256xf32>
    %760 = arith.mulf %758, %759 : vector<2x256xf32>
    %761 = arith.addf %747, %760 : vector<2x256xf32>
    %c48 = arith.constant 48 : index
    %762 = memref.load %arg5[%c48] : memref<98xf32, #tpu.memory_space<smem>>
    %c97_339 = arith.constant 97 : index
    %763 = memref.load %arg5[%c97_339] : memref<98xf32, #tpu.memory_space<smem>>
    %c0_340 = arith.constant 0 : index
    %c0_341 = arith.constant 0 : index
    %c179 = arith.constant 179 : index
    %764 = vector.load %arg7[%c0_340, %c0_341, %c179] : memref<2x2x512xf32, #tpu.memory_space<vmem>>, vector<1x2x256xf32>
    %765 = vector.shape_cast %764 : vector<1x2x256xf32> to vector<2x256xf32>
    %c1_342 = arith.constant 1 : index
    %c0_343 = arith.constant 0 : index
    %c179_344 = arith.constant 179 : index
    %766 = vector.load %arg7[%c1_342, %c0_343, %c179_344] : memref<2x2x512xf32, #tpu.memory_space<vmem>>, vector<1x2x256xf32>
    %767 = vector.shape_cast %766 : vector<1x2x256xf32> to vector<2x256xf32>
    %768 = vector.broadcast %762 : f32 to vector<2x256xf32>
    %769 = arith.mulf %768, %765 : vector<2x256xf32>
    %770 = vector.broadcast %763 : f32 to vector<2x256xf32>
    %771 = arith.mulf %770, %767 : vector<2x256xf32>
    %772 = arith.addf %769, %771 : vector<2x256xf32>
    %773 = vector.broadcast %677 : vector<1x256xf32> to vector<2x256xf32>
    %774 = arith.mulf %772, %773 : vector<2x256xf32>
    %775 = arith.addf %761, %774 : vector<2x256xf32>
    %776 = arith.negf %775 : vector<2x256xf32>
    %777 = math.exp %776 : vector<2x256xf32>
    %cst_345 = arith.constant 1.000000e+00 : f32
    %778 = vector.broadcast %cst_345 : f32 to vector<2x256xf32>
    %779 = arith.addf %778, %777 : vector<2x256xf32>
    %780 = arith.divf %778, %779 : vector<2x256xf32>
    %c0_346 = arith.constant 0 : index
    %c0_347 = arith.constant 0 : index
    %c128_348 = arith.constant 128 : index
    %781 = vector.load %arg7[%c0_346, %c0_347, %c128_348] : memref<2x2x512xf32, #tpu.memory_space<vmem>>, vector<1x2x256xf32>
    %782 = vector.shape_cast %781 : vector<1x2x256xf32> to vector<2x256xf32>
    %783 = vector.shape_cast %780 : vector<2x256xf32> to vector<1x2x256xf32>
    tpu.vector_store %arg7[%c0_346, %c0_347, %c128_348], %783 {strides = array<i32>} : memref<2x2x512xf32, #tpu.memory_space<vmem>>, vector<1x2x256xf32>,
    %c0_349 = arith.constant 0 : index
    %c0_350 = arith.constant 0 : index
    %c128_351 = arith.constant 128 : index
    %784 = vector.load %arg7[%c0_349, %c0_350, %c128_351] : memref<2x2x512xf32, #tpu.memory_space<vmem>>, vector<1x1x256xf32>
    %785 = vector.shape_cast %784 : vector<1x1x256xf32> to vector<1x256xf32>
    %786 = vector.broadcast %785 : vector<1x256xf32> to vector<32x256xf32>
    %787 = arith.mulf %29, %786 : vector<32x256xf32>
    %c0_352 = arith.constant 0 : index
    %c0_353 = arith.constant 0 : index
    %c0_354 = arith.constant 0 : index
    %788 = vector.load %arg6[%c0_352, %c0_353, %c0_354] : memref<2x32x256xf32, #tpu.memory_space<vmem>>, vector<1x32x256xf32>
    %789 = vector.shape_cast %788 : vector<1x32x256xf32> to vector<32x256xf32>
    %790 = vector.shape_cast %787 : vector<32x256xf32> to vector<1x32x256xf32>
    tpu.vector_store %arg6[%c0_352, %c0_353, %c0_354], %790 {strides = array<i32>} : memref<2x32x256xf32, #tpu.memory_space<vmem>>, vector<1x32x256xf32>,
    %c0_355 = arith.constant 0 : index
    %c1_356 = arith.constant 1 : index
    %c128_357 = arith.constant 128 : index
    %791 = vector.load %arg7[%c0_355, %c1_356, %c128_357] : memref<2x2x512xf32, #tpu.memory_space<vmem>>, vector<1x1x256xf32>
    %792 = vector.shape_cast %791 : vector<1x1x256xf32> to vector<1x256xf32>
    %793 = vector.broadcast %792 : vector<1x256xf32> to vector<32x256xf32>
    %794 = arith.mulf %69, %793 : vector<32x256xf32>
    %c1_358 = arith.constant 1 : index
    %c0_359 = arith.constant 0 : index
    %c0_360 = arith.constant 0 : index
    %795 = vector.load %arg6[%c1_358, %c0_359, %c0_360] : memref<2x32x256xf32, #tpu.memory_space<vmem>>, vector<1x32x256xf32>
    %796 = vector.shape_cast %795 : vector<1x32x256xf32> to vector<32x256xf32>
    %797 = vector.shape_cast %794 : vector<32x256xf32> to vector<1x32x256xf32>
    tpu.vector_store %arg6[%c1_358, %c0_359, %c0_360], %797 {strides = array<i32>} : memref<2x32x256xf32, #tpu.memory_space<vmem>>, vector<1x32x256xf32>,
    return
  }
  func.func @transform_0(%arg0: i32) -> (i32, i32, i32) {
    %c0_i32 = arith.constant 0 : i32
    %c0_i32_0 = arith.constant 0 : i32
    %c0_i32_1 = arith.constant 0 : i32
    return %arg0, %c0_i32, %c0_i32_0 : i32, i32, i32
  }
  func.func @transform_1(%arg0: i32) -> (i32, i32) {
    %c0_i32 = arith.constant 0 : i32
    %c0_i32_0 = arith.constant 0 : i32
    %c0_i32_1 = arith.constant 0 : i32
    return %c0_i32, %c0_i32_0 : i32, i32
  }
  func.func @transform_2(%arg0: i32) -> (i32, i32) {
    %c0_i32 = arith.constant 0 : i32
    %c0_i32_0 = arith.constant 0 : i32
    %c0_i32_1 = arith.constant 0 : i32
    return %c0_i32, %c0_i32_0 : i32, i32
  }
  func.func @transform_3(%arg0: i32) -> (i32, i32) {
    %c0_i32 = arith.constant 0 : i32
    %c0_i32_0 = arith.constant 0 : i32
    %c0_i32_1 = arith.constant 0 : i32
    return %c0_i32, %c0_i32_0 : i32, i32
  }
  func.func @transform_4(%arg0: i32) -> i32 {
    %c0_i32 = arith.constant 0 : i32
    %c0_i32_0 = arith.constant 0 : i32
    return %c0_i32 : i32
  }
  func.func @transform_5(%arg0: i32) -> (i32, i32, i32) {
    %c0_i32 = arith.constant 0 : i32
    %c0_i32_0 = arith.constant 0 : i32
    %c0_i32_1 = arith.constant 0 : i32
    return %arg0, %c0_i32, %c0_i32_0 : i32, i32, i32
  }
}

</mosaic_0001>

<bundles_post_ra>
// kernel: tpu_custom_call.1
= control target key start
LH: loop header
LB: loop body
LE: loop exit
PB: predicated region body
PF: predicated region fallthrough
CT: control target
= control target key end

     0   :  { %10 = vsyncpa [#allocation5], 0  ;;  %s3625_s0 = inlined_call_operand.hbm [shape: f32[2,32,256], index: 0, kind: input, shape index: {}]   ;;  %s3626_s1 = inlined_call_operand.vmem [shape: f32[2,32], index: 1, kind: input, shape index: {}]   ;;  %s3627_s2 = inlined_call_operand.vmem [shape: f32[32,2], index: 2, kind: input, shape index: {}]   ;;  %s3628_s3 = inlined_call_operand.vmem [shape: f32[7,256], index: 3, kind: input, shape index: {}]   ;;  %s3629_s4 = inlined_call_operand.vmem [shape: f32[98], index: 4, kind: input, shape index: {}]   ;;  %s3630_s5 = inlined_call_operand.hbm [shape: f32[2,32,256], index: 5, kind: output, shape index: {}]  }
   0x1   :  { %11 = vsyncpa [#allocation7], 0 }
   0x2   :  { %12 = vsyncpa [#allocation6], 0  ;;  %s2555_s18 = smov [#allocation4]   ;;  %s37_s22 = sshll.u32 %s3629_s4, 4  ;;  %s38_s22 = int_to_ptr.vmem [resolvable:$true] %s37_s22 }
   0x3   :  { %s18_s19 = sshll.u32 %s2555_s18, 4  ;;  %s19_s19 = int_to_ptr.vmem [resolvable:$true] %s18_s19 }
   0x4   :  { %s2505_s23 = scalar_lea.vmem %s19_s19, 2048  ;;  %p2510_p1 = scmp.lt.s32.totalorder %s19_s19, %s19_s19 }
   0x5   :  { %p2506_p0 = scmp.ne.s32.totalorder %s19_s19, %s2505_s23  ;;  %p2511_p2 = scmp.lt.s32.totalorder %s2505_s23, %s2505_s23 }
   0x7   :  { %p2512_p3 = por %p2511_p2, %p2510_p1 }
   0x9   :  { %p2513_p4 = pnand %p2512_p3, %p2506_p0 }
   0xb   :  { %2516 = shalt.err (!%p2513_p4)
}
   0xc   :  { %s3631_s24 = smov 256   ;;  %s3632_s25 = smov 16  }
   0xd   :  { %24 = dma.hbm_to_vmem [thread:$0]  %s3625_s0, 2048, %s19_s19, [#allocation5], %s3631_s24, %s3631_s24, %s3632_s25  }
   0xe   :  { %s2517_s28 = scalar_lea.vmem %s38_s22, 16  ;;  %p2522_p6 = scmp.lt.s32.totalorder %s38_s22, %s38_s22 }
   0xf   :  { %p2518_p5 = scmp.ne.s32.totalorder %s38_s22, %s2517_s28  ;;  %p2523_p7 = scmp.lt.s32.totalorder %s2517_s28, %s2517_s28 }
  0x11   :  { %p2524_p8 = por %p2523_p7, %p2522_p6 }
  0x13   :  { %p2525_p9 = pnand %p2524_p8, %p2518_p5 }
  0x15   :  { %2528 = shalt.err (!%p2525_p9)
}
  0x16   :  { %s2558_s4 = smov [#allocation8]  }
  0x17   :  { %40 = dma.vmem_to_smem %s38_s22, 16, %s2558_s4, [#allocation7]  }
  0x18   :  { %2549 = dma.done.wait [#allocation5], 2048  }
  0x19   :  { %2550 = vsyncadd [#allocation5], 4294965248 }
  0x1a   :  { %2551 = dma.done.wait [#allocation7], 16  }
  0x1b   :  { %2552 = vsyncadd [#allocation7], 4294967280 }
  0x1c   :  { %47 = sfence }
  0x1d   :  { %v2676_v0 = vld [vmem:[#allocation4 + $0x30] sm:$0xff]  ;;  %v2678_v1 = vld [vmem:[#allocation4 + $0x38] sm:$0xff]  ;;  %v2680_v2 = vld [vmem:[#allocation4 + $0x20] sm:$0xff]  ;;  %v2559_v16 = vmov 0.0   ;;  %vm2560_vm0 = vmmov 0   ;;  %vm75_vm1 = vcmask 7168  }
  0x1e   :  { %v67_v3 = vadd.f32 %v2678_v1, %v2676_v0  ;;  %v89_v4 = vmax.f32 %v2676_v0, %v2678_v1  ;;  %v2686_v5 = vld [vmem:[#allocation4 + $0x28] sm:$0xff]  ;;  %v2688_v6 = vld [vmem:[#allocation4 + $0x10] sm:$0xff]  ;;  %v2690_v7 = vld [vmem:[#allocation4 + $0x18] sm:$0xff]  ;;  %2337 = vmatprep.subr.mxu0 %v2559_v16  ;;  %48 = vst [vmem:[#allocation2] sm:$0xff] %v2559_v16  ;;  %2345 = vmatprep.mubr.msk.f32.mxu0 %vm2560_vm0, %v2559_v16  ;;  %vm92_vm2 = vcmask 15368   ;;  %vm102_vm3 = vcmask 261120  }
  0x1f   :  { %v64_v8 = vadd.f32 %v2686_v5, %v2680_v2  ;;  %v61_v9 = vadd.f32 %v2690_v7, %v2688_v6  ;;  %v2696_v10 = vld [vmem:[#allocation4] sm:$0xff]  ;;  %v2698_v11 = vld [vmem:[#allocation4 + $0x8] sm:$0xff]  ;;  %v86_v12 = vmax.f32 %v2680_v2, %v2686_v5  ;;  %v83_v14 = vmax.f32 %v2688_v6, %v2690_v7  ;;  %49 = vst [vmem:[#allocation2 + $0x8] sm:$0xff] %v2559_v16  ;;  %v101_v33 = vld [vmem:[%s3626_s1] sm:$0x3]  ;;  %s3634_s18 = smov 93  }
  0x20   :  { %68 = vadd.xlane.f32.xlu0 %v67_v3  ;;  %90 = vmax.xlane.f32.xlu1 %v89_v4  ;;  %v58_v13 = vadd.f32 %v2698_v11, %v2696_v10  ;;  %v80_v15 = vmax.f32 %v2696_v10, %v2698_v11  ;;  %v177_v34 = vld [vmem:[%s3627_s2] sm:$0xff]  ;;  %vm181_vm4 = vcmask 15360   ;;  %v2735_v36 = vld [vmem:[#allocation4 + $0x78] sm:$0xff]  ;;  %v2737_v37 = vld [vmem:[#allocation4 + $0x60] sm:$0xff]  ;;  %vm194_vm5 = vcmask 1041408   ;;  %s3635_s19 = smov 125  }
  0x21   :  { %2350 = vmatprep.mubr.msk.f32.mxu1 %vm181_vm4, %v177_v34  ;;  %v2733_v35 = vld [vmem:[#allocation4 + $0x70] sm:$0xff]  ;;  %v2741_v39 = vld [vmem:[#allocation4 + $0x68] sm:$0xff]  ;;  %v2745_v41 = vld [vmem:[#allocation4 + $0x58] sm:$0xff]  ;;  %s3649_s20 = smov 109   ;;  %s3633_s21 = smov 29   ;;  %vm3657_vm7 = vcmask 760832  }
  0x22   :  { %v465_v38 = vadd.f32 %v2735_v36, %v2733_v35  ;;  %v2743_v40 = vld [vmem:[#allocation4 + $0x50] sm:$0xff]  ;;  %v462_v42 = vadd.f32 %v2741_v39, %v2737_v37  ;;  %v485_v43 = vmax.f32 %v2733_v35, %v2735_v36  ;;  %v2753_v45 = vld [vmem:[#allocation4 + $0x40] sm:$0xff]  ;;  %v2755_v46 = vld [vmem:[#allocation4 + $0x48] sm:$0xff]  ;;  %v482_v47 = vmax.f32 %v2737_v37, %v2741_v39  ;;  %s2568_s22 = smov 13   ;;  %s3638_s23 = smov 78  }
  0x23   :  { %v459_v44 = vadd.f32 %v2745_v41, %v2743_v40  ;;  %v456_v48 = vadd.f32 %v2755_v46, %v2753_v45  ;;  %v479_v49 = vmax.f32 %v2743_v40, %v2745_v41  ;;  %v476_v50 = vmax.f32 %v2753_v45, %v2755_v46  ;;  %v2768_v54 = vld [vmem:[%s3627_s2 + $0x8] sm:$0xff]  ;;  %v179_v55 = vld [vmem:[%s3627_s2 + $0x10] sm:$0xff]  ;;  %v2782_v56 = vld [vmem:[%s3627_s2 + $0x18] sm:$0xff]  ;;  %s2561_s2 = smov 127   ;;  %s3645_s26 = smov 45  }
  0x24   :  { %65 = vadd.xlane.f32.xlu0 %v64_v8  ;;  %62 = vadd.xlane.f32.xlu1 %v61_v9  ;;  %s3640_s4 = smov 110   ;;  %s3639_s0 = smov 94   ;;  %vm3659_vm8 = vcmask 891904   ;;  %vm3660_vm9 = vcmask 1022976   ;;  %vm952_vm10 = vcmask 105472   ;;  %vm3655_vm11 = vcmask 236544  }
  0x25   :  { %s2573_s29 = smov 14   ;;  %s3641_s30 = smov 126   ;;  %vm3656_vm12 = vcmask 367616   ;;  %vm3663_vm13 = vcmask 637952   ;;  %vm1317_vm14 = vcmask 121856   ;;  %vm3664_vm15 = vcmask 769024  }
  0x26   :  { %s3637_s6 = smov 46   ;;  %s2576_s7 = smov 30  }
  0x27   :  { %s3646_s10 = smov 95   ;;  %s3644_s11 = smov 79  }
  0x28   :  { %87 = vmax.xlane.f32.xlu0 %v86_v12  ;;  %59 = vadd.xlane.f32.xlu1 %v58_v13  ;;  %s3648_s12 = smov 111   ;;  %s3642_s13 = smov 31  }
  0x29   :  { %s2581_s14 = smov 15   ;;  %s2582_s16 = smov 80  }
  0x2a   :  { %s3643_s17 = smov 47   ;;  %s2585_s27 = smov 96  }
  0x2b   :  { %s2586_s28 = smov 32   ;;  %s2588_s8 = smov 48  }
  0x2c   :  { %84 = vmax.xlane.f32.xlu0 %v83_v14  ;;  %81 = vmax.xlane.f32.xlu1 %v80_v15  ;;  %s2589_s9 = smov 113   ;;  %s2592_s15 = smov 1  }
  0x2d   :  { %s2599_s24 = smov 2  }
  0x30   :  { %466 = vadd.xlane.f32.xlu0 %v465_v38  ;;  %463 = vadd.xlane.f32.xlu1 %v462_v42 }
  0x34   :  { %486 = vmax.xlane.f32.xlu0 %v485_v43  ;;  %460 = vadd.xlane.f32.xlu1 %v459_v44 }
  0x38   :  { %483 = vmax.xlane.f32.xlu0 %v482_v47  ;;  %457 = vadd.xlane.f32.xlu1 %v456_v48 }
  0x3c   :  { %480 = vmax.xlane.f32.xlu0 %v479_v49  ;;  %477 = vmax.xlane.f32.xlu1 %v476_v50 }
  0xa9   :  { %v69_v17 = vpop.xlane.xlu0 %68  ;;  %v91_v18 = vpop.xlane.xlu1 %90 }
  0xaa   :  { %v74_v19 = vmul.f32 0.00390625, %v69_v17 }
  0xac   :  { %79 = vst.msk [vmem:[#allocation3 + $0x18] sm:$0xff] %vm75_vm1, %v74_v19 }
  0xad   :  { %96 = vst.msk [vmem:[#allocation3 + $0x18] sm:$0xff] %vm92_vm2, %v91_v18  ;;  %v66_v20 = vpop.xlane.xlu0 %65  ;;  %v63_v21 = vpop.xlane.xlu1 %62 }
  0xae   :  { %v73_v22 = vmul.f32 0.00390625, %v66_v20  ;;  %v72_v23 = vmul.f32 0.00390625, %v63_v21 }
  0xb0   :  { %78 = vst.msk [vmem:[#allocation3 + $0x10] sm:$0xff] %vm75_vm1, %v73_v22  ;;  %77 = vst.msk [vmem:[#allocation3 + $0x8] sm:$0xff] %vm75_vm1, %v72_v23 }
  0xb1   :  { %v88_v24 = vpop.xlane.xlu0 %87  ;;  %v60_v25 = vpop.xlane.xlu1 %59 }
  0xb2   :  { %95 = vst.msk [vmem:[#allocation3 + $0x10] sm:$0xff] %vm92_vm2, %v88_v24  ;;  %v71_v26 = vmul.f32 0.00390625, %v60_v25 }
  0xb4   :  { %76 = vst.msk [vmem:[#allocation3] sm:$0xff] %vm75_vm1, %v71_v26  ;;  %v100_v27 = vld [vmem:[#allocation3 + $0x18] sm:$0xff]  ;;  %v496_v26 = vld [vmem:[%s3626_s1] sm:$0x3]  ;;  %s3647_s1 = smov 77  }
  0xb5   :  { %v85_v28 = vpop.xlane.xlu0 %84  ;;  %2338 = vmatpush3.msra.mxu0 %v100_v27  ;;  %v82_v29 = vpop.xlane.xlu1 %81  ;;  %v2562_v27 = vmov 0  }
  0xb6   :  { %94 = vst.msk [vmem:[#allocation3 + $0x8] sm:$0xff] %vm92_vm2, %v85_v28  ;;  %93 = vst.msk [vmem:[#allocation3] sm:$0xff] %vm92_vm2, %v82_v29  ;;  %2339 = vmatprep.subr.mxu0 %v2559_v16  ;;  %2459 = vset.pattern.permute.xlu0 %v2562_v27 }
  0xb7   :  { %2460 = vset.pattern.permute.xlu1 %v2562_v27 }
  0xb9   :  { %v99_v30 = vld [vmem:[#allocation3 + $0x10] sm:$0xff]  ;;  %v467_v57 = vpop.xlane.xlu0 %466  ;;  %v464_v58 = vpop.xlane.xlu1 %463 }
  0xba   :  { %2340 = vmatpush3.msra.mxu0 %v99_v30  ;;  %v471_v18 = vmul.f32 0.00390625, %v467_v57  ;;  %v470_v20 = vmul.f32 0.00390625, %v464_v58 }
  0xbb   :  { %2341 = vmatprep.subr.mxu0 %v2559_v16 }
  0xbd   :  { %v98_v31 = vld [vmem:[#allocation3 + $0x8] sm:$0xff]  ;;  %v97_v32 = vld [vmem:[#allocation3] sm:$0xff]  ;;  %v487_v59 = vpop.xlane.xlu0 %486  ;;  %v461_v60 = vpop.xlane.xlu1 %460 }
  0xbe   :  { %2342 = vmatpush3.msra.mxu0 %v98_v31  ;;  %v469_v8 = vmul.f32 0.00390625, %v461_v60 }
  0xbf   :  { %2343 = vmatprep.subr.mxu0 %v2559_v16 }
  0xc0   :  { %2344 = vmatpush3.msra.mxu0 %v97_v32 }
  0xc1   :  { %2346 = vmatmul.mubr.msk.f32.vlgmr.msra.gmra.mxu0 %vm102_vm3, %v101_v33  ;;  %v484_v62 = vpop.xlane.xlu0 %483  ;;  %v458_v3 = vpop.xlane.xlu1 %457 }
  0xc2   :  { %2369 = vmatprep.mubr.msk.f32.mxu0 %vm181_vm4, %v177_v34  ;;  %v468_v12 = vmul.f32 0.00390625, %v458_v3 }
  0xc5   :  { %v481_v13 = vpop.xlane.xlu0 %480  ;;  %v478_v15 = vpop.xlane.xlu1 %477 }
 0x181   :  { %v172_v51 = vpop.f32.mrf.mxu0 }
 0x182   :  { %v176_v52 = vmax.f32 %v172_v51, 0.0 }
 0x183   :  { %v2347_v53 = vpop.f32.mrf.mxu0 }
 0x184   :  { %2348 = vmatprep.subr.msk.mxu1 %vm194_vm5, %v176_v52 }
 0x185   :  { %2349 = vmatpush3.msk.msra.mxu1 %vm194_vm5, %v176_v52 }
 0x186   :  { %2351 = vmatmul.mubr.msk.f32.vlgmr.msra.gmra.mxu1 %vm181_vm4, %v2768_v54  ;;  %2356 = vmatprep.subr.mxu1 %v2559_v16 }
 0x187   :  { %2353 = vmatprep.mubr.msk.f32.mxu1 %vm181_vm4, %v179_v55 }
 0x18a   :  { %2354 = vmatmul.mubr.msk.f32.gmra.mxu1 %vm181_vm4, %v2782_v56 }
 0x18b   :  { %2364 = vmatprep.mubr.msk.f32.mxu1 %vm2560_vm0, %v2559_v16  ;;  %vm1170_vm0 = vcmask 384000  }
 0x246   :  { %v2352_v61 = vpop.f32.mrf.mxu1 }
 0x247   :  { %284 = vst.msk [vmem:[#allocation3 + $0x8] sm:$0xff] %vm181_vm4, %v2352_v61 }
 0x248   :  { %v264_v63 = vpop.f32.mrf.mxu1 }
 0x249   :  { %283 = vst.msk [vmem:[#allocation3] sm:$0xff] %vm181_vm4, %v264_v63 }
 0x24a   :  { %v2355_v4 = vpop.f32.mrf.mxu1 }
 0x24b   :  { %286 = vst.msk [vmem:[#allocation3 + $0x18] sm:$0xff] %vm181_vm4, %v2355_v4 }
 0x24c   :  { %v274_v9 = vpop.f32.mrf.mxu1 }
 0x24d   :  { %285 = vst.msk [vmem:[#allocation3 + $0x10] sm:$0xff] %vm181_vm4, %v274_v9 }
 0x24e   :  { %v288_v14 = vld [vmem:[#allocation3 + $0x8] sm:$0xff] }
 0x24f   :  { %297 = vrot.lane.b32.xlu1 %v288_v14, %s2561_s2  ;;  %473 = vst.msk [vmem:[#allocation3 + $0x8] sm:$0xff] %vm75_vm1, %v469_v8 }
 0x250   :  { %v287_v17 = vld [vmem:[#allocation3] sm:$0xff]  ;;  %489 = vst.msk [vmem:[#allocation3 + $0x8] sm:$0xff] %vm92_vm2, %v481_v13 }
 0x251   :  { %295 = vrot.lane.b32.xlu0 %v287_v17, %s2561_s2  ;;  %472 = vst.msk [vmem:[#allocation3] sm:$0xff] %vm75_vm1, %v468_v12 }
 0x252   :  { %v2797_v19 = vld [vmem:[#allocation3 + $0x18] sm:$0xff]  ;;  %488 = vst.msk [vmem:[#allocation3] sm:$0xff] %vm92_vm2, %v478_v15 }
 0x253   :  { %475 = vst.msk [vmem:[#allocation3 + $0x18] sm:$0xff] %vm75_vm1, %v471_v18 }
 0x254   :  { %491 = vst.msk [vmem:[#allocation3 + $0x18] sm:$0xff] %vm92_vm2, %v487_v59  ;;  %v289_v21 = vld [vmem:[#allocation3 + $0x10] sm:$0xff] }
 0x255   :  { %474 = vst.msk [vmem:[#allocation3 + $0x10] sm:$0xff] %vm75_vm1, %v470_v20  ;;  %299 = vrot.lane.b32.xlu0 %v289_v21, %s2561_s2 }
 0x256   :  { %490 = vst.msk [vmem:[#allocation3 + $0x10] sm:$0xff] %vm92_vm2, %v484_v62  ;;  %vm1090_vm2 = vcmask 900096  }
 0x257   :  { %v493_v24 = vld [vmem:[#allocation3 + $0x8] sm:$0xff] }
 0x259   :  { %301 = vrot.lane.b32.xlu0 %v2797_v19, %s2561_s2  ;;  %v492_v25 = vld [vmem:[#allocation3] sm:$0xff] }
 0x25b   :  { %v495_v22 = vld [vmem:[#allocation3 + $0x18] sm:$0xff] }
 0x25c   :  { %2357 = vmatpush3.msra.mxu1 %v495_v22 }
 0x25d   :  { %2358 = vmatprep.subr.mxu1 %v2559_v16  ;;  %v494_v23 = vld [vmem:[#allocation3 + $0x10] sm:$0xff] }
 0x25e   :  { %2359 = vmatpush3.msra.mxu1 %v494_v23 }
 0x25f   :  { %2360 = vmatprep.subr.mxu1 %v2559_v16 }
 0x260   :  { %2361 = vmatpush3.msra.mxu1 %v493_v24 }
 0x261   :  { %2362 = vmatprep.subr.mxu1 %v2559_v16 }
 0x262   :  { %2363 = vmatpush3.msra.mxu1 %v492_v25 }
 0x263   :  { %2365 = vmatmul.mubr.msk.f32.vlgmr.msra.gmra.mxu1 %vm102_vm3, %v496_v26 }
 0x264   :  { %2372 = vmatprep.mubr.msk.f32.mxu1 %vm181_vm4, %v179_v55 }
 0x2c1   :  { %v298_v42 = vpop.permute.xlu1 %297 }
 0x2c2   :  { %v308_v43 = vadd.f32 %v298_v42, %v288_v14 }
 0x2c3   :  { %v296_v28 = vpop.permute.xlu0 %295 }
 0x2c4   :  { %v307_v29 = vadd.f32 %v296_v28, %v287_v17  ;;  %v2200_v47 = vmul.f32 -1.442695, %v308_v43  ;;  %v2563_v43 = vmov 1983009808  }
 0x2c6   :  { %v2199_v30 = vmul.f32 -1.442695, %v307_v29  ;;  %v390_v29 = vlaneseq }
 0x2c7   :  { %v300_v44 = vpop.permute.xlu0 %299 }
 0x2c8   :  { %2461 = vpow2.f32 %v2199_v30  ;;  %v309_v48 = vadd.f32 %v300_v44, %v289_v21  ;;  %v854_v44 = vunpack.c.l.s4 %v2563_v43  ;;  %vm3061_vm6 = vcmp.lt.s32.totalorder %v390_v29, 256 }
 0x2ca   :  { %v2201_v49 = vmul.f32 -1.442695, %v309_v48 }
 0x2cb   :  { %v302_v3 = vpop.permute.xlu0 %301 }
 0x2cc   :  { %v310_v4 = vadd.f32 %v302_v3, %v2797_v19  ;;  %v2241_v3 = vld [vmem:[%s3628_s3 + $0x2] ss:$8 sm:$0x3] }
 0x2ce   :  { %v2202_v13 = vmul.f32 -1.442695, %v310_v4 }
 0x2d5   :  { %v2462_v31 = vpop.eup %2461 }
 0x2d6   :  { %v323_v32 = vadd.f32 1.0, %v2462_v31 }
 0x2d8   :  { %2463 = vrcp.f32 %v323_v32 }
 0x2d9   :  { %2465 = vpow2.f32 %v2200_v47  ;;  %v833_v47 = vld [vmem:[%s3628_s3] ss:$8 sm:$0x3] }
 0x2da   :  { %2467 = vpow2.f32 %v2201_v49 }
 0x2e5   :  { %v2464_v33 = vpop.eup %2463 }
 0x2e6   :  { %337 = vperm.xlu0 %2459, %v2464_v33   ;;  %v2833_v33 = vshrl.u32 %v390_v29, 7 }
 0x2e8   :  { %v2839_v42 = vsub.s32 1, %v2833_v33 }
 0x323   :  { %v566_v34 = vpop.f32.mrf.mxu1 }
 0x324   :  { %v570_v38 = vmax.f32 %v566_v34, 0.0 }
 0x325   :  { %v2366_v16 = vpop.f32.mrf.mxu1 }
 0x326   :  { %2367 = vmatprep.subr.msk.mxu0 %vm194_vm5, %v570_v38  ;;  %2375 = vmatprep.subr.msk.mxu1 %vm194_vm5, %v570_v38  ;;  %v2836_v16 = vsub.s32 0, %v2833_v33 }
 0x327   :  { %2368 = vmatpush3.msk.msra.mxu0 %vm194_vm5, %v570_v38  ;;  %2376 = vmatpush3.msk.msra.mxu1 %vm194_vm5, %v570_v38  ;;  %vm912_vm5 = vcmask 785408  }
 0x328   :  { %2370 = vmatmul.mubr.msk.f32.vlgmr.msra.gmra.mxu0 %vm181_vm4, %v2768_v54  ;;  %2373 = vmatmul.mubr.msk.f32.vlgmr.msra.gmra.mxu1 %vm181_vm4, %v2782_v56  ;;  %v2466_v54 = vpop.eup %2465  ;;  %v847_v49 = vrot.slane %v833_v47, %v2836_v16  ;;  %v1213_v4 = vrot.slane %v2241_v3, %v2836_v16 }
 0x329   :  { %v324_v55 = vadd.f32 1.0, %v2466_v54  ;;  %v2468_v56 = vpop.eup %2467 }
 0x32a   :  { %v325_v58 = vadd.f32 1.0, %v2468_v56 }
 0x32b   :  { %2469 = vrcp.f32 %v324_v55 }
 0x32c   :  { %2471 = vrcp.f32 %v325_v58  ;;  %v2226_v58 = vld [vmem:[%s3628_s3 + $0x1] ss:$8 sm:$0x3] }
 0x338   :  { %v2470_v62 = vpop.eup %2469 }
 0x339   :  { %v2472_v63 = vpop.eup %2471 }
 0x3e8   :  { %v2371_v50 = vpop.f32.mrf.mxu0  ;;  %v2374_v51 = vpop.f32.mrf.mxu1 }
 0x3e9   :  { %676 = vst.msk [vmem:[#allocation3 + $0x8] sm:$0xff] %vm181_vm4, %v2371_v50  ;;  %678 = vst.msk [vmem:[#allocation3 + $0x18] sm:$0xff] %vm181_vm4, %v2374_v51  ;;  %v851_v50 = vrot.slane %v833_v47, %v2839_v42  ;;  %v855_v51 = vunpack.c.0.s8 %v854_v44  ;;  %v338_v44 = vpop.permute.xlu0 %337 }
 0x3ea   :  { %v656_v52 = vpop.f32.mrf.mxu0  ;;  %v666_v53 = vpop.f32.mrf.mxu1 }
 0x3eb   :  { %675 = vst.msk [vmem:[#allocation3] sm:$0xff] %vm181_vm4, %v656_v52  ;;  %677 = vst.msk [vmem:[#allocation3 + $0x10] sm:$0xff] %vm181_vm4, %v666_v53  ;;  %v852_v53 = vcombine.low %v847_v49, %v851_v50  ;;  %v2847_v54 = vsub.s32 %v855_v51, %v2833_v33  ;;  %v2606_v49 = vmov 1966171168  }
 0x3ec   :  { %v388_v50 = vunpack.c.l.s4 %v2606_v49 }
 0x3f0   :  { %v680_v57 = vld [vmem:[#allocation3 + $0x8] sm:$0xff]  ;;  %v682_v61 = vld [vmem:[#allocation3 + $0x18] sm:$0xff] }
 0x3f1   :  { %689 = vrot.lane.b32.xlu1 %v680_v57, %s2561_s2 }
 0x3f2   :  { %v679_v59 = vld [vmem:[#allocation3] sm:$0xff]  ;;  %v681_v60 = vld [vmem:[#allocation3 + $0x10] sm:$0xff] }
 0x3f5   :  { %687 = vrot.lane.b32.xlu1 %v679_v59, %s2561_s2 }
 0x3f9   :  { %691 = vrot.lane.b32.xlu1 %v681_v60, %s2561_s2 }
 0x3fd   :  { %693 = vrot.lane.b32.xlu1 %v682_v61, %s2561_s2 }
 0x401   :  { %342 = vperm.xlu1 %2460, %v2470_v62  }
 0x405   :  { %347 = vperm.xlu1 %2460, %v2472_v63  }
 0x463   :  { %v690_v8 = vpop.permute.xlu1 %689 }
 0x464   :  { %v700_v9 = vadd.f32 %v690_v8, %v680_v57  ;;  %v2850_v57 = vrot.slane %v852_v53, %v2847_v54  ;;  %v1217_v8 = vrot.slane %v2241_v3, %v2839_v42 }
 0x466   :  { %v2210_v12 = vmul.f32 -1.442695, %v700_v9  ;;  %v1218_v9 = vcombine.low %v1213_v4, %v1217_v8 }
 0x467   :  { %v688_v14 = vpop.permute.xlu1 %687 }
 0x468   :  { %2473 = vpow2.f32 %v2210_v12  ;;  %v699_v15 = vadd.f32 %v688_v14, %v679_v59  ;;  %v1225_v12 = vrot.slane %v1218_v9, %v2847_v54 }
 0x469   :  { %2475 = vpow2.f32 %v2202_v13  ;;  %v2256_v13 = vld [vmem:[%s3628_s3 + $0x3] ss:$8 sm:$0x3] }
 0x46a   :  { %v2209_v17 = vmul.f32 -1.442695, %v699_v15  ;;  %v1388_v14 = vrot.slane %v2256_v13, %v2836_v16  ;;  %v1392_v15 = vrot.slane %v2256_v13, %v2839_v42 }
 0x46b   :  { %v692_v18 = vpop.permute.xlu1 %691 }
 0x46c   :  { %2477 = vpow2.f32 %v2209_v17  ;;  %v701_v20 = vadd.f32 %v692_v18, %v681_v60  ;;  %v1026_v60 = vrot.slane %v2226_v58, %v2836_v16  ;;  %v1393_v17 = vcombine.low %v1388_v14, %v1392_v15 }
 0x46e   :  { %v2211_v21 = vmul.f32 -1.442695, %v701_v20  ;;  %v2892_v18 = vrot.slane %v1393_v17, %v2847_v54  ;;  %v2271_v20 = vld [vmem:[%s3628_s3 + $0x4] ss:$8 sm:$0x3] }
 0x46f   :  { %v694_v22 = vpop.permute.xlu1 %693 }
 0x470   :  { %2479 = vpow2.f32 %v2211_v21  ;;  %v702_v23 = vadd.f32 %v694_v22, %v682_v61  ;;  %v1030_v61 = vrot.slane %v2226_v58, %v2839_v42  ;;  %v1559_v21 = vrot.slane %v2271_v20, %v2836_v16 }
 0x471   :  { %v1563_v22 = vrot.slane %v2271_v20, %v2839_v42 }
 0x472   :  { %v2212_v24 = vmul.f32 -1.442695, %v702_v23  ;;  %v1031_v62 = vcombine.low %v1026_v60, %v1030_v61 }
 0x473   :  { %v1564_v23 = vcombine.low %v1559_v21, %v1563_v22 }
 0x474   :  { %2481 = vpow2.f32 %v2212_v24  ;;  %v1038_v63 = vrot.slane %v1031_v62, %v2847_v54 }
 0x475   :  { %v2474_v25 = vpop.eup %2473  ;;  %v1571_v24 = vrot.slane %v1564_v23, %v2847_v54 }
 0x476   :  { %v716_v19 = vadd.f32 1.0, %v2474_v25  ;;  %v2476_v26 = vpop.eup %2475  ;;  %v2286_v25 = vld [vmem:[%s3628_s3 + $0x5] ss:$8 sm:$0x3] }
 0x477   :  { %v326_v30 = vadd.f32 1.0, %v2476_v26  ;;  %v1749_v26 = vrot.slane %v2286_v25, %v2839_v42 }
 0x478   :  { %2483 = vrcp.f32 %v716_v19  ;;  %v1745_v19 = vrot.slane %v2286_v25, %v2836_v16 }
 0x479   :  { %v2478_v27 = vpop.eup %2477 }
 0x47a   :  { %v715_v28 = vadd.f32 1.0, %v2478_v27  ;;  %v1750_v27 = vcombine.low %v1745_v19, %v1749_v26 }
 0x47c   :  { %2485 = vrcp.f32 %v715_v28  ;;  %v1757_v28 = vrot.slane %v1750_v27, %v2847_v54  ;;  %v343_v43 = vpop.permute.xlu1 %342 }
 0x47d   :  { %v2480_v31 = vpop.eup %2479  ;;  %2487 = vrcp.f32 %v326_v30  ;;  %v2301_v30 = vld [vmem:[%s3628_s3 + $0x6] ss:$8 sm:$0x3]  ;;  %s2605_s3 = smov 115   ;;  %v2933_v51 = vmul.f32 %v343_v43, %v2688_v6 }
 0x47e   :  { %v717_v32 = vadd.f32 1.0, %v2480_v31  ;;  %v1931_v31 = vrot.slane %v2301_v30, %v2836_v16 }
 0x480   :  { %2489 = vrcp.f32 %v717_v32  ;;  %v1935_v32 = vrot.slane %v2301_v30, %v2839_v42  ;;  %v348_v47 = vpop.permute.xlu1 %347 }
 0x481   :  { %v2482_v34 = vpop.eup %2481  ;;  %v2952_v6 = vmul.f32 %v348_v47, %v2680_v2 }
 0x482   :  { %v718_v38 = vadd.f32 1.0, %v2482_v34  ;;  %v1936_v34 = vcombine.low %v1931_v31, %v1935_v32 }
 0x484   :  { %2491 = vrcp.f32 %v718_v38  ;;  %v2927_v38 = vrot.slane %v1936_v34, %v2847_v54  ;;  %v2939_v54 = vmul.f32 %v338_v44, %v2696_v10 }
 0x485   :  { %v2484_v48 = vpop.eup %2483 }
 0x486   :  { %734 = vperm.xlu0 %2459, %v2484_v48  }
 0x489   :  { %v2486_v52 = vpop.eup %2485 }
 0x48a   :  { %729 = vperm.xlu1 %2460, %v2486_v52   ;;  %v2488_v55 = vpop.eup %2487  ;;  %v2936_v52 = vmul.f32 %v343_v43, %v2690_v7  ;;  %v2955_v7 = vmul.f32 %v348_v47, %v2686_v5 }
 0x48d   :  { %v2490_v56 = vpop.eup %2489 }
 0x48e   :  { %352 = vperm.xlu1 %2460, %v2488_v55   ;;  %739 = vperm.xlu0 %2459, %v2490_v56   ;;  %v2942_v55 = vmul.f32 %v338_v44, %v2698_v11 }
 0x490   :  { %v372_v58 = vadd.f32 %v2936_v52, %v2942_v55 }
 0x491   :  { %v2492_v59 = vpop.eup %2491 }
 0x492   :  { %744 = vperm.xlu0 %2459, %v2492_v59   ;;  %877 = vrot.lane.b32.xlu1 %v2850_v57, %s3634_s18  ;;  %s2598_s18 = smov 114   ;;  %v373_v3 = vadd.f32 %v372_v58, %v2955_v7 }
 0x496   :  { %925 = vrot.lane.b32.xlu1 %v2850_v57, %s3635_s19  ;;  %901 = vrot.lane.b32.xlu0 %v2850_v57, %s3649_s20  ;;  %s2600_s19 = smov 18   ;;  %s3120_s20 = sld [smem:[#allocation8 + $0x24]] }
 0x49a   :  { %973 = vrot.lane.b32.xlu1 %v2850_v57, %s3633_s21  ;;  %949 = vrot.lane.b32.xlu0 %v2850_v57, %s2568_s22  ;;  %s2584_s22 = smov 112   ;;  %s2593_s21 = smov 17  }
 0x49e   :  { %1039 = vrot.lane.b32.xlu1 %v1038_v63, %s3638_s23  ;;  %997 = vrot.lane.b32.xlu0 %v2850_v57, %s3645_s26  ;;  %s3069_s23 = sld [smem:[#allocation8 + $0x5b]] }
 0x49f   :  { %s3103_s26 = sld [smem:[#allocation8 + $0x16]] }
 0x4a2   :  { %1087 = vrot.lane.b32.xlu1 %v1038_v63, %s3640_s4  ;;  %1063 = vrot.lane.b32.xlu0 %v1038_v63, %s3639_s0  ;;  %s3077_s0 = sld [smem:[#allocation8 + $0x1]] }
 0x4a3   :  { %s3083_s4 = sld [smem:[#allocation8 + $0x32]] }
 0x4a6   :  { %1135 = vrot.lane.b32.xlu1 %v1038_v63, %s2573_s29  ;;  %1111 = vrot.lane.b32.xlu0 %v1038_v63, %s3641_s30  ;;  %s2587_s29 = smov 81   ;;  %s3087_s30 = sld [smem:[#allocation8 + $0x8]] }
 0x4aa   :  { %1183 = vrot.lane.b32.xlu1 %v1038_v63, %s3637_s6  ;;  %1159 = vrot.lane.b32.xlu0 %v1038_v63, %s2576_s7  ;;  %s3065_s6 = sld [smem:[#allocation8 + $0x2a]] }
 0x4ae   :  { %1248 = vrot.lane.b32.xlu1 %v1225_v12, %s3646_s10  ;;  %1226 = vrot.lane.b32.xlu0 %v1225_v12, %s3644_s11  ;;  %s3101_s11 = sld [smem:[#allocation8 + $0x40]] }
 0x4af   :  { %s3105_s10 = sld [smem:[#allocation8 + $0x47]] }
 0x4b2   :  { %1292 = vrot.lane.b32.xlu1 %v1225_v12, %s2561_s2  ;;  %1270 = vrot.lane.b32.xlu0 %v1225_v12, %s3648_s12  ;;  %s3116_s12 = sld [smem:[#allocation8 + $0x4e]] }
 0x4b6   :  { %1338 = vrot.lane.b32.xlu1 %v1225_v12, %s3642_s13  ;;  %1314 = vrot.lane.b32.xlu0 %v1225_v12, %s2581_s14  ;;  %s2590_s14 = smov 97   ;;  %s3089_s13 = sld [smem:[#allocation8 + $0x39]] }
 0x4ba   :  { %1401 = vrot.lane.b32.xlu1 %v2892_v18, %s2582_s16  ;;  %1360 = vrot.lane.b32.xlu0 %v1225_v12, %s3643_s17  ;;  %s3099_s17 = sld [smem:[#allocation8 + $0xf]] }
 0x4be   :  { %1445 = vrot.lane.b32.xlu1 %v2892_v18, %s2584_s22  ;;  %1423 = vrot.lane.b32.xlu0 %v2892_v18, %s2585_s27 }
 0x4c2   :  { %1509 = vrot.lane.b32.xlu1 %v2892_v18, %s2586_s28  ;;  %1485 = vrot.lane.b32.xlu0 %v2892_v18, %s3632_s25  ;;  %s3636_s25 = smov 51  }
 0x4c6   :  { %1572 = vrot.lane.b32.xlu1 %v1571_v24, %s2587_s29  ;;  %1531 = vrot.lane.b32.xlu0 %v2892_v18, %s2588_s8  ;;  %s2594_s29 = smov 33  }
 0x4ca   :  { %1620 = vrot.lane.b32.xlu1 %v1571_v24, %s2589_s9  ;;  %1596 = vrot.lane.b32.xlu0 %v1571_v24, %s2590_s14  ;;  %s2595_s9 = smov 49   ;;  %s2596_s14 = smov 82  }
 0x4ce   :  { %860 = vrot.lane.b32.xlu1 %v2850_v57, %s3647_s1  ;;  %1644 = vrot.lane.b32.xlu0 %v1571_v24, %s2592_s15  ;;  %s2597_s15 = smov 98   ;;  %s3109_s1 = sld [smem:[#allocation8 + $0x1d]] }
 0x4d2   :  { %1667 = vrot.lane.b32.xlu0 %v1571_v24, %s2593_s21  ;;  %s3030_s21 = sld [smem:[#allocation8 + $0x7]] }
 0x4d6   :  { %1691 = vrot.lane.b32.xlu0 %v1571_v24, %s2594_s29  ;;  %s2601_s29 = smov 34  }
 0x4da   :  { %1715 = vrot.lane.b32.xlu0 %v1571_v24, %s2595_s9  ;;  %s2602_s9 = smov 50  }
 0x4de   :  { %1758 = vrot.lane.b32.xlu0 %v1757_v28, %s2596_s14  ;;  %s2604_s14 = smov 99  }
 0x4e2   :  { %1782 = vrot.lane.b32.xlu0 %v1757_v28, %s2597_s15  ;;  %s2608_s15 = smov 19  }
 0x4e6   :  { %1806 = vrot.lane.b32.xlu0 %v1757_v28, %s2598_s18  ;;  %s2603_s18 = smov 83  }
 0x4ea   :  { %1830 = vrot.lane.b32.xlu0 %v1757_v28, %s2599_s24  ;;  %s2609_s24 = smov 35  }
 0x4ee   :  { %1853 = vrot.lane.b32.xlu0 %v1757_v28, %s2600_s19  ;;  %s2607_s19 = smov 3  }
 0x4f2   :  { %1877 = vrot.lane.b32.xlu0 %v1757_v28, %s2601_s29  ;;  %s3032_s29 = sld [smem:[#allocation8 + $0x38]] }
 0x4f6   :  { %1901 = vrot.lane.b32.xlu0 %v1757_v28, %s2602_s9  ;;  %s3034_s9 = sld [smem:[#allocation8 + $0xe]] }
 0x4fa   :  { %1944 = vrot.lane.b32.xlu0 %v2927_v38, %s2603_s18  ;;  %s3036_s18 = sld [smem:[#allocation8 + $0x3f]] }
 0x4fe   :  { %1968 = vrot.lane.b32.xlu0 %v2927_v38, %s2604_s14  ;;  %s3042_s14 = sld [smem:[#allocation8 + $0x15]] }
 0x501   :  { %v735_v48 = vpop.permute.xlu0 %734 }
 0x502   :  { %1992 = vrot.lane.b32.xlu0 %v2927_v38, %s2605_s3  ;;  %v2958_v10 = vmul.f32 %v735_v48, %v2743_v40  ;;  %v2961_v11 = vmul.f32 %v735_v48, %v2745_v41  ;;  %s3044_s3 = sld [smem:[#allocation8 + $0x46]] }
 0x504   :  { %3665 = vst [vmem:[#allocation13_spill] sm:$0xff] %v2958_v10  ;;  %3666 = vst [vmem:[#allocation14_spill] sm:$0xff] %v2961_v11 }
 0x505   :  { %v730_v53 = vpop.permute.xlu1 %729 }
 0x506   :  { %v2945_v56 = vmul.f32 %v730_v53, %v2753_v45  ;;  %v2948_v57 = vmul.f32 %v730_v53, %v2755_v46  ;;  %2016 = vrot.lane.b32.xlu0 %v2927_v38, %s2607_s19  ;;  %v389_v45 = vunpack.c.0.s8 %v388_v50  ;;  %v363_v46 = vadd.f32 %v2933_v51, %v2939_v54  ;;  %s3046_s19 = sld [smem:[#allocation8 + $0x1c]] }
 0x508   :  { %v755_v2 = vadd.f32 %v2958_v10, %v2945_v56  ;;  %v764_v5 = vadd.f32 %v2961_v11, %v2948_v57  ;;  %v364_v63 = vadd.f32 %v363_v46, %v2952_v6 }
 0x509   :  { %v740_v59 = vpop.permute.xlu0 %739  ;;  %v353_v60 = vpop.permute.xlu1 %352 }
 0x50a   :  { %v2972_v40 = vmul.f32 %v740_v59, %v2737_v37  ;;  %v2975_v41 = vmul.f32 %v740_v59, %v2741_v39  ;;  %v2978_v61 = vmul.f32 %v353_v60, %v2676_v0  ;;  %v2981_v62 = vmul.f32 %v353_v60, %v2678_v1  ;;  %2040 = vrot.lane.b32.xlu0 %v2927_v38, %s2608_s15  ;;  %s3048_s15 = sld [smem:[#allocation8 + $0x4d]] }
 0x50b   :  { %v408_v37 = vmax.f32 %v2939_v54, %v2952_v6  ;;  %v417_v39 = vmax.f32 %v2942_v55, %v2955_v7  ;;  %v2993_v1 = vsub.s32 %v389_v45, %v2833_v33 }
 0x50c   :  { %3667 = vst [vmem:[#allocation15_spill] sm:$0xff] %v2972_v40  ;;  %3668 = vst [vmem:[#allocation16_spill] sm:$0xff] %v2975_v41  ;;  %v756_v4 = vadd.f32 %v755_v2, %v2972_v40  ;;  %v765_v0 = vadd.f32 %v764_v5, %v2975_v41  ;;  %v365_v8 = vadd.f32 %v364_v63, %v2978_v61 }
 0x50d   :  { %v374_v9 = vadd.f32 %v373_v3, %v2981_v62  ;;  %v409_v12 = vmax.f32 %v2933_v51, %v2978_v61  ;;  %v418_v13 = vmax.f32 %v2936_v52, %v2981_v62  ;;  %v745_v14 = vpop.permute.xlu0 %744  ;;  %v3001_v15 = vpop.permute.xlu1 %877  ;;  %v795_v17 = vmax.f32 %v2945_v56, %v2972_v40 }
 0x50e   :  { %v804_v33 = vmax.f32 %v2948_v57, %v2975_v41  ;;  %v3008_v20 = vmul.f32 %v745_v14, %v2733_v35  ;;  %v3011_v21 = vmul.f32 %v745_v14, %v2735_v36  ;;  %2064 = vrot.lane.b32.xlu0 %v2927_v38, %s2609_s24  ;;  %v366_v22 = vrot.slane %v365_v8, 4  ;;  %s3054_s24 = sld [smem:[#allocation8 + $0x23]] }
 0x50f   :  { %v375_v23 = vrot.slane %v374_v9, 4  ;;  %v410_v24 = vmax.f32 %v408_v37, %v409_v12  ;;  %v419_v25 = vmax.f32 %v417_v39, %v418_v13 }
 0x510   :  { %3669 = vst [vmem:[#allocation17_spill] sm:$0xff] %v3008_v20  ;;  %3670 = vst [vmem:[#allocation18_spill] sm:$0xff] %v3011_v21  ;;  %v757_v19 = vadd.f32 %v756_v4, %v3008_v20  ;;  %v766_v26 = vadd.f32 %v765_v0, %v3011_v21  ;;  %v796_v27 = vmax.f32 %v2958_v10, %v3008_v20 }
 0x511   :  { %v805_v35 = vmax.f32 %v2961_v11, %v3011_v21  ;;  %v367_v28 = vadd.f32 %v366_v22, %v365_v8  ;;  %v376_v36 = vadd.f32 %v375_v23, %v374_v9  ;;  %v411_v30 = vrot.slane %v410_v24, 4  ;;  %v3020_v32 = vpop.permute.xlu0 %901  ;;  %v3022_v34 = vpop.permute.xlu1 %925 }
 0x512   :  { %v420_v31 = vrot.slane %v419_v25, 4  ;;  %v758_v43 = vrot.slane %v757_v19, 4  ;;  %v767_v44 = vrot.slane %v766_v26, 4  ;;  %v797_v47 = vmax.f32 %v795_v17, %v796_v27  ;;  %2088 = vrot.lane.b32.xlu0 %v2927_v38, %s3636_s25  ;;  %s3058_s25 = sld [smem:[#allocation8 + $0x54]] }
 0x513   :  { %v806_v48 = vmax.f32 %v804_v33, %v805_v35  ;;  %v368_v49 = vrot.slane %v367_v28, 2  ;;  %v377_v50 = vrot.slane %v376_v36, 2  ;;  %v412_v53 = vmax.f32 %v410_v24, %v411_v30 }
 0x514   :  { %v421_v45 = vmax.f32 %v419_v25, %v420_v31  ;;  %v759_v46 = vadd.f32 %v758_v43, %v757_v19  ;;  %v768_v58 = vadd.f32 %v767_v44, %v766_v26  ;;  %v798_v2 = vrot.slane %v797_v47, 4 }
 0x515   :  { %v807_v5 = vrot.slane %v806_v48, 4  ;;  %v369_v59 = vadd.f32 %v368_v49, %v367_v28  ;;  %v378_v60 = vadd.f32 %v377_v50, %v376_v36  ;;  %v413_v63 = vrot.slane %v412_v53, 2  ;;  %v3026_v37 = vpop.permute.xlu0 %949  ;;  %v3028_v39 = vpop.permute.xlu1 %973 }
 0x516   :  { %v422_v3 = vrot.slane %v421_v45, 2  ;;  %v760_v4 = vrot.slane %v759_v46, 2  ;;  %v769_v0 = vrot.slane %v768_v58, 2  ;;  %v799_v8 = vmax.f32 %v797_v47, %v798_v2 }
 0x517   :  { %v808_v38 = vmax.f32 %v806_v48, %v807_v5  ;;  %v370_v9 = vrot.slane %v369_v59, 1  ;;  %v379_v12 = vrot.slane %v378_v60, 1  ;;  %v414_v13 = vmax.f32 %v412_v53, %v413_v63 }
 0x518   :  { %v423_v14 = vmax.f32 %v421_v45, %v422_v3  ;;  %v761_v17 = vadd.f32 %v760_v4, %v759_v46  ;;  %v770_v33 = vadd.f32 %v769_v0, %v768_v58  ;;  %v800_v22 = vrot.slane %v799_v8, 2 }
 0x519   :  { %v809_v23 = vrot.slane %v808_v38, 2  ;;  %v371_v24 = vadd.f32 %v370_v9, %v369_v59  ;;  %v380_v25 = vadd.f32 %v379_v12, %v378_v60  ;;  %v415_v19 = vrot.slane %v414_v13, 1  ;;  %v3038_v27 = vpop.permute.xlu0 %997  ;;  %v3040_v35 = vpop.permute.xlu1 %1039 }
 0x51a   :  { %v424_v26 = vrot.slane %v423_v14, 1  ;;  %v762_v28 = vrot.slane %v761_v17, 1  ;;  %v771_v36 = vrot.slane %v770_v33, 1  ;;  %v801_v30 = vmax.f32 %v799_v8, %v800_v22 }
 0x51b   :  { %v810_v31 = vmax.f32 %v808_v38, %v809_v23  ;;  %v382_v43 = vmul.f32 0.03125, %v371_v24  ;;  %v383_v44 = vmul.f32 0.03125, %v380_v25  ;;  %v416_v47 = vmax.f32 %v414_v13, %v415_v19 }
 0x51c   :  { %v425_v48 = vmax.f32 %v423_v14, %v424_v26  ;;  %v763_v49 = vadd.f32 %v762_v28, %v761_v17  ;;  %v772_v50 = vadd.f32 %v771_v36, %v770_v33  ;;  %v802_v53 = vrot.slane %v801_v30, 1 }
 0x51d   :  { %v811_v45 = vrot.slane %v810_v31, 1  ;;  %v386_v46 = vcombine.low %v382_v43, %v383_v44  ;;  %v3050_v2 = vpop.permute.xlu0 %1063  ;;  %v3052_v5 = vpop.permute.xlu1 %1087  ;;  %v872_v26 = vstv %s3030_s21  ;;  %v874_v28 = vstv %s3032_s29  ;;  %s3124_s21 = sld [smem:[#allocation8 + $0x55]] }
 0x51e   :  { %v428_v58 = vcombine.low %v416_v47, %v425_v48  ;;  %v773_v59 = vmul.f32 0.03125, %v763_v49  ;;  %v774_v60 = vmul.f32 0.03125, %v772_v50  ;;  %v803_v63 = vmax.f32 %v801_v30, %v802_v53  ;;  %s3129_s29 = sld [smem:[#allocation8 + $0x2b]] }
 0x51f   :  { %v812_v3 = vmax.f32 %v810_v31, %v811_v45  ;;  %v393_v4 = vrot.slane %v386_v46, %v2993_v1  ;;  %v896_v36 = vstv %s3034_s9  ;;  %v879_v30 = vrot.slane %v3001_v15, 6  ;;  %s3135_s9 = sld [smem:[#allocation8 + $0x1e]] }
 0x520   :  { %v435_v0 = vrot.slane %v428_v58, %v2993_v1  ;;  %v777_v38 = vcombine.low %v773_v59, %v774_v60  ;;  %v898_v31 = vstv %s3036_s18  ;;  %v903_v58 = vrot.slane %v3020_v32, 6  ;;  %s3139_s18 = sld [smem:[#allocation8 + $0x4f]] }
 0x521   :  { %v815_v9 = vcombine.low %v803_v63, %v812_v3  ;;  %v400_v12 = vrot.slane %v393_v4, %v2993_v1  ;;  %v3071_v14 = vpop.permute.xlu0 %1111  ;;  %v3073_v17 = vpop.permute.xlu1 %1135  ;;  %v920_v59 = vstv %s3042_s14  ;;  %v922_v60 = vstv %s3044_s3  ;;  %s3147_s14 = sld [smem:[#allocation8 + $0x2c]] }
 0x522   :  { %v442_v13 = vrot.slane %v435_v0, %v2993_v1  ;;  %v784_v33 = vrot.slane %v777_v38, %v2993_v1  ;;  %v881_v8 = vsel %vm3657_vm7, %v879_v30, %v3001_v15  ;;  %s3149_s3 = sld [smem:[#allocation8 + $0x5d]]  ;;  %vm3662_vm7 = vcmask 375808  }
 0x523   :  { %v822_v29 = vrot.slane %v815_v9, %v2993_v1  ;;  %407 = vst.msk [vmem:[#allocation2 + $0x2] ss:$2 sm:$0x3] %vm3061_vm6, %v400_v12 }
 0x524   :  { %446 = vst.msk [vmem:[#allocation2 + $0xa] ss:$2 sm:$0x3] %vm3061_vm6, %v442_v13  ;;  %v791_v22 = vrot.slane %v784_v33, %v2993_v1 }
 0x525   :  { %v829_v23 = vrot.slane %v822_v29, %v2993_v1  ;;  %v3091_v24 = vpop.permute.xlu0 %1159  ;;  %v3093_v25 = vpop.permute.xlu1 %1183  ;;  %v905_v29 = vsel %vm3659_vm8, %v903_v58, %v3020_v32  ;;  %v992_v58 = vstv %s3065_s6  ;;  %s3205_s6 = sld [smem:[#allocation8 + $0x26]]  ;;  %vm1670_vm8 = vcmask 138240  }
 0x526   :  { %794 = vst.msk [vmem:[#allocation2 + $0x3] ss:$2 sm:$0x3] %vm3061_vm6, %v791_v22  ;;  %v927_v22 = vrot.slane %v3022_v34, 6 }
 0x527   :  { %832 = vst.msk [vmem:[#allocation2 + $0xb] ss:$2 sm:$0x3] %vm3061_vm6, %v829_v23  ;;  %v944_v23 = vstv %s3046_s19  ;;  %s3155_s19 = sld [smem:[#allocation8 + $0xa]]  ;;  %vm1114_vm6 = vcmask 1031168  }
 0x529   :  { %v3107_v1 = vpop.permute.xlu0 %1226  ;;  %v3111_v19 = vpop.permute.xlu1 %1248 }
 0x52d   :  { %v870_v43 = vld [vmem:[#allocation2] sm:$0x3f]  ;;  %v3122_v48 = vpop.permute.xlu0 %1270  ;;  %v3131_v0 = vpop.permute.xlu1 %1292 }
 0x52e   :  { %v871_v44 = vld [vmem:[#allocation2 + $0x8] sm:$0x3f]  ;;  %v894_v47 = vld [vmem:[#allocation2] sm:$0x3f]  ;;  %v873_v49 = vmul.f32 %v872_v26, %v870_v43  ;;  %v946_v26 = vstv %s3048_s15  ;;  %s3169_s15 = sld [smem:[#allocation8 + $0x5c]] }
 0x52f   :  { %v875_v50 = vmul.f32 %v874_v28, %v871_v44  ;;  %v895_v53 = vld [vmem:[#allocation2 + $0x8] sm:$0x3f]  ;;  %v897_v45 = vmul.f32 %v896_v36, %v894_v47  ;;  %v918_v63 = vld [vmem:[#allocation2] sm:$0x3f]  ;;  %v929_v47 = vsel %vm3660_vm9, %v927_v22, %v3022_v34  ;;  %v1058_v22 = vstv %s3087_s30  ;;  %s3195_s30 = sld [smem:[#allocation8 + $0x10]] }
 0x530   :  { %v899_v46 = vmul.f32 %v898_v31, %v895_v53  ;;  %v919_v3 = vld [vmem:[#allocation2 + $0x8] sm:$0x3f]  ;;  %v921_v13 = vmul.f32 %v920_v59, %v918_v63  ;;  %v942_v28 = vld [vmem:[#allocation2 + $0x2] sm:$0x3f]  ;;  %v970_v53 = vstv %s3058_s25  ;;  %v994_v59 = vstv %s3069_s23  ;;  %s3180_s23 = sld [smem:[#allocation8 + $0x33]] }
 0x531   :  { %v876_v4 = vadd.f32 %v875_v50, %v873_v49  ;;  %v3137_v38 = vpop.permute.xlu0 %1314  ;;  %v923_v33 = vmul.f32 %v922_v60, %v919_v3  ;;  %v943_v15 = vld [vmem:[#allocation2 + $0xa] sm:$0x3f]  ;;  %v945_v32 = vmul.f32 %v944_v23, %v942_v28  ;;  %v3153_v44 = vpop.permute.xlu1 %1338  ;;  %v951_v49 = vrot.slane %v3026_v37, 6  ;;  %s3209_s25 = sld [smem:[#allocation8 + $0x18]]  ;;  %v1416_v11 = vld [vmem:[#allocation2] sm:$0x3f] }
 0x532   :  { %v900_v12 = vadd.f32 %v899_v46, %v897_v45  ;;  %v947_v43 = vmul.f32 %v946_v26, %v943_v15  ;;  %v968_v50 = vstv %s3054_s24  ;;  %v966_v45 = vld [vmem:[#allocation2 + $0x2] sm:$0x3f]  ;;  %v967_v46 = vld [vmem:[#allocation2 + $0xa] sm:$0x3f]  ;;  %v1017_v60 = vstv %s3077_s0  ;;  %s3191_s0 = sld [smem:[#allocation8 + $0x3a]] }
 0x533   :  { %v883_v9 = vmul.f32 %v881_v8, %v876_v4  ;;  %v924_v31 = vadd.f32 %v923_v33, %v921_v13  ;;  %v1019_v63 = vstv %s3083_s4  ;;  %v969_v8 = vmul.f32 %v968_v50, %v966_v45  ;;  %v991_v13 = vld [vmem:[#allocation2 + $0xa] sm:$0x3f]  ;;  %s3183_s4 = sld [smem:[#allocation8 + $0x9]]  ;;  %v1015_v45 = vld [vmem:[#allocation2] sm:$0x3f] }
 0x534   :  { %v907_v30 = vmul.f32 %v905_v29, %v900_v12  ;;  %v948_v4 = vadd.f32 %v947_v43, %v945_v32  ;;  %v990_v12 = vld [vmem:[#allocation2 + $0x2] sm:$0x3f]  ;;  %v953_v33 = vsel %vm952_vm10, %v951_v49, %v3026_v37  ;;  %v975_v29 = vrot.slane %v3028_v39, 6  ;;  %s3219_s24 = sld [smem:[#allocation8 + $0x49]]  ;;  %v1177_v10 = vld [vmem:[#allocation2 + $0xa] sm:$0x3f] }
 0x535   :  { %885 = vrot.lane.b32.xlu1 %v883_v9, %s2584_s22  ;;  %v3151_v36 = vpop.permute.xlu0 %1360  ;;  %s3163_s22 = sld [smem:[#allocation8 + $0x3b]]  ;;  %v931_v3 = vmul.f32 %v929_v47, %v924_v31  ;;  %v971_v9 = vmul.f32 %v970_v53, %v967_v46  ;;  %v1309_v28 = vstv %s3135_s9  ;;  %v1311_v15 = vstv %s3139_s18  ;;  %v1308_v31 = vld [vmem:[#allocation2 + $0xa] sm:$0x3f]  ;;  %v3187_v32 = vpop.permute.xlu1 %1401  ;;  %s2612_s18 = smov 62  }
 0x536   :  { %v993_v37 = vmul.f32 %v992_v58, %v990_v12  ;;  %v995_v43 = vmul.f32 %v994_v59, %v991_v13  ;;  %v955_v50 = vmul.f32 %v953_v33, %v948_v4  ;;  %v1016_v46 = vld [vmem:[#allocation2 + $0x8] sm:$0x3f]  ;;  %v1355_v26 = vstv %s3147_s14  ;;  %v1353_v13 = vld [vmem:[#allocation2 + $0x2] sm:$0x3f]  ;;  %s3222_s9 = sld [smem:[#allocation8 + $0x57]] }
 0x537   :  { %v972_v53 = vadd.f32 %v971_v9, %v969_v8  ;;  %v1357_v23 = vstv %s3149_s3  ;;  %v977_v58 = vsel %vm3655_vm11, %v975_v29, %v3028_v39  ;;  %v999_v59 = vrot.slane %v3038_v27, 6  ;;  %v1354_v47 = vld [vmem:[#allocation2 + $0xa] sm:$0x3f]  ;;  %v1056_v39 = vld [vmem:[#allocation2] sm:$0x3f]  ;;  %s3229_s14 = sld [smem:[#allocation8 + $0x4]] }
 0x538   :  { %v1312_v12 = vmul.f32 %v1311_v15, %v1308_v31  ;;  %v1316_v4 = vrot.slane %v3137_v38, 6  ;;  %v1418_v8 = vstv %s3155_s19  ;;  %v996_v33 = vadd.f32 %v995_v43, %v993_v37  ;;  %v1057_v15 = vld [vmem:[#allocation2 + $0x8] sm:$0x3f]  ;;  %s3291_s3 = sld [smem:[#allocation8 + $0x5f]] }
 0x539   :  { %909 = vrot.lane.b32.xlu1 %v907_v30, %s2585_s27  ;;  %v3171_v34 = vpop.permute.xlu0 %1423  ;;  %s3173_s27 = sld [smem:[#allocation8 + $0x2]]  ;;  %v1307_v30 = vld [vmem:[#allocation2 + $0x2] sm:$0x3f]  ;;  %v1018_v21 = vmul.f32 %v1017_v60, %v1015_v45  ;;  %v1020_v20 = vmul.f32 %v1019_v63, %v1016_v46  ;;  %v1356_v31 = vmul.f32 %v1355_v26, %v1353_v13  ;;  %v1358_v40 = vmul.f32 %v1357_v23, %v1354_v47  ;;  %v3213_v37 = vpop.permute.xlu1 %1445 }
 0x53a   :  { %v1001_v60 = vsel %vm3656_vm12, %v999_v59, %v3038_v27  ;;  %v1041_v63 = vrot.slane %v3040_v35, 6  ;;  %v1362_v45 = vrot.slane %v3151_v36, 6  ;;  %v3673_v23 = vstv %s3089_s13  ;;  %s3234_s13 = sld [smem:[#allocation8 + $0x35]]  ;;  %v1080_v13 = vld [vmem:[#allocation2] sm:$0x3f] }
 0x53b   :  { %v1420_v9 = vstv %s3163_s22  ;;  %v1359_v26 = vadd.f32 %v1358_v40, %v1356_v31  ;;  %v1061_v47 = vmul.f32 %v3673_v23, %v1057_v15  ;;  %v1419_v46 = vmul.f32 %v1418_v8, %v1416_v11  ;;  %s3317_s19 = sld [smem:[#allocation8 + $0x3d]] }
 0x53c   :  { %v1363_v27 = vsel %vm1170_vm0, %v1362_v45, %v3151_v36  ;;  %v1021_v59 = vadd.f32 %v1020_v20, %v1018_v21  ;;  %v1043_v11 = vsel %vm3663_vm13, %v1041_v63, %v3040_v35  ;;  %v1065_v36 = vrot.slane %v3050_v2, 6  ;;  %s3327_s22 = sld [smem:[#allocation8 + $0x41]] }
 0x53d   :  { %933 = vrot.lane.b32.xlu1 %v931_v3, %s2582_s16  ;;  %v3193_v49 = vpop.permute.xlu0 %1485  ;;  %v1310_v3 = vmul.f32 %v1309_v28, %v1307_v30  ;;  %s2611_s16 = smov 64   ;;  %v979_v28 = vmul.f32 %v977_v58, %v972_v53  ;;  %v1318_v30 = vsel %vm1317_vm14, %v1316_v4, %v3137_v38  ;;  %v1059_v53 = vmul.f32 %v1058_v22, %v1056_v39  ;;  %v1081_v4 = vld [vmem:[#allocation2 + $0x8] sm:$0x3f] }
 0x53e   :  { %v1106_v38 = vstv %s3103_s26  ;;  %v1003_v22 = vmul.f32 %v1001_v60, %v996_v33  ;;  %v1108_v8 = vstv %s3105_s10  ;;  %v1130_v33 = vstv %s3109_s1  ;;  %s3254_s10 = sld [smem:[#allocation8 + $0x43]]  ;;  %s3678_s26 = smov 77  }
 0x53f   :  { %v1313_v29 = vadd.f32 %v1312_v12, %v1310_v3  ;;  %v1365_v3 = vmul.f32 %v1363_v27, %v1359_v26  ;;  %v1425_v12 = vrot.slane %v3171_v34, 6  ;;  %v1132_v20 = vstv %s3116_s12  ;;  %v1460_v27 = vld [vmem:[#allocation2 + $0x2] sm:$0xf]  ;;  %s3679_s12 = smov 95   ;;  %s3309_s1 = sld [smem:[#allocation8 + $0xc]] }
 0x540   :  { %v3674_v60 = vstv %s3099_s17  ;;  %v1067_v26 = vsel %vm3664_vm15, %v1065_v36, %v3050_v2  ;;  %v1089_v23 = vrot.slane %v3052_v5, 6  ;;  %vm1138_vm10 = vcmask 113664   ;;  %s3677_s17 = smov 111  }
 0x541   :  { %957 = vrot.lane.b32.xlu1 %v955_v50, %s2611_s16  ;;  %v3207_v41 = vpop.permute.xlu0 %1531  ;;  %v1417_v50 = vld [vmem:[#allocation2 + $0x8] sm:$0x3f]  ;;  %v1320_v43 = vmul.f32 %v1318_v30, %v1313_v29  ;;  %v1426_v39 = vsel %vm912_vm5, %v1425_v12, %v3171_v34  ;;  %v3245_v29 = vpop.permute.xlu1 %1509  ;;  %v1045_v34 = vmul.f32 %v1043_v11, %v1021_v59  ;;  %v1083_v63 = vmul.f32 %v3674_v60, %v1080_v13  ;;  %s3340_s16 = sld [smem:[#allocation8 + $0x4b]] }
 0x542   :  { %v1421_v58 = vmul.f32 %v1420_v9, %v1417_v50  ;;  %v1062_v50 = vadd.f32 %v1061_v47, %v1059_v53  ;;  %v1104_v53 = vld [vmem:[#allocation2] sm:$0x3f]  ;;  %v1105_v47 = vld [vmem:[#allocation2 + $0x8] sm:$0x3f]  ;;  %v1113_v2 = vrot.slane %v3071_v14, 6  ;;  %v1504_v36 = vstv %s3205_s6  ;;  %s3336_s6 = sld [smem:[#allocation8 + $0x1a]] }
 0x543   :  { %1322 = vrot.lane.b32.xlu0 %v1320_v43, %s2612_s18  ;;  %v3675_v43 = vstv %s3101_s11  ;;  %v1506_v13 = vstv %s3222_s9  ;;  %s3676_s11 = smov 109   ;;  %v1091_v59 = vsel %vm1090_vm2, %v1089_v23, %v3052_v5  ;;  %v1107_v11 = vmul.f32 %v1106_v38, %v1104_v53  ;;  %v1549_v23 = vld [vmem:[#allocation2 + $0x8] sm:$0x3f]  ;;  %s3357_s9 = sld [smem:[#allocation8 + $0x28]] }
 0x544   :  { %v1422_v9 = vadd.f32 %v1421_v58, %v1419_v46  ;;  %v1085_v45 = vmul.f32 %v3675_v43, %v1081_v4  ;;  %v1461_v46 = vld [vmem:[#allocation2 + $0xa] sm:$0xf]  ;;  %v1462_v58 = vstv %s3209_s25  ;;  %v1502_v4 = vld [vmem:[#allocation2 + $0x2] sm:$0x3f]  ;;  %v1069_v60 = vmul.f32 %v1067_v26, %v1062_v50  ;;  %s3344_s25 = sld [smem:[#allocation8 + $0x17]] }
 0x545   :  { %981 = vrot.lane.b32.xlu1 %v979_v28, %s2588_s8  ;;  %v3231_v40 = vpop.permute.xlu0 %1596  ;;  %s3247_s8 = sld [smem:[#allocation8 + $0x12]]  ;;  %v1573_v12 = vpop.permute.xlu1 %1572  ;;  %v1109_v15 = vmul.f32 %v1108_v8, %v1105_v47  ;;  %v1128_v28 = vld [vmem:[#allocation2 + $0x2] sm:$0x3f]  ;;  %v1511_v35 = vrot.slane %v3245_v29, 6  ;;  %v1505_v50 = vmul.f32 %v1504_v36, %v1502_v4  ;;  %v1137_v5 = vrot.slane %v3073_v17, 6 }
 0x546   :  { %v1428_v30 = vmul.f32 %v1426_v39, %v1422_v9  ;;  %v1503_v9 = vld [vmem:[#allocation2 + $0xa] sm:$0x3f]  ;;  %v1086_v43 = vadd.f32 %v1085_v45, %v1083_v63  ;;  %vm3661_vm14 = vcmask 244736   ;;  %v1550_v38 = vstv %s3229_s14  ;;  %v1548_v26 = vld [vmem:[#allocation2] sm:$0x3f]  ;;  %s3363_s18 = sld [smem:[#allocation8 + $0x59]] }
 0x547   :  { %1367 = vrot.lane.b32.xlu0 %v1365_v3, %s2576_s7  ;;  %s3273_s7 = sld [smem:[#allocation8 + $0x51]]  ;;  %v1463_v3 = vmul.f32 %v1462_v58, %v1460_v27  ;;  %v1507_v63 = vmul.f32 %v1506_v13, %v1503_v9  ;;  %v1552_v8 = vstv %s3234_s13  ;;  %vm1575_vm11 = vcmask 662528   ;;  %v1152_v36 = vld [vmem:[#allocation2 + $0x2] sm:$0x3f]  ;;  %v1153_v13 = vld [vmem:[#allocation2 + $0xa] sm:$0x3f] }
 0x548   :  { %v1115_v58 = vsel %vm1114_vm6, %v1113_v2, %v3071_v14  ;;  %v1110_v47 = vadd.f32 %v1109_v15, %v1107_v11  ;;  %v1512_v4 = vsel %vm102_vm3, %v1511_v35, %v3245_v29  ;;  %v1553_v14 = vmul.f32 %v1552_v8, %v1549_v23  ;;  %v1614_v29 = vld [vmem:[#allocation2 + $0x8] sm:$0x3f]  ;;  %s2615_s14 = smov 92   ;;  %s3385_s13 = sld [smem:[#allocation8 + $0x56]] }
 0x549   :  { %1005 = vrot.lane.b32.xlu1 %v1003_v22, %s2586_s28  ;;  %v3256_v31 = vpop.permute.xlu0 %1644  ;;  %s3262_s28 = sld [smem:[#allocation8 + $0x20]]  ;;  %v1464_v22 = vstv %s3219_s24  ;;  %v1508_v9 = vadd.f32 %v1507_v63, %v1505_v50  ;;  %vm1623_vm12 = vcmask 924672   ;;  %v1139_v11 = vsel %vm1138_vm10, %v1137_v5, %v3073_v17  ;;  %v1176_v63 = vld [vmem:[#allocation2 + $0x2] sm:$0x3f]  ;;  %s2614_s24 = smov 63  }
 0x54a   :  { %v1161_v21 = vrot.slane %v3091_v24, 6  ;;  %vm1122_vm10 = vcmask 646144   ;;  %vm1194_vm9 = vcmask 252928   ;;  %vm1995_vm13 = vcmask 941056  }
 0x54b   :  { %1430 = vrot.lane.b32.xlu0 %v1428_v30, %s3676_s11  ;;  %v1129_v30 = vld [vmem:[#allocation2 + $0xa] sm:$0x3f]  ;;  %s3693_s11 = smov 126   ;;  %vm984_vm15 = vcmask 392192  }
 0x54d   :  { %1047 = vrot.lane.b32.xlu1 %v1045_v34, %s2561_s2  ;;  %v3280_v39 = vpop.permute.xlu0 %1667  ;;  %v1465_v34 = vmul.f32 %v1464_v22, %v1461_v46  ;;  %s3287_s2 = sld [smem:[#allocation8 + $0x2e]]  ;;  %v1093_v46 = vmul.f32 %v1091_v59, %v1086_v43  ;;  %v1131_v22 = vmul.f32 %v1130_v33, %v1128_v28  ;;  %v1574_v59 = vrot.slane %v1573_v12, 6  ;;  %v1613_v28 = vld [vmem:[#allocation2] sm:$0x3f] }
 0x54e   :  { %v1615_v33 = vstv %s3247_s8  ;;  %v1664_v15 = vstv %s3273_s7  ;;  %v3680_v43 = vstv %s3120_s20  ;;  %s3682_s20 = smov 45   ;;  %s2616_s8 = smov 60  }
 0x54f   :  { %v1466_v45 = vadd.f32 %v1465_v34, %v1463_v3  ;;  %v1133_v3 = vmul.f32 %v1132_v20, %v1129_v30  ;;  %v1617_v20 = vstv %s3254_s10  ;;  %v1662_v35 = vstv %s3262_s28  ;;  %s3394_s10 = sld [smem:[#allocation8 + $0x6]]  ;;  %s2617_s28 = smov 28  }
 0x550   :  { %v1155_v34 = vmul.f32 %v3680_v43, %v1152_v36  ;;  %v3681_v30 = vstv %s3124_s21  ;;  %v1616_v5 = vmul.f32 %v1615_v33, %v1613_v28  ;;  %v1618_v36 = vmul.f32 %v1617_v20, %v1614_v29  ;;  %s3683_s21 = smov 79   ;;  %v1708_v29 = vld [vmem:[#allocation2 + $0x2] sm:$0x3f]  ;;  %v1709_v43 = vld [vmem:[#allocation2 + $0xa] sm:$0x3f]  ;;  %s3404_s7 = sld [smem:[#allocation8 + $0x34]] }
 0x551   :  { %1071 = vrot.lane.b32.xlu1 %v1069_v60, %s3677_s17  ;;  %v3296_v27 = vpop.permute.xlu0 %1691  ;;  %v1468_v53 = vmul.f32 %v1466_v45, %v2892_v18  ;;  %v1551_v60 = vmul.f32 %v1550_v38, %v1548_v26  ;;  %v1621_v18 = vpop.permute.xlu1 %1620  ;;  %v1157_v50 = vmul.f32 %v3681_v30, %v1153_v13  ;;  %v1514_v45 = vmul.f32 %v1512_v4, %v1508_v9  ;;  %s3412_s17 = sld [smem:[#allocation8 + $0x42]] }
 0x552   :  { %v1117_v38 = vmul.f32 %v1115_v58, %v1110_v47  ;;  %v1134_v8 = vadd.f32 %v1133_v3, %v1131_v22  ;;  %v1576_v26 = vsel %vm1575_vm11, %v1574_v59, %v1573_v12  ;;  %v1622_v23 = vrot.slane %v1621_v18, 6 }
 0x553   :  { %1470 = vrot.lane.b32.xlu0 %v1468_v53, %s3678_s26  ;;  %v1661_v53 = vld [vmem:[#allocation2 + $0xa] sm:$0x3f]  ;;  %v1554_v17 = vadd.f32 %v1553_v14, %v1551_v60  ;;  %v1669_v58 = vrot.slane %v3280_v39, 6  ;;  %v1710_v12 = vstv %s3287_s2  ;;  %v1712_v22 = vstv %s3291_s3  ;;  %s3410_s2 = sld [smem:[#allocation8 + $0x11]]  ;;  %s2618_s26 = smov 107  }
 0x554   :  { %v3684_v3 = vstv %s3129_s29  ;;  %v1665_v9 = vmul.f32 %v1664_v15, %v1661_v53  ;;  %v1141_v60 = vmul.f32 %v1139_v11, %v1134_v8  ;;  %v1158_v14 = vadd.f32 %v1157_v50, %v1155_v34  ;;  %v1202_v15 = vld [vmem:[#allocation2] sm:$0x3f]  ;;  %s2613_s29 = smov 124   ;;  %s3417_s3 = sld [smem:[#allocation8 + $0x1f]] }
 0x555   :  { %1095 = vrot.lane.b32.xlu1 %v1093_v46, %s3679_s12  ;;  %v3315_v2 = vpop.permute.xlu0 %1715  ;;  %v1660_v46 = vld [vmem:[#allocation2 + $0x2] sm:$0x3f]  ;;  %v1179_v13 = vmul.f32 %v3684_v3, %v1176_v63  ;;  %v1578_v4 = vmul.f32 %v1576_v26, %v1554_v17  ;;  %v3685_v33 = vstv %s3169_s15  ;;  %v1624_v28 = vsel %vm1623_vm12, %v1622_v23, %v1621_v18  ;;  %v1203_v63 = vld [vmem:[#allocation2 + $0x8] sm:$0x3f]  ;;  %s3350_s15 = sld [smem:[#allocation8 + $0x48]]  ;;  %s3694_s12 = smov 110  }
 0x556   :  { %v1663_v59 = vmul.f32 %v1662_v35, %v1660_v46  ;;  %v1181_v20 = vmul.f32 %v3685_v33, %v1177_v10  ;;  %v1163_v30 = vsel %vm3661_vm14, %v1161_v21, %v3091_v24  ;;  %v1185_v35 = vrot.slane %v3093_v25, 6  ;;  %v1264_v33 = vld [vmem:[#allocation2 + $0x8] sm:$0x3f] }
 0x557   :  { %1516 = vrot.lane.b32.xlu0 %v1514_v45, %s3682_s20  ;;  %v1619_v45 = vadd.f32 %v1618_v36, %v1616_v5  ;;  %vm1718_vm11 = vcmask 400384   ;;  %v1671_v10 = vsel %vm1670_vm8, %v1669_v58, %v3280_v39  ;;  %v1717_v18 = vrot.slane %v3315_v2, 6  ;;  %v1775_v5 = vld [vmem:[#allocation2] sm:$0x3f]  ;;  %v1776_v36 = vld [vmem:[#allocation2 + $0x8] sm:$0x3f] }
 0x558   :  { %v1777_v24 = vstv %s3309_s1  ;;  %v1779_v21 = vstv %s3317_s19  ;;  %v1666_v50 = vadd.f32 %v1665_v9, %v1663_v59  ;;  %v1713_v8 = vmul.f32 %v1712_v22, %v1709_v43  ;;  %v1242_v22 = vld [vmem:[#allocation2 + $0x8] sm:$0x3f]  ;;  %s3420_s1 = sld [smem:[#allocation8 + $0x14]] }
 0x559   :  { %1119 = vrot.lane.b32.xlu1 %v1117_v38, %s3683_s21  ;;  %v3334_v47 = vpop.permute.xlu0 %1758  ;;  %v1626_v34 = vmul.f32 %v1624_v28, %v1619_v45  ;;  %v1711_v38 = vmul.f32 %v1710_v12, %v1708_v29  ;;  %v1165_v26 = vmul.f32 %v1163_v30, %v1158_v14  ;;  %v1182_v23 = vadd.f32 %v1181_v20, %v1179_v13  ;;  %v1241_v12 = vld [vmem:[#allocation2] sm:$0x3f]  ;;  %s3425_s19 = sld [smem:[#allocation8 + $0x45]]  ;;  %s3695_s21 = smov 94  }
 0x55a   :  { %v3686_v46 = vstv %s3173_s27  ;;  %v3687_v17 = vstv %s3180_s23  ;;  %v1187_v58 = vsel %vm3662_vm7, %v1185_v35, %v3093_v25  ;;  %v1228_v3 = vrot.slane %v3107_v1, 6  ;;  %s3688_s27 = smov 47   ;;  %v1263_v14 = vld [vmem:[#allocation2] sm:$0x3f]  ;;  %s3380_s23 = sld [smem:[#allocation8 + $0x25]] }
 0x55b   :  { %1580 = vrot.lane.b32.xlu0 %v1578_v4, %s2613_s29  ;;  %v1205_v53 = vmul.f32 %v3686_v46, %v1202_v15  ;;  %v1207_v39 = vmul.f32 %v3687_v17, %v1203_v63  ;;  %v1267_v4 = vstv %s3327_s22  ;;  %v1673_v59 = vmul.f32 %v1671_v10, %v1666_v50  ;;  %v1823_v10 = vld [vmem:[#allocation2 + $0x2] sm:$0x3f]  ;;  %s2619_s22 = smov 75   ;;  %s3432_s20 = sld [smem:[#allocation8 + $0x50]] }
 0x55c   :  { %v1719_v13 = vsel %vm1718_vm11, %v1717_v18, %v3315_v2  ;;  %vm1785_vm8 = vcmask 801792   ;;  %v1825_v25 = vstv %s3336_s6  ;;  %v1714_v20 = vadd.f32 %v1713_v8, %v1711_v38  ;;  %v1824_v18 = vld [vmem:[#allocation2 + $0xa] sm:$0x3f]  ;;  %s3439_s6 = sld [smem:[#allocation8 + $0x2d]]  ;;  %s2620_s29 = smov 43  }
 0x55d   :  { %1143 = vrot.lane.b32.xlu1 %v1141_v60, %s2614_s24  ;;  %v1783_v11 = vpop.permute.xlu0 %1782  ;;  %v1778_v28 = vmul.f32 %v1777_v24, %v1775_v5  ;;  %v1780_v29 = vmul.f32 %v1779_v21, %v1776_v36  ;;  %v1827_v43 = vstv %s3340_s16  ;;  %v1189_v30 = vmul.f32 %v1187_v58, %v1182_v23  ;;  %s3441_s16 = sld [smem:[#allocation8 + $0x5e]] }
 0x55e   :  { %v1784_v9 = vrot.slane %v1783_v11, 6  ;;  %v1208_v35 = vadd.f32 %v1207_v39, %v1205_v53  ;;  %v3689_v15 = vstv %s3183_s4  ;;  %v3690_v2 = vstv %s3191_s0  ;;  %s3390_s4 = sld [smem:[#allocation8 + $0x3]]  ;;  %s3692_s0 = smov 31  }
 0x55f   :  { %1628 = vrot.lane.b32.xlu0 %v1626_v34, %s2615_s14  ;;  %v1244_v63 = vmul.f32 %v3689_v15, %v1241_v12  ;;  %v1246_v45 = vmul.f32 %v3690_v2, %v1242_v22  ;;  %v1229_v34 = vsel %vm1122_vm10, %v1228_v3, %v3107_v1  ;;  %vm1098_vm12 = vcmask 777216   ;;  %v1285_v3 = vld [vmem:[#allocation2] sm:$0x3f]  ;;  %v1286_v12 = vld [vmem:[#allocation2 + $0x8] sm:$0x3f]  ;;  %s3449_s24 = sld [smem:[#allocation8 + $0x22]] }
 0x560   :  { %v1250_v24 = vrot.slane %v3111_v19, 6  ;;  %v1721_v21 = vmul.f32 %v1719_v13, %v1714_v20  ;;  %v3691_v50 = vstv %s3195_s30  ;;  %v1268_v8 = vmul.f32 %v1267_v4, %v1264_v33  ;;  %s3398_s30 = sld [smem:[#allocation8 + $0x37]]  ;;  %s3697_s14 = smov 46  }
 0x561   :  { %1167 = vrot.lane.b32.xlu1 %v1165_v26, %s3688_s27  ;;  %v3372_v60 = vpop.permute.xlu0 %1806  ;;  %v1266_v38 = vmul.f32 %v3691_v50, %v1263_v14  ;;  %v1287_v26 = vstv %s3344_s25  ;;  %v1786_v23 = vsel %vm1785_vm8, %v1784_v9, %v1783_v11  ;;  %v1781_v46 = vadd.f32 %v1780_v29, %v1778_v28  ;;  %v1870_v9 = vld [vmem:[#allocation2 + $0x2] sm:$0x3f]  ;;  %s3446_s25 = sld [smem:[#allocation8 + $0xb]] }
 0x562   :  { %v1826_v53 = vmul.f32 %v1825_v25, %v1823_v10  ;;  %v1828_v17 = vmul.f32 %v1827_v43, %v1824_v18  ;;  %v1231_v5 = vmul.f32 %v1229_v34, %v1208_v35  ;;  %v1247_v36 = vadd.f32 %v1246_v45, %v1244_v63  ;;  %v1871_v25 = vld [vmem:[#allocation2 + $0xa] sm:$0x3f]  ;;  %v1331_v34 = vld [vmem:[#allocation2 + $0x2] sm:$0x3f]  ;;  %s3467_s27 = sld [smem:[#allocation8 + $0x19]] }
 0x563   :  { %1675 = vrot.lane.b32.xlu0 %v1673_v59, %s2616_s8  ;;  %v1289_v58 = vstv %s3350_s15  ;;  %v1872_v22 = vstv %s3357_s9  ;;  %v1251_v11 = vsel %vm1098_vm12, %v1250_v24, %v3111_v19  ;;  %v1272_v4 = vrot.slane %v3122_v48, 6  ;;  %s3696_s15 = smov 78   ;;  %s3454_s9 = sld [smem:[#allocation8 + $0x53]] }
 0x564   :  { %v1788_v59 = vmul.f32 %v1786_v23, %v1781_v46  ;;  %v1874_v13 = vstv %s3363_s18  ;;  %vm1074_vm11 = vcmask 908288   ;;  %v1269_v20 = vadd.f32 %v1268_v8, %v1266_v38  ;;  %s3460_s18 = sld [smem:[#allocation8 + $0x3c]] }
 0x565   :  { %1191 = vrot.lane.b32.xlu1 %v1189_v30, %s3692_s0  ;;  %v1831_v1 = vpop.permute.xlu0 %1830  ;;  %v1288_v28 = vmul.f32 %v1287_v26, %v1285_v3  ;;  %v1829_v19 = vadd.f32 %v1828_v17, %v1826_v53  ;;  %v1253_v29 = vmul.f32 %v1251_v11, %v1247_v36  ;;  %v1290_v43 = vmul.f32 %v1289_v58, %v1286_v12  ;;  %v1920_v53 = vld [vmem:[#allocation2] sm:$0x3f]  ;;  %v1921_v17 = vld [vmem:[#allocation2 + $0x8] sm:$0x3f]  ;;  %s3474_s8 = sld [smem:[#allocation8 + $0x27]] }
 0x566   :  { %v1832_v39 = vrot.slane %v1831_v1, 6  ;;  %v1873_v30 = vmul.f32 %v1872_v22, %v1870_v9  ;;  %v1875_v35 = vmul.f32 %v1874_v13, %v1871_v25  ;;  %v1273_v15 = vsel %vm1074_vm11, %v1272_v4, %v3122_v48  ;;  %v1332_v48 = vld [vmem:[#allocation2 + $0xa] sm:$0x3f]  ;;  %v1377_v12 = vld [vmem:[#allocation2] sm:$0x3f]  ;;  %s3477_s0 = sld [smem:[#allocation8 + $0x30]] }
 0x567   :  { %1723 = vrot.lane.b32.xlu0 %v1721_v21, %s2617_s28  ;;  %v1294_v63 = vrot.slane %v3131_v0, 6  ;;  %vm1880_vm8 = vcmask 277504   ;;  %v1333_v10 = vstv %s3380_s23  ;;  %v1335_v18 = vstv %s3385_s13  ;;  %v1378_v22 = vld [vmem:[#allocation2 + $0x8] sm:$0x3f]  ;;  %s3469_s23 = sld [smem:[#allocation8 + $0x4a]]  ;;  %s2621_s13 = smov 122  }
 0x568   :  { %v1833_v14 = vsel %vm181_vm4, %v1832_v39, %v1831_v1  ;;  %vm1050_vm4 = vcmask 1039360   ;;  %v1275_v21 = vmul.f32 %v1273_v15, %v1269_v20  ;;  %v1291_v50 = vadd.f32 %v1290_v43, %v1288_v28  ;;  %v1439_v43 = vld [vmem:[#allocation2 + $0x8] sm:$0x3f]  ;;  %s3699_s28 = smov 93  }
 0x569   :  { %1233 = vrot.lane.b32.xlu1 %v1231_v5, %s3693_s11  ;;  %v3408_v33 = vpop.permute.xlu0 %1853  ;;  %v1835_v2 = vmul.f32 %v1833_v14, %v1829_v19  ;;  %v1876_v38 = vadd.f32 %v1875_v35, %v1873_v30  ;;  %v1922_v8 = vstv %s3394_s10  ;;  %v1295_v26 = vsel %vm1050_vm4, %v1294_v63, %v3131_v0  ;;  %s3482_s10 = sld [smem:[#allocation8 + $0x61]] }
 0x56a   :  { %v1340_v23 = vrot.slane %v3153_v44, 6  ;;  %v1924_v46 = vstv %s3398_s30  ;;  %v1334_v39 = vmul.f32 %v1333_v10, %v1331_v34  ;;  %v1336_v5 = vmul.f32 %v1335_v18, %v1332_v48  ;;  %v1985_v34 = vld [vmem:[#allocation2] sm:$0x3f]  ;;  %v1986_v48 = vld [vmem:[#allocation2 + $0x8] sm:$0x3f]  ;;  %s3488_s30 = sld [smem:[#allocation8 + $0x58]] }
 0x56b   :  { %1790 = vrot.lane.b32.xlu0 %v1788_v59, %s2618_s26  ;;  %v1379_v0 = vstv %s3390_s4  ;;  %v1381_v3 = vstv %s3404_s7  ;;  %v1297_v11 = vmul.f32 %v1295_v26, %v1291_v50  ;;  %v1923_v4 = vmul.f32 %v1922_v8, %v1920_v53  ;;  %s3698_s4 = smov 125   ;;  %s2622_s7 = smov 90  }
 0x56c   :  { %v1925_v59 = vmul.f32 %v1924_v46, %v1921_v17  ;;  %v1341_v13 = vsel %vm1194_vm9, %v1340_v23, %v3153_v44  ;;  %v1403_v9 = vrot.slane %v3187_v32, 6  ;;  %v1337_v25 = vadd.f32 %v1336_v5, %v1334_v39  ;;  %s3498_s11 = sld [smem:[#allocation8 + $0x5]] }
 0x56d   :  { %1255 = vrot.lane.b32.xlu1 %v1253_v29, %s3694_s12  ;;  %v1878_v45 = vpop.permute.xlu0 %1877  ;;  %v1380_v14 = vmul.f32 %v1379_v0, %v1377_v12  ;;  %v1382_v20 = vmul.f32 %v1381_v3, %v1378_v22  ;;  %vm1947_vm14 = vcmask 678912   ;;  %v1440_v19 = vstv %s3410_s2  ;;  %v1438_v29 = vld [vmem:[#allocation2] sm:$0x3f]  ;;  %s3500_s2 = sld [smem:[#allocation8 + $0x36]]  ;;  %s3700_s12 = smov 29  }
 0x56e   :  { %v1879_v24 = vrot.slane %v1878_v45, 6  ;;  %v1442_v44 = vstv %s3412_s17  ;;  %v1343_v35 = vmul.f32 %v1341_v13, %v1337_v25  ;;  %vm888_vm7 = vcmask 916480   ;;  %s2623_s17 = smov 61   ;;  %s3511_s26 = sld [smem:[#allocation8 + $0x44]] }
 0x56f   :  { %1837 = vrot.lane.b32.xlu0 %v1835_v2, %s2619_s22  ;;  %v1926_v15 = vadd.f32 %v1925_v59, %v1923_v4  ;;  %v1987_v63 = vstv %s3420_s1  ;;  %v1989_v18 = vstv %s3425_s19  ;;  %v1443_v50 = vmul.f32 %v1442_v44, %v1439_v43  ;;  %v1524_v4 = vld [vmem:[#allocation2 + $0x2] sm:$0x3f]  ;;  %s2624_s1 = smov 58   ;;  %s3521_s19 = sld [smem:[#allocation8 + $0x21]] }
 0x570   :  { %v1881_v1 = vsel %vm1880_vm8, %v1879_v24, %v1878_v45  ;;  %vm936_vm8 = vcmask 654336   ;;  %v1447_v45 = vrot.slane %v3213_v37, 6  ;;  %v1383_v24 = vadd.f32 %v1382_v20, %v1380_v14  ;;  %v2033_v44 = vld [vmem:[#allocation2 + $0x2] sm:$0x3f]  ;;  %s3523_s22 = sld [smem:[#allocation8 + $0x52]] }
 0x571   :  { %v1883_v36 = vmul.f32 %v1881_v1, %v1876_v38  ;;  %1277 = vrot.lane.b32.xlu1 %v1275_v21, %s3695_s21  ;;  %v3435_v58 = vpop.permute.xlu0 %1901  ;;  %v1404_v2 = vsel %vm936_vm8, %v1403_v9, %v3187_v32  ;;  %v1441_v21 = vmul.f32 %v1440_v19, %v1438_v29  ;;  %v1480_v26 = vstv %s3417_s3  ;;  %v1478_v1 = vld [vmem:[#allocation2 + $0x2] sm:$0x3f]  ;;  %v1479_v32 = vld [vmem:[#allocation2 + $0xa] sm:$0x3f]  ;;  %s3504_s3 = sld [smem:[#allocation8 + $0x13]] }
 0x572   :  { %v1482_v23 = vstv %s3432_s20  ;;  %v1406_v46 = vmul.f32 %v1404_v2, %v1383_v24  ;;  %v1988_v53 = vmul.f32 %v1987_v63, %v1985_v34  ;;  %v1990_v17 = vmul.f32 %v1989_v18, %v1986_v48  ;;  %v2034_v29 = vld [vmem:[#allocation2 + $0xa] sm:$0x3f]  ;;  %s2625_s20 = smov 108   ;;  %s3530_s21 = sld [smem:[#allocation8 + $0x2f]] }
 0x573   :  { %1885 = vrot.lane.b32.xlu0 %v1883_v36, %s2620_s29  ;;  %v1448_v39 = vsel %vm888_vm7, %v1447_v45, %v3213_v37  ;;  %v1487_v5 = vrot.slane %v3193_v49, 6  ;;  %v1444_v36 = vadd.f32 %v1443_v50, %v1441_v21  ;;  %v1481_v0 = vmul.f32 %v1480_v26, %v1478_v1  ;;  %v1525_v37 = vld [vmem:[#allocation2 + $0xa] sm:$0x3f]  ;;  %s3540_s29 = sld [smem:[#allocation8 + $0xd]] }
 0x574   :  { %v1483_v3 = vmul.f32 %v1482_v23, %v1479_v32  ;;  %v1526_v22 = vstv %s3439_s6  ;;  %v1991_v9 = vadd.f32 %v1990_v17, %v1988_v53  ;;  %v2035_v25 = vstv %s3449_s24  ;;  %s3533_s6 = sld [smem:[#allocation8 + $0x60]]  ;;  %s2628_s24 = smov 44  }
 0x575   :  { %1299 = vrot.lane.b32.xlu1 %v1297_v11, %s3696_s15  ;;  %v1945_v28 = vpop.permute.xlu0 %1944  ;;  %v1528_v11 = vstv %s3441_s16  ;;  %v1450_v13 = vmul.f32 %v1448_v39, %v1444_v36  ;;  %v1533_v20 = vrot.slane %v3207_v41, 6  ;;  %v2037_v19 = vstv %s3454_s9  ;;  %s2626_s16 = smov 76   ;;  %s3542_s15 = sld [smem:[#allocation8 + $0x3e]] }
 0x576   :  { %v1946_v30 = vrot.slane %v1945_v28, 6  ;;  %v1484_v43 = vadd.f32 %v1483_v3, %v1481_v0  ;;  %v1591_v2 = vstv %s3446_s25  ;;  %v1593_v45 = vstv %s3460_s18  ;;  %s2627_s25 = smov 26   ;;  %s3548_s9 = sld [smem:[#allocation8 + $0x1b]] }
 0x577   :  { %v2036_v34 = vmul.f32 %v2035_v25, %v2033_v44  ;;  %v2038_v48 = vmul.f32 %v2037_v19, %v2034_v29  ;;  %v1534_v24 = vsel %vm984_vm15, %v1533_v20, %v3207_v41  ;;  %v1598_v21 = vrot.slane %v3231_v40, 6  ;;  %v1638_v41 = vld [vmem:[#allocation2 + $0xa] sm:$0x3f]  ;;  %v1684_v20 = vld [vmem:[#allocation2 + $0x2] sm:$0x3f]  ;;  %s3550_s18 = sld [smem:[#allocation8 + $0x4c]] }
 0x578   :  { %v1948_v10 = vsel %vm1947_vm14, %v1946_v30, %v1945_v28  ;;  %vm1488_vm14 = vcmask 130048   ;;  %v1527_v30 = vmul.f32 %v1526_v22, %v1524_v4  ;;  %v1639_v1 = vstv %s3467_s27  ;;  %v2081_v22 = vld [vmem:[#allocation2 + $0x2] sm:$0x3f]  ;;  %s3556_s27 = sld [smem:[#allocation8 + $0x29]] }
 0x579   :  { %v1950_v38 = vmul.f32 %v1948_v10, %v1926_v15  ;;  %1345 = vrot.lane.b32.xlu1 %v1343_v35, %s3697_s14  ;;  %v3463_v8 = vpop.permute.xlu0 %1968  ;;  %v1489_v14 = vsel %vm1488_vm14, %v1487_v5, %v3193_v49  ;;  %v1529_v35 = vmul.f32 %v1528_v11, %v1525_v37  ;;  %v1589_v10 = vld [vmem:[#allocation2] sm:$0x3f]  ;;  %v1590_v49 = vld [vmem:[#allocation2 + $0x8] sm:$0x3f]  ;;  %vm2043_vm14 = vcmask 154624   ;;  %s2629_s14 = smov 123  }
 0x57a   :  { %v1491_v18 = vmul.f32 %v1489_v14, %v1484_v43  ;;  %v1594_v26 = vmul.f32 %v1593_v45, %v1590_v49  ;;  %v1641_v32 = vstv %s3469_s23  ;;  %v2039_v39 = vadd.f32 %v2038_v48, %v2036_v34  ;;  %v2082_v11 = vld [vmem:[#allocation2 + $0xa] sm:$0x3f]  ;;  %v1734_v49 = vld [vmem:[#allocation2] sm:$0x3f]  ;;  %s3558_s23 = sld [smem:[#allocation8 + $0x5a]] }
 0x57b   :  { %1952 = vrot.lane.b32.xlu0 %v1950_v38, %s2621_s13  ;;  %v1530_v50 = vadd.f32 %v1529_v35, %v1527_v30  ;;  %v1592_v38 = vmul.f32 %v1591_v2, %v1589_v10  ;;  %v2083_v5 = vstv %s3477_s0  ;;  %v1646_v0 = vrot.slane %v3256_v31, 6  ;;  %s2630_s13 = smov 91   ;;  %s2633_s0 = smov 106  }
 0x57c   :  { %v1686_v25 = vstv %s3474_s8  ;;  %v1688_v14 = vstv %s3488_s30  ;;  %v2084_v19 = vmul.f32 %v2083_v5, %v2081_v22  ;;  %v1693_v43 = vrot.slane %v3296_v27, 6  ;;  %v1846_v22 = vld [vmem:[#allocation2 + $0x2] sm:$0x3f]  ;;  %s2631_s8 = smov 59   ;;  %s2635_s30 = smov 42  }
 0x57d   :  { %1408 = vrot.lane.b32.xlu1 %v1406_v46, %s3698_s4  ;;  %v1993_v12 = vpop.permute.xlu0 %1992  ;;  %v1637_v46 = vld [vmem:[#allocation2 + $0x2] sm:$0x3f]  ;;  %v1536_v17 = vmul.f32 %v1534_v24, %v1530_v50  ;;  %v1595_v4 = vadd.f32 %v1594_v26, %v1592_v38  ;;  %v1647_v29 = vsel %vm75_vm1, %v1646_v0, %v3256_v31  ;;  %v1687_v35 = vmul.f32 %v1686_v25, %v1684_v20  ;;  %s2632_s4 = smov 27  }
 0x57e   :  { %v1994_v59 = vrot.slane %v1993_v12, 6  ;;  %v1640_v37 = vmul.f32 %v1639_v1, %v1637_v46  ;;  %v1736_v45 = vstv %s3498_s11  ;;  %v1738_v10 = vstv %s3500_s2  ;;  %s3710_s11 = smov 51   ;;  %s2636_s2 = smov [#allocation9]  }
 0x57f   :  { %vm1761_vm1 = vcmask 670720   ;;  %v1737_v26 = vmul.f32 %v1736_v45, %v1734_v49  ;;  %v1803_v46 = vstv %s3511_s26  ;;  %v1898_v20 = vstv %s3533_s6  ;;  %v1962_v45 = vld [vmem:[#allocation2 + $0x8] sm:$0x3f] }
 0x580   :  { %v1996_v28 = vsel %vm1995_vm13, %v1994_v59, %v1993_v12  ;;  %vm1599_vm13 = vcmask 793600   ;;  %v2085_v12 = vstv %s3482_s10  ;;  %v1642_v59 = vmul.f32 %v1641_v32, %v1638_v41  ;;  %v1799_v41 = vld [vmem:[#allocation2] sm:$0x3f]  ;;  %s2634_s10 = smov 74  }
 0x581   :  { %v1998_v15 = vmul.f32 %v1996_v28, %v1991_v9  ;;  %1452 = vrot.lane.b32.xlu1 %v1450_v13, %s3699_s28  ;;  %v3491_v63 = vpop.permute.xlu0 %2016  ;;  %v1600_v36 = vsel %vm1599_vm13, %v1598_v21, %v3231_v40  ;;  %v1685_v40 = vld [vmem:[#allocation2 + $0xa] sm:$0x3f]  ;;  %v2086_v44 = vmul.f32 %v2085_v12, %v2082_v11  ;;  %vm1694_vm13 = vcmask 269312   ;;  %s834_s28 = sld [smem:[#allocation8]] }
 0x582   :  { %v1602_v28 = vmul.f32 %v1600_v36, %v1595_v4  ;;  %v1643_v30 = vadd.f32 %v1642_v59, %v1640_v37  ;;  %v1695_v24 = vsel %vm1694_vm13, %v1693_v43, %v3296_v27  ;;  %v1760_v21 = vrot.slane %v3334_v47, 6  ;;  %v1800_v27 = vld [vmem:[#allocation2 + $0x8] sm:$0x3f] }
 0x583   :  { %2000 = vrot.lane.b32.xlu0 %v1998_v15, %s2622_s7  ;;  %v1689_v15 = vmul.f32 %v1688_v14, %v1685_v40  ;;  %v2087_v48 = vadd.f32 %v2086_v44, %v2084_v19  ;;  %v1801_v32 = vstv %s3504_s3  ;;  %vm1809_vm13 = vcmask 932864   ;;  %v1847_v11 = vld [vmem:[#allocation2 + $0xa] sm:$0x3f]  ;;  %v1894_v40 = vld [vmem:[#allocation2 + $0x2] sm:$0x3f]  ;;  %s2213_s7 = sld [smem:[#allocation8 + $0x31]] }
 0x584   :  { %v1649_v34 = vmul.f32 %v1647_v29, %v1643_v30  ;;  %v1802_v36 = vmul.f32 %v1801_v32, %v1799_v41  ;;  %v1804_v0 = vmul.f32 %v1803_v46, %v1800_v27  ;;  %v1850_v12 = vstv %s3523_s22 }
 0x585   :  { %1493 = vrot.lane.b32.xlu1 %v1491_v18, %s2623_s17  ;;  %v2041_v23 = vpop.permute.xlu0 %2040  ;;  %v1735_v18 = vld [vmem:[#allocation2 + $0x8] sm:$0x3f]  ;;  %v1690_v38 = vadd.f32 %v1689_v15, %v1687_v35  ;;  %v1855_v37 = vrot.slane %v3408_v33, 6  ;;  %v1851_v25 = vmul.f32 %v1850_v12, %v1847_v11  ;;  %v1896_v14 = vstv %s3530_s21  ;;  %s2178_s17 = sshll.u32 %s2636_s2, 4  ;;  %s2179_s17 = int_to_ptr.vmem [resolvable:$true] %s2178_s17 }
 0x586   :  { %v2042_v53 = vrot.slane %v2041_v23, 6  ;;  %v1805_v59 = vadd.f32 %v1804_v0, %v1802_v36  ;;  %v1903_v44 = vrot.slane %v3435_v58, 6  ;;  %v1897_v43 = vmul.f32 %v1896_v14, %v1894_v40  ;;  %s2529_s3 = scalar_lea.vmem %s2179_s17, 2048  ;;  %p2534_p11 = scmp.lt.s32.totalorder %s2179_s17, %s2179_s17 }
 0x587   :  { %v1963_v35 = vstv %s3540_s29  ;;  %v1965_v15 = vstv %s3542_s15  ;;  %v1970_v49 = vrot.slane %v3463_v8, 6  ;;  %v2059_v41 = vstv %s3556_s27  ;;  %p2530_p10 = scmp.ne.s32.totalorder %s2179_s17, %s2529_s3  ;;  %p2535_p12 = scmp.lt.s32.totalorder %s2529_s3, %s2529_s3 }
 0x588   :  { %v2044_v3 = vsel %vm2043_vm14, %v2042_v53, %v2041_v23  ;;  %vm2091_vm14 = vcmask 416768   ;;  %v1739_v23 = vmul.f32 %v1738_v10, %v1735_v18  ;;  %v1697_v53 = vmul.f32 %v1695_v24, %v1690_v38  ;;  %v2010_v38 = vld [vmem:[#allocation2 + $0xa] sm:$0x3f] }
 0x589   :  { %v2046_v13 = vmul.f32 %v2044_v3, %v2039_v39  ;;  %1538 = vrot.lane.b32.xlu1 %v1536_v17, %s3700_s12  ;;  %v3514_v9 = vpop.permute.xlu0 %2064  ;;  %v1762_v17 = vsel %vm1761_vm1, %v1760_v21, %v3334_v47  ;;  %v1808_v39 = vrot.slane %v3372_v60, 6  ;;  %v1848_v3 = vstv %s3521_s19  ;;  %p2536_p13 = por %p2535_p12, %p2534_p11 }
 0x58a   :  { %v1740_v5 = vadd.f32 %v1739_v23, %v1737_v26  ;;  %vm1856_vm1 = vcmask 146432   ;;  %v2011_v24 = vstv %s3548_s9  ;;  %v2013_v21 = vstv %s3550_s18 }
 0x58b   :  { %2048 = vrot.lane.b32.xlu0 %v2046_v13, %s2624_s1  ;;  %v1810_v47 = vsel %vm1809_vm13, %v1808_v39, %v3372_v60  ;;  %v1849_v13 = vmul.f32 %v1848_v3, %v1846_v22  ;;  %v1857_v60 = vsel %vm1856_vm1, %v1855_v37, %v3408_v33  ;;  %vm1904_vm13 = vcmask 408576   ;;  %p2537_p0 = pnand %p2536_p13, %p2530_p10 }
 0x58c   :  { %v1764_v4 = vmul.f32 %v1762_v17, %v1740_v5  ;;  %v1812_v19 = vmul.f32 %v1810_v47, %v1805_v59  ;;  %v1905_v33 = vsel %vm1904_vm13, %v1903_v44, %v3435_v58  ;;  %vm1971_vm1 = vcmask 809984   ;;  %v2058_v17 = vld [vmem:[#allocation2 + $0xa] sm:$0x3f] }
 0x58d   :  { %1604 = vrot.lane.b32.xlu1 %v1602_v28, %s2625_s20  ;;  %v2089_v2 = vpop.permute.xlu0 %2088  ;;  %v1895_v28 = vld [vmem:[#allocation2 + $0xa] sm:$0x3f]  ;;  %v1852_v29 = vadd.f32 %v1851_v25, %v1849_v13  ;;  %v1972_v23 = vsel %vm1971_vm1, %v1970_v49, %v3463_v8  ;;  %v2018_v58 = vrot.slane %v3491_v63, 6  ;;  %vm2019_vm13 = vcmask 23552  }
 0x58e   :  { %v2090_v31 = vrot.slane %v2089_v2, 6  ;;  %v1899_v30 = vmul.f32 %v1898_v20, %v1895_v28  ;;  %v2014_v46 = vmul.f32 %v2013_v21, %v2010_v38  ;;  %v2061_v27 = vstv %s3558_s23  ;;  %v836_v28 = vld [vmem:[#allocation2] sm:$0x3f] }
 0x58f   :  { %v1859_v10 = vmul.f32 %v1857_v60, %v1852_v29  ;;  %v2020_v36 = vsel %vm2019_vm13, %v2018_v58, %v3491_v63  ;;  %v2066_v0 = vrot.slane %v3514_v9, 6  ;;  %vm2067_vm1 = vcmask 285696  }
 0x590   :  { %v2092_v50 = vsel %vm2091_vm14, %v2090_v31, %v2089_v2  ;;  %v1961_v2 = vld [vmem:[#allocation2] sm:$0x3f]  ;;  %v1900_v18 = vadd.f32 %v1899_v30, %v1897_v43  ;;  %v2062_v12 = vmul.f32 %v2061_v27, %v2058_v17  ;;  %v838_v20 = vstv %s834_s28 }
 0x591   :  { %v2094_v1 = vmul.f32 %v2092_v50, %v2087_v48  ;;  %1651 = vrot.lane.b32.xlu1 %v1649_v34, %s2626_s16  ;;  %v1964_v31 = vmul.f32 %v1963_v35, %v1961_v2  ;;  %v1966_v34 = vmul.f32 %v1965_v15, %v1962_v45  ;;  %v861_v48 = vpop.permute.xlu1 %860  ;;  %v2009_v50 = vld [vmem:[#allocation2 + $0x2] sm:$0x3f]  ;;  %v840_v40 = vstv %s2213_s7 }
 0x592   :  { %v1907_v26 = vmul.f32 %v1905_v33, %v1900_v18  ;;  %v2012_v32 = vmul.f32 %v2011_v24, %v2009_v50  ;;  %v862_v60 = vrot.slane %v861_v48, 6  ;;  %vm863_vm13 = vcmask 629760  }
 0x593   :  { %2096 = vrot.lane.b32.xlu0 %v2094_v1, %s2627_s25  ;;  %v1967_v1 = vadd.f32 %v1966_v34, %v1964_v31 }
 0x594   :  { %v2015_v3 = vadd.f32 %v2014_v46, %v2012_v32  ;;  %v864_v30 = vsel %vm863_vm13, %v862_v60, %v861_v48 }
 0x595   :  { %1699 = vrot.lane.b32.xlu1 %v1697_v53, %s2628_s24  ;;  %v2057_v53 = vld [vmem:[#allocation2 + $0x2] sm:$0x3f]  ;;  %v1974_v5 = vmul.f32 %v1972_v23, %v1967_v1 }
 0x596   :  { %v2060_v8 = vmul.f32 %v2059_v41, %v2057_v53  ;;  %v2022_v11 = vmul.f32 %v2020_v36, %v2015_v3 }
 0x598   :  { %v2063_v47 = vadd.f32 %v2062_v12, %v2060_v8 }
 0x599   :  { %1766 = vrot.lane.b32.xlu1 %v1764_v4, %s2629_s14  ;;  %v2068_v4 = vsel %vm2067_vm1, %v2066_v0, %v3514_v9  ;;  %v839_v9 = vmul.f32 %v838_v20, %v836_v28  ;;  %vm960_vm1 = vcmask 523264  }
 0x59a   :  { %v2070_v59 = vmul.f32 %v2068_v4, %v2063_v47 }
 0x59d   :  { %1814 = vrot.lane.b32.xlu1 %v1812_v19, %s2630_s13  ;;  %v837_v19 = vld [vmem:[#allocation2 + $0x8] sm:$0x3f] }
 0x59e   :  { %v841_v29 = vmul.f32 %v840_v40, %v837_v19 }
 0x5a0   :  { %v842_v2 = vadd.f32 %v841_v29, %v839_v9 }
 0x5a1   :  { %1861 = vrot.lane.b32.xlu1 %v1859_v10, %s2631_s8 }
 0x5a2   :  { %v866_v33 = vmul.f32 %v864_v30, %v842_v2 }
 0x5a5   :  { %1909 = vrot.lane.b32.xlu1 %v1907_v26, %s2632_s4 }
 0x5a7   :  { %v886_v39 = vpop.permute.xlu1 %885 }
 0x5a8   :  { %v887_v43 = vrot.slane %v886_v39, 2 }
 0x5a9   :  { %1976 = vrot.lane.b32.xlu1 %v1974_v5, %s2633_s0 }
 0x5aa   :  { %v889_v45 = vsel %vm888_vm7, %v886_v39, %v887_v43  ;;  %vm1146_vm7 = vcmask 515072  }
 0x5ab   :  { %v910_v22 = vpop.permute.xlu1 %909  ;;  %v891_v31 = vadd.f32 %v889_v45, %v866_v33 }
 0x5ac   :  { %v911_v35 = vrot.slane %v910_v22, 2 }
 0x5ad   :  { %2024 = vrot.lane.b32.xlu1 %v2022_v11, %s2634_s10 }
 0x5ae   :  { %v913_v49 = vsel %vm912_vm5, %v910_v22, %v911_v35  ;;  %vm3705_vm5 = vcmask 1022976  }
 0x5af   :  { %v934_v37 = vpop.permute.xlu1 %933  ;;  %v915_v50 = vadd.f32 %v913_v49, %v891_v31 }
 0x5b0   :  { %v935_v10 = vrot.slane %v934_v37, 2 }
 0x5b1   :  { %2072 = vrot.lane.b32.xlu1 %v2070_v59, %s2635_s30 }
 0x5b2   :  { %v937_v24 = vsel %vm936_vm8, %v934_v37, %v935_v10  ;;  %vm3709_vm8 = vcmask 236544  }
 0x5b3   :  { %v958_v63 = vpop.permute.xlu1 %957  ;;  %v939_v48 = vadd.f32 %v937_v24, %v915_v50 }
 0x5b4   :  { %v959_v18 = vrot.slane %v958_v63, 6 }
 0x5b5   :  { %v1323_v3 = vpop.permute.xlu0 %1322 }
 0x5b6   :  { %v961_v38 = vsel %vm960_vm1, %v959_v18, %v958_v63  ;;  %v1324_v31 = vrot.slane %v1323_v3, 6  ;;  %vm1607_vm1 = vcmask 883712  }
 0x5b7   :  { %v982_v13 = vpop.permute.xlu1 %981  ;;  %v963_v32 = vadd.f32 %v961_v38, %v939_v48 }
 0x5b8   :  { %v983_v21 = vrot.slane %v982_v13, 6 }
 0x5ba   :  { %v985_v58 = vsel %vm984_vm15, %v983_v21, %v982_v13  ;;  %vm1325_vm15 = vcmask 506880  }
 0x5bb   :  { %v1006_v25 = vpop.permute.xlu1 %1005  ;;  %v987_v27 = vadd.f32 %v985_v58, %v963_v32  ;;  %v1326_v48 = vsel %vm1325_vm15, %v1324_v31, %v1323_v3  ;;  %vm1702_vm15 = vcmask 359424  }
 0x5bc   :  { %v1007_v26 = vrot.slane %v1006_v25, 6 }
 0x5be   :  { %v1008_v46 = vsel %vm102_vm3, %v1007_v26, %v1006_v25  ;;  %vm3701_vm3 = vcmask 769024  }
 0x5bf   :  { %v1048_v14 = vpop.permute.xlu1 %1047  ;;  %v1010_v5 = vadd.f32 %v1008_v46, %v987_v27 }
 0x5c0   :  { %v1049_v1 = vrot.slane %v1048_v14, 2 }
 0x5c2   :  { %v1051_v17 = vsel %vm1050_vm4, %v1048_v14, %v1049_v1  ;;  %v1368_v14 = vpop.permute.xlu0 %1367  ;;  %vm1583_vm4 = vcmask 1014784  }
 0x5c3   :  { %v1072_v44 = vpop.permute.xlu1 %1071  ;;  %v1053_v8 = vadd.f32 %v1051_v17, %v1010_v5 }
 0x5c4   :  { %v1073_v41 = vrot.slane %v1072_v44, 2 }
 0x5c6   :  { %v1075_v36 = vsel %vm1074_vm11, %v1072_v44, %v1073_v41  ;;  %v1431_v30 = vpop.permute.xlu0 %1430  ;;  %vm3708_vm11 = vcmask 367616  }
 0x5c7   :  { %v1096_v15 = vpop.permute.xlu1 %1095  ;;  %v1077_v4 = vadd.f32 %v1075_v36, %v1053_v8  ;;  %v1432_v17 = vrot.slane %v1431_v30, 2 }
 0x5c8   :  { %v1097_v39 = vrot.slane %v1096_v15, 2 }
 0x5ca   :  { %v1099_v22 = vsel %vm1098_vm12, %v1096_v15, %v1097_v39  ;;  %v1471_v24 = vpop.permute.xlu0 %1470  ;;  %vm1496_vm12 = vcmask 498688  }
 0x5cb   :  { %v1120_v34 = vpop.permute.xlu1 %1119  ;;  %v1101_v59 = vadd.f32 %v1099_v22, %v1077_v4  ;;  %v1472_v3 = vrot.slane %v1471_v24, 6 }
 0x5cc   :  { %v1121_v0 = vrot.slane %v1120_v34, 2 }
 0x5ce   :  { %v1123_v47 = vsel %vm1122_vm10, %v1120_v34, %v1121_v0  ;;  %v1517_v46 = vpop.permute.xlu0 %1516  ;;  %vm3707_vm10 = vcmask 760832  }
 0x5cf   :  { %v1144_v23 = vpop.permute.xlu1 %1143  ;;  %v1125_v20 = vadd.f32 %v1123_v47, %v1101_v59 }
 0x5d0   :  { %v1145_v11 = vrot.slane %v1144_v23, 6 }
 0x5d2   :  { %v1147_v13 = vsel %vm1146_vm7, %v1145_v11, %v1144_v23  ;;  %v1369_v23 = vrot.slane %v1368_v14, 6  ;;  %v1581_v11 = vpop.permute.xlu0 %1580  ;;  %vm1654_vm7 = vcmask 621568  }
 0x5d3   :  { %v1168_v53 = vpop.permute.xlu1 %1167  ;;  %v1149_v19 = vadd.f32 %v1147_v13, %v1125_v20  ;;  %v1518_v13 = vrot.slane %v1517_v46, 6 }
 0x5d4   :  { %v1169_v37 = vrot.slane %v1168_v53, 6 }
 0x5d6   :  { %v1171_v40 = vsel %vm1170_vm0, %v1169_v37, %v1168_v53  ;;  %vm3703_vm0 = vcmask 375808  }
 0x5d7   :  { %v1192_v12 = vpop.permute.xlu1 %1191  ;;  %v1173_v29 = vadd.f32 %v1171_v40, %v1149_v19  ;;  %v1629_v40 = vpop.permute.xlu0 %1628 }
 0x5d8   :  { %v1193_v25 = vrot.slane %v1192_v12, 6 }
 0x5da   :  { %v1195_v44 = vsel %vm1194_vm9, %v1193_v25, %v1192_v12  ;;  %vm3702_vm9 = vcmask 637952  }
 0x5db   :  { %v1234_v63 = vpop.permute.xlu1 %1233  ;;  %v1197_v35 = vadd.f32 %v1195_v44, %v1173_v29  ;;  %v1582_v44 = vrot.slane %v1581_v11, 2 }
 0x5dc   :  { %v1235_v28 = vrot.slane %v1234_v63, 2 }
 0x5de   :  { %v1236_v43 = vsel %vm1114_vm6, %v1234_v63, %v1235_v28  ;;  %vm3706_vm6 = vcmask 891904   ;;  %v1473_v63 = vsel %vm863_vm13, %v1472_v3, %v1471_v24  ;;  %vm1631_vm13 = vcmask 752640  }
 0x5df   :  { %v1256_v60 = vpop.permute.xlu1 %1255  ;;  %v1238_v10 = vadd.f32 %v1236_v43, %v1197_v35  ;;  %v1433_v12 = vsel %vm3706_vm6, %v1431_v30, %v1432_v17  ;;  %vm1840_vm6 = vcmask 613376  }
 0x5e0   :  { %v1257_v9 = vrot.slane %v1256_v60, 2 }
 0x5e2   :  { %v1258_v2 = vsel %vm1090_vm2, %v1256_v60, %v1257_v9  ;;  %vm3704_vm2 = vcmask 244736   ;;  %v1519_v60 = vsel %vm3708_vm11, %v1518_v13, %v1517_v46  ;;  %vm1912_vm11 = vcmask 220160  }
 0x5e3   :  { %v1278_v15 = vpop.permute.xlu1 %1277  ;;  %v1260_v49 = vadd.f32 %v1258_v2, %v1238_v10  ;;  %v1370_v53 = vsel %vm3704_vm2, %v1369_v23, %v1368_v14  ;;  %v1630_v2 = vrot.slane %v1629_v40, 2  ;;  %v1676_v10 = vpop.permute.xlu0 %1675  ;;  %vm1793_vm2 = vcmask 875520  }
 0x5e4   :  { %v1279_v45 = vrot.slane %v1278_v15, 2  ;;  %v1677_v24 = vrot.slane %v1676_v10, 6 }
 0x5e6   :  { %v1280_v33 = vsel %vm3701_vm3, %v1278_v15, %v1279_v45  ;;  %v1584_v15 = vsel %vm1583_vm4, %v1581_v11, %v1582_v44  ;;  %vm1678_vm3 = vcmask 490496   ;;  %vm1955_vm4 = vcmask 998400  }
 0x5e7   :  { %v1300_v18 = vpop.permute.xlu1 %1299  ;;  %v1282_v21 = vadd.f32 %v1280_v33, %v1260_v49 }
 0x5e8   :  { %v1301_v34 = vrot.slane %v1300_v18, 2 }
 0x5ea   :  { %v1302_v50 = vsel %vm3702_vm9, %v1300_v18, %v1301_v34  ;;  %v1632_v34 = vsel %vm1631_vm13, %v1629_v40, %v1630_v2  ;;  %vm1726_vm9 = vcmask 228352   ;;  %vm2027_vm13 = vcmask 605184  }
 0x5eb   :  { %v1304_v38 = vadd.f32 %v1302_v50, %v1282_v21  ;;  %v1346_v26 = vpop.permute.xlu1 %1345  ;;  %v1724_v50 = vpop.permute.xlu0 %1723 }
 0x5ec   :  { %v1347_v58 = vrot.slane %v1346_v26, 6 }
 0x5ed   :  { %v1328_v1 = vadd.f32 %v1326_v48, %v1304_v38 }
 0x5ee   :  { %v1348_v32 = vsel %vm3703_vm0, %v1347_v58, %v1346_v26  ;;  %v1679_v58 = vsel %vm1678_vm3, %v1677_v24, %v1676_v10  ;;  %vm1769_vm0 = vcmask 1006592   ;;  %vm2075_vm3 = vcmask 343040  }
 0x5ef   :  { %v1350_v41 = vadd.f32 %v1348_v32, %v1328_v1  ;;  %v1409_v27 = vpop.permute.xlu1 %1408  ;;  %v1725_v1 = vrot.slane %v1724_v50, 6  ;;  %v1791_v46 = vpop.permute.xlu0 %1790 }
 0x5f0   :  { %v1410_v39 = vrot.slane %v1409_v27, 2 }
 0x5f1   :  { %v1372_v5 = vadd.f32 %v1370_v53, %v1350_v41 }
 0x5f2   :  { %v1411_v36 = vsel %vm3705_vm5, %v1409_v27, %v1410_v39  ;;  %v1727_v39 = vsel %vm1726_vm9, %v1725_v1, %v1724_v50  ;;  %vm1817_vm5 = vcmask 744448  }
 0x5f3   :  { %v1413_v0 = vadd.f32 %v1411_v36, %v1372_v5  ;;  %v1453_v8 = vpop.permute.xlu1 %1452  ;;  %v1792_v5 = vrot.slane %v1791_v46, 2 }
 0x5f4   :  { %v1454_v22 = vrot.slane %v1453_v8, 2 }
 0x5f5   :  { %v1435_v4 = vadd.f32 %v1433_v12, %v1413_v0  ;;  %v1838_v0 = vpop.permute.xlu0 %1837  ;;  %v1794_v11 = vsel %vm1793_vm2, %v1791_v46, %v1792_v5 }
 0x5f6   :  { %v1455_v47 = vsel %vm3707_vm10, %v1453_v8, %v1454_v22  ;;  %vm1864_vm10 = vcmask 482304  }
 0x5f7   :  { %v1457_v37 = vadd.f32 %v1455_v47, %v1435_v4  ;;  %v1494_v59 = vpop.permute.xlu1 %1493  ;;  %v1839_v4 = vrot.slane %v1838_v0, 6 }
 0x5f8   :  { %v1495_v25 = vrot.slane %v1494_v59, 6 }
 0x5f9   :  { %v1475_v14 = vadd.f32 %v1473_v63, %v1457_v37  ;;  %v1886_v37 = vpop.permute.xlu0 %1885 }
 0x5fa   :  { %v1497_v20 = vsel %vm1496_vm12, %v1495_v25, %v1494_v59  ;;  %vm1888_vm12 = vcmask 351232  }
 0x5fb   :  { %v1499_v28 = vadd.f32 %v1497_v20, %v1475_v14  ;;  %v1539_v19 = vpop.permute.xlu1 %1538  ;;  %v1841_v14 = vsel %vm1840_vm6, %v1839_v4, %v1838_v0  ;;  %v1887_v20 = vrot.slane %v1886_v37, 6 }
 0x5fc   :  { %v1540_v9 = vrot.slane %v1539_v19, 6 }
 0x5fd   :  { %v1521_v29 = vadd.f32 %v1519_v60, %v1499_v28  ;;  %v1953_v28 = vpop.permute.xlu0 %1952 }
 0x5fe   :  { %v1541_v43 = vsel %vm3709_vm8, %v1540_v9, %v1539_v19  ;;  %vm1979_vm8 = vcmask 867328  }
 0x5ff   :  { %v1543_v30 = vadd.f32 %v1541_v43, %v1521_v29  ;;  %v1605_v35 = vpop.permute.xlu1 %1604  ;;  %v1889_v29 = vsel %vm1888_vm12, %v1887_v20, %v1886_v37  ;;  %v1954_v43 = vrot.slane %v1953_v28, 2 }
 0x600   :  { %v1606_v45 = vrot.slane %v1605_v35, 2 }
 0x601   :  { %v1586_v33 = vadd.f32 %v1584_v15, %v1543_v30 }
 0x602   :  { %v1608_v49 = vsel %vm1607_vm1, %v1605_v35, %v1606_v45  ;;  %v2001_v35 = vpop.permute.xlu0 %2000  ;;  %vm2003_vm1 = vcmask 736256  }
 0x603   :  { %v1610_v18 = vadd.f32 %v1608_v49, %v1586_v33  ;;  %v1652_v31 = vpop.permute.xlu1 %1651  ;;  %v1956_v33 = vsel %vm1955_vm4, %v1953_v28, %v1954_v43  ;;  %v2002_v49 = vrot.slane %v2001_v35, 2  ;;  %v3715_v43 = vld [vmem:[#allocation17_spill] sm:$0xff] }
 0x604   :  { %v1653_v21 = vrot.slane %v1652_v31, 6 }
 0x605   :  { %v1634_v38 = vadd.f32 %v1632_v34, %v1610_v18 }
 0x606   :  { %v1655_v26 = vsel %vm1654_vm7, %v1653_v21, %v1652_v31  ;;  %v2049_v31 = vpop.permute.xlu0 %2048  ;;  %vm2051_vm7 = vcmask 474112  }
 0x607   :  { %v1657_v48 = vadd.f32 %v1655_v26, %v1634_v38  ;;  %v1700_v23 = vpop.permute.xlu1 %1699  ;;  %v2004_v38 = vsel %vm2003_vm1, %v2001_v35, %v2002_v49  ;;  %v2050_v26 = vrot.slane %v2049_v31, 6  ;;  %v3716_v35 = vld [vmem:[#allocation18_spill] sm:$0xff] }
 0x608   :  { %v1701_v32 = vrot.slane %v1700_v23, 6 }
 0x609   :  { %v1681_v41 = vadd.f32 %v1679_v58, %v1657_v48 }
 0x60a   :  { %v1703_v27 = vsel %vm1702_vm15, %v1701_v32, %v1700_v23  ;;  %v2097_v23 = vpop.permute.xlu0 %2096  ;;  %vm2099_vm15 = vcmask 211968  }
 0x60b   :  { %v1705_v53 = vadd.f32 %v1703_v27, %v1681_v41  ;;  %v1767_v17 = vpop.permute.xlu1 %1766  ;;  %v2052_v41 = vsel %vm2051_vm7, %v2050_v26, %v2049_v31  ;;  %v2098_v27 = vrot.slane %v2097_v23, 6 }
 0x60c   :  { %v1768_v36 = vrot.slane %v1767_v17, 2 }
 0x60d   :  { %v1729_v8 = vadd.f32 %v1727_v39, %v1705_v53 }
 0x60e   :  { %v1770_v12 = vsel %vm1769_vm0, %v1767_v17, %v1768_v36  ;;  %v2100_v36 = vsel %vm2099_vm15, %v2098_v27, %v2097_v23 }
 0x60f   :  { %v1772_v3 = vadd.f32 %v1770_v12, %v1729_v8  ;;  %v1815_v22 = vpop.permute.xlu1 %1814 }
 0x610   :  { %v1816_v47 = vrot.slane %v1815_v22, 2 }
 0x611   :  { %v1796_v59 = vadd.f32 %v1794_v11, %v1772_v3 }
 0x612   :  { %v1818_v63 = vsel %vm1817_vm5, %v1815_v22, %v1816_v47 }
 0x613   :  { %v1820_v13 = vadd.f32 %v1818_v63, %v1796_v59  ;;  %v1862_v25 = vpop.permute.xlu1 %1861 }
 0x614   :  { %v1863_v40 = vrot.slane %v1862_v25, 6 }
 0x615   :  { %v1843_v19 = vadd.f32 %v1841_v14, %v1820_v13 }
 0x616   :  { %v1865_v60 = vsel %vm1864_vm10, %v1863_v40, %v1862_v25 }
 0x617   :  { %v1867_v44 = vadd.f32 %v1865_v60, %v1843_v19  ;;  %v1910_v9 = vpop.permute.xlu1 %1909 }
 0x618   :  { %v1911_v30 = vrot.slane %v1910_v9, 6 }
 0x619   :  { %v1891_v15 = vadd.f32 %v1889_v29, %v1867_v44 }
 0x61a   :  { %v1913_v2 = vsel %vm1912_vm11, %v1911_v30, %v1910_v9 }
 0x61b   :  { %v1915_v45 = vadd.f32 %v1913_v2, %v1891_v15  ;;  %v1977_v10 = vpop.permute.xlu1 %1976 }
 0x61c   :  { %v1978_v18 = vrot.slane %v1977_v10, 2 }
 0x61d   :  { %v1958_v34 = vadd.f32 %v1956_v33, %v1915_v45 }
 0x61e   :  { %v1980_v24 = vsel %vm1979_vm8, %v1977_v10, %v1978_v18 }
 0x61f   :  { %v1982_v21 = vadd.f32 %v1980_v24, %v1958_v34  ;;  %v2025_v50 = vpop.permute.xlu1 %2024 }
 0x620   :  { %v2026_v48 = vrot.slane %v2025_v50, 6 }
 0x621   :  { %v2006_v58 = vadd.f32 %v2004_v38, %v1982_v21 }
 0x622   :  { %v2028_v1 = vsel %vm2027_vm13, %v2026_v48, %v2025_v50 }
 0x623   :  { %v2030_v32 = vadd.f32 %v2028_v1, %v2006_v58  ;;  %v2073_v46 = vpop.permute.xlu1 %2072 }
 0x624   :  { %v2074_v53 = vrot.slane %v2073_v46, 6 }
 0x625   :  { %v2054_v17 = vadd.f32 %v2052_v41, %v2030_v32 }
 0x626   :  { %v2076_v39 = vsel %vm2075_vm3, %v2074_v53, %v2073_v46 }
 0x627   :  { %v2078_v5 = vadd.f32 %v2076_v39, %v2054_v17 }
 0x629   :  { %v2102_v0 = vadd.f32 %v2100_v36, %v2078_v5 }
 0x62b   :  { %v2316_v8 = vmul.f32 -1.442695, %v2102_v0 }
 0x62d   :  { %2493 = vpow2.f32 %v2316_v8 }
 0x63a   :  { %v2494_v12 = vpop.eup %2493 }
 0x63b   :  { %v2106_v3 = vadd.f32 1.0, %v2494_v12 }
 0x63d   :  { %2495 = vrcp.f32 %v2106_v3 }
 0x64a   :  { %v2496_v22 = vpop.eup %2495 }
 0x64b   :  { %2110 = vrot.lane.b32.xlu1 %v2496_v22, %s3710_s11 }
 0x6bd   :  { %v2111_v11 = vpop.permute.xlu1 %2110 }
 0x6be   :  { %v2112_v4 = vrot.slane %v2111_v11, 2 }
 0x6c0   :  { %v2113_v47 = vsel %vm2091_vm14, %v2111_v11, %v2112_v4 }
 0x6c1   :  { %2115 = vst [vmem:[#allocation2 + $0x2] sm:$0xf] %v2113_v47 }
 0x6c8   :  { %v2116_v37 = vld [vmem:[#allocation2 + $0x2] ss:$2 sm:$0x3]  ;;  %v2144_v59 = vld [vmem:[#allocation2 + $0x3] ss:$2 sm:$0x3] }
 0x6c9   :  { %v2121_v63 = vrot.slane %v2116_v37, %v2836_v16  ;;  %v2125_v13 = vrot.slane %v2116_v37, %v2839_v42  ;;  %v2149_v25 = vrot.slane %v2144_v59, %v2836_v16  ;;  %v2153_v14 = vrot.slane %v2144_v59, %v2839_v42 }
 0x6cb   :  { %v2128_v20 = vmul.f32 %v2121_v63, %v2939_v54  ;;  %v2129_v40 = vmul.f32 %v2125_v13, %v2942_v55  ;;  %v2130_v28 = vmul.f32 %v2121_v63, %v2933_v51  ;;  %v2131_v19 = vmul.f32 %v2125_v13, %v2936_v52  ;;  %v3711_v54 = vld [vmem:[#allocation13_spill] sm:$0xff]  ;;  %v3712_v55 = vld [vmem:[#allocation14_spill] sm:$0xff] }
 0x6cc   :  { %v2132_v60 = vmul.f32 %v2121_v63, %v2952_v6  ;;  %v2133_v44 = vmul.f32 %v2125_v13, %v2955_v7  ;;  %v2134_v9 = vmul.f32 %v2121_v63, %v2978_v61  ;;  %v2135_v16 = vmul.f32 %v2125_v13, %v2981_v62  ;;  %v3713_v6 = vld [vmem:[#allocation15_spill] sm:$0xff]  ;;  %v3714_v61 = vld [vmem:[#allocation16_spill] sm:$0xff] }
 0x6cd   :  { %2136 = vst [vmem:[#allocation9] sm:$0xff] %v2128_v20  ;;  %2137 = vst [vmem:[#allocation9 + $0x8] sm:$0xff] %v2129_v40  ;;  %v2156_v42 = vmul.f32 %v2149_v25, %v2945_v56  ;;  %v2157_v51 = vmul.f32 %v2153_v14, %v2948_v57  ;;  %v2158_v52 = vmul.f32 %v2149_v25, %v3711_v54 }
 0x6ce   :  { %2138 = vst [vmem:[#allocation9 + $0x10] sm:$0xff] %v2130_v28  ;;  %2139 = vst [vmem:[#allocation9 + $0x18] sm:$0xff] %v2131_v19  ;;  %v2159_v29 = vmul.f32 %v2153_v14, %v3712_v55  ;;  %v2160_v7 = vmul.f32 %v2149_v25, %v3713_v6  ;;  %v2161_v62 = vmul.f32 %v2153_v14, %v3714_v61 }
 0x6cf   :  { %2140 = vst [vmem:[#allocation9 + $0x20] sm:$0xff] %v2132_v60  ;;  %2141 = vst [vmem:[#allocation9 + $0x28] sm:$0xff] %v2133_v44  ;;  %v2162_v30 = vmul.f32 %v2149_v25, %v3715_v43  ;;  %v2163_v15 = vmul.f32 %v2153_v14, %v3716_v35 }
 0x6d0   :  { %2142 = vst [vmem:[#allocation9 + $0x30] sm:$0xff] %v2134_v9  ;;  %2143 = vst [vmem:[#allocation9 + $0x38] sm:$0xff] %v2135_v16 }
 0x6d1   :  { %2165 = vst [vmem:[#allocation9 + $0x40] sm:$0xff] %v2156_v42  ;;  %2166 = vst [vmem:[#allocation9 + $0x48] sm:$0xff] %v2157_v51 }
 0x6d2   :  { %2167 = vst [vmem:[#allocation9 + $0x50] sm:$0xff] %v2158_v52  ;;  %2168 = vst [vmem:[#allocation9 + $0x58] sm:$0xff] %v2159_v29 }
 0x6d3   :  { %2169 = vst [vmem:[#allocation9 + $0x60] sm:$0xff] %v2160_v7  ;;  %2170 = vst [vmem:[#allocation9 + $0x68] sm:$0xff] %v2161_v62 }
 0x6d4   :  { %2171 = vst [vmem:[#allocation9 + $0x70] sm:$0xff] %v2162_v30  ;;  %2172 = vst [vmem:[#allocation9 + $0x78] sm:$0xff] %v2163_v15 }
 0x6d5   :  { %2540 = shalt.err (!%p2537_p0)
}
 0x6d6   :  { %s3717_s26 = smov 16   ;;  %s3718_s12 = smov 256  }
 0x6d7   :  { %2184 = dma.vmem_to_hbm [thread:$0]  %s2179_s17, 2048, %s3630_s5, [#allocation6], %s3718_s12, %s3718_s12, %s3717_s26  }
 0x6d8   :  { %2553 = dma.done.wait [#allocation6], 2048  }
 0x6d9   :  { %2554 = vsyncadd [#allocation6], 4294965248 }
 0x6da   :  { %2188 = vsyncpa [#allocation5], 1 }
 0x6db   :  { %2189 = vsyncpa [#allocation6], 1 }
 0x6dc   :  { %2190 = vsyncpa [#allocation7], 1 }

</bundles_post_ra>
